<compile_context>
chip_gen: v7x
topology: tpu7x:2x2x1
jax: 0.10.0
libtpu: 0.0.40
codegen_flags: <defaults>
</compile_context>

<pallas_src>
import functools

import jax
import jax.numpy as jnp
import numpy as np
from jax import lax
from jax.experimental import pallas as pl
from jax.experimental.pallas import tpu as pltpu


# ----------------------------- kernel -------------------------------------


def _layer_norm(x, gamma, beta, true_d, eps=1e-8):
    # Padded feature columns are exactly zero, so sums over the padded width
    # equal sums over the true D; divide by the true D (masked statistics).
    inv_d = jnp.float32(1.0 / true_d)
    mean = jnp.sum(x, axis=-1, keepdims=True) * inv_d
    ex2 = jnp.sum(x * x, axis=-1, keepdims=True) * inv_d
    var = jnp.maximum(ex2 - mean * mean, 0.0)
    # gamma/beta are zero in padded columns, so padded columns stay exactly 0.
    return (x - mean) * lax.rsqrt(var + eps) * gamma + beta


def sasrec_kernel(
    x_ref, tmask_ref,
    attn_ln_g_ref, attn_ln_b_ref,
    q_w_ref, q_b_ref,
    kv_w_ref, kv_b_ref,
    out_w_ref, out_b_ref,
    fwd_ln_g_ref, fwd_ln_b_ref,
    c1_w_ref, c1_b_ref,
    c2_w_ref, c2_b_ref,
    last_ln_g_ref, last_ln_b_ref,
    out_ref,
    *, n_blocks, n_heads, d_pad, d_true, batch_tile, seq_len,
):
    Bt, L, Dp, H = batch_tile, seq_len, d_pad, n_heads
    M = Bt * L
    dhp = Dp // H

    # Flatten the batch tile so projections / FFN see M = Bt*L matmul rows.
    x = x_ref[...].reshape(M, Dp)              # f32 activations (lane-dense Dp)
    tmask = tmask_ref[...].reshape(M, 1)       # f32, 1.0 where seq != 0

    # Causal mask built in-kernel (saves L^2*4B of HBM traffic and a VMEM
    # buffer); broadcast once so it is not re-materialized per head/per block.
    row = lax.broadcasted_iota(jnp.int32, (L, L), 0)
    col = lax.broadcasted_iota(jnp.int32, (L, L), 1)
    causal = jnp.where(col > row, jnp.float32(-1e30), jnp.float32(0.0))
    causal_b = jnp.broadcast_to(causal[None, :, :], (Bt, L, L))

    def block_body(blk, x):
        # ---------------- attention sub-layer ----------------------------
        h = _layer_norm(x, attn_ln_g_ref[blk], attn_ln_b_ref[blk], d_true)

        h16 = h.astype(jnp.bfloat16)
        x16 = x.astype(jnp.bfloat16)
        # Q from the normalized embeddings (1/sqrt(dh) scale pre-folded into
        # the weights/bias), fused K|V from the raw embeddings.
        q = jnp.dot(h16, q_w_ref[blk],
                    preferred_element_type=jnp.float32) + q_b_ref[blk]
        kv = jnp.dot(x16, kv_w_ref[blk],
                     preferred_element_type=jnp.float32) + kv_b_ref[blk]
        k = kv[:, :Dp]
        v = kv[:, Dp:]

        out_w = out_w_ref[blk]                 # (Dp, Dp) bf16, (in, out) layout
        attn = None
        # TODO(synk): benchmark one full-K (M,Dp)@(Dp,Dp) out-proj (concat of
        # per-head o) and a single fused head einsum vs this per-head
        # accumulation on v6e/v7x.
        for hd in range(H):                    # small static head loop
            sl = slice(hd * dhp, (hd + 1) * dhp)
            qh = q[:, sl].reshape(Bt, L, dhp).astype(jnp.bfloat16)
            kh = k[:, sl].reshape(Bt, L, dhp).astype(jnp.bfloat16)
            vh = v[:, sl].reshape(Bt, L, dhp).astype(jnp.bfloat16)
            s = jnp.einsum("bqd,bkd->bqk", qh, kh,
                           preferred_element_type=jnp.float32)
            s = s + causal_b                   # hoisted broadcast, f32
            s = s - jnp.max(s, axis=-1, keepdims=True)
            p = jnp.exp(s)
            p = p * pl.reciprocal(jnp.sum(p, axis=-1, keepdims=True), approx=True)
            o = jnp.einsum("bqk,bkd->bqd", p.astype(jnp.bfloat16), vh,
                           preferred_element_type=jnp.float32)
            contrib = jnp.dot(o.reshape(M, dhp).astype(jnp.bfloat16),
                              out_w[sl, :], preferred_element_type=jnp.float32)
            attn = contrib if attn is None else attn + contrib
        attn = attn + out_b_ref[blk]

        x = h + attn                           # residual onto normalized emb

        # ---------------- point-wise feed-forward ------------------------
        xn = _layer_norm(x, fwd_ln_g_ref[blk], fwd_ln_b_ref[blk], d_true)
        y = jnp.dot(xn.astype(jnp.bfloat16), c1_w_ref[blk],
                    preferred_element_type=jnp.float32) + c1_b_ref[blk]
        y = jnp.maximum(y, 0.0)
        # bf16 cast here is the key FLOP-path fix (bf16 x bf16 MXU matmul).
        y = jnp.dot(y.astype(jnp.bfloat16), c2_w_ref[blk],
                    preferred_element_type=jnp.float32) + c2_b_ref[blk]
        x = (xn + y) * tmask                   # FFN residual + timeline mask
        return x

    x = lax.fori_loop(0, n_blocks, block_body, x)
    x = _layer_norm(x, last_ln_g_ref[...], last_ln_b_ref[...], d_true)
    out_ref[...] = x.reshape(Bt, L, Dp).astype(out_ref.dtype)   # bf16 store


# ----------------------------- wrapper -------------------------------------


def _round_up(x, m):
    return (x + m - 1) // m * m


def _choose_batch_tile(batch, seq_len, target_rows=512):
    """Largest divisor of `batch` giving ~target_rows matmul rows, keeping
    >= 2 grid steps and preferring an even step count (v7x megacore balance)."""
    limit = max(1, target_rows // max(seq_len, 1))
    if batch >= 2:
        limit = min(limit, max(1, batch // 2))
    divisors = [d for d in range(1, batch + 1) if batch % d == 0 and d <= limit]
    if not divisors:
        return 1
    even = [d for d in divisors if (batch // d) % 2 == 0]
    pool = even if even else divisors
    return max(pool)


def _vmem_capacity_bytes(default=64 * 1024 * 1024):
    try:
        info = pltpu.get_tpu_info()
        for name in ("vmem_capacity_bytes", "vmem_size_bytes", "vmem_bytes"):
            v = getattr(info, name, None)
            if v:
                return int(v)
    except Exception:
        pass
    return default


def _pick_vmem_limit(packed, Bt, L, Dp):
    """Size vmem_limit_bytes from the actual footprint, capped at ~85% of the
    physical VMEM (leaves headroom; never asks below 32 MiB)."""
    weight_bytes = sum(int(np.prod(w.shape)) * w.dtype.itemsize for w in packed)
    act_in = 2 * Bt * L * Dp * 4           # double-buffered f32 activations
    mask_in = 2 * Bt * L * 4
    out_buf = 2 * Bt * L * Dp * 2          # double-buffered bf16 output
    live = 8 * Bt * L * Dp * 4 + 4 * Bt * L * L * 4   # temps + score tensors
    need = weight_bytes + act_in + mask_in + out_buf + live
    cap = _vmem_capacity_bytes()
    return int(min(max(int(need * 1.5), 32 * 1024 * 1024), int(cap * 0.85)))


def _pack_params(params, Dp):
    """Pre-transpose weights to (in, out) layout, fuse K|V, fold the attention
    scale into Q, zero-pad the model dim to Dp lanes (per-head padding for the
    head-concat axes), and cast matmul weights to bf16.  Per-block vectors are
    shaped (n_blocks, 1, dim) so they can be dynamically indexed in-kernel."""
    f32, bf16 = jnp.float32, jnp.bfloat16
    D = params["emb_size"]
    H = params["n_heads"]
    NB = params["n_blocks"]
    dh = D // H
    dhp = Dp // H
    scale = jnp.float32(1.0 / np.sqrt(dh))

    t = lambda w: jnp.transpose(w, (0, 2, 1))          # (NB,out,in) -> (NB,in,out)

    def pad_cols(w, new):                               # pad last (output) dim
        return jnp.pad(w, ((0, 0), (0, 0), (0, new - w.shape[-1])))

    def pad_rows(w, new):                               # pad input dim
        return jnp.pad(w, ((0, 0), (0, new - w.shape[1]), (0, 0)))

    def pad_head_cols(w):                               # pad each head's dh -> dhp
        lead = w.shape[:-1]
        w = w.reshape(*lead, H, dh)
        w = jnp.pad(w, [(0, 0)] * (w.ndim - 1) + [(0, dhp - dh)])
        return w.reshape(*lead, H * dhp)

    def pad_vec(v, new):                                # (NB, D) -> (NB, new)
        return jnp.pad(v, ((0, 0), (0, new - v.shape[-1])))

    # Q projection: fold the 1/sqrt(dh) attention scale into weights + bias.
    q_w = pad_rows(pad_head_cols(t(params["in_proj_w"][:, 0]) * scale), Dp)
    q_b = pad_head_cols(params["in_proj_b"][:, 0] * scale)
    k_w = pad_rows(pad_head_cols(t(params["in_proj_w"][:, 1])), Dp)
    v_w = pad_rows(pad_head_cols(t(params["in_proj_w"][:, 2])), Dp)
    kv_w = jnp.concatenate([k_w, v_w], axis=-1)          # (NB, Dp, 2Dp)
    kv_b = jnp.concatenate([pad_head_cols(params["in_proj_b"][:, 1]),
                            pad_head_cols(params["in_proj_b"][:, 2])], axis=-1)

    # Out-proj: input axis is head-concat space -> per-head row padding.
    ow = t(params["out_proj_w"])                          # (NB, D(heads), D(model))
    ow = ow.reshape(NB, H, dh, D)
    ow = jnp.pad(ow, ((0, 0), (0, 0), (0, dhp - dh), (0, 0)))
    ow = ow.reshape(NB, H * dhp, D)
    out_w = pad_cols(ow, Dp)

    c1_w = pad_cols(pad_rows(t(params["conv1_w"]), Dp), Dp)
    c2_w = pad_cols(pad_rows(t(params["conv2_w"]), Dp), Dp)

    return [
        pad_vec(params["attn_ln_g"], Dp)[:, None, :].astype(f32),
        pad_vec(params["attn_ln_b"], Dp)[:, None, :].astype(f32),
        q_w.astype(bf16), q_b[:, None, :].astype(f32),
        kv_w.astype(bf16), kv_b[:, None, :].astype(f32),
        out_w.astype(bf16),
        pad_vec(params["out_proj_b"], Dp)[:, None, :].astype(f32),
        pad_vec(params["fwd_ln_g"], Dp)[:, None, :].astype(f32),
        pad_vec(params["fwd_ln_b"], Dp)[:, None, :].astype(f32),
        c1_w.astype(bf16),
        pad_vec(params["conv1_b"], Dp)[:, None, :].astype(f32),
        c2_w.astype(bf16),
        pad_vec(params["conv2_b"], Dp)[:, None, :].astype(f32),
        pad_vec(params["last_ln_g"], Dp).astype(f32),
        pad_vec(params["last_ln_b"], Dp).astype(f32),
    ]


def sasrec_forward(params, seq, pos, batch_tile=None):
    """Embedding lookup + masks in plain JAX, transformer stack in Pallas."""
    D = params["emb_size"]
    NB = params["n_blocks"]
    H = params["n_heads"]
    B, L = seq.shape
    assert D % H == 0

    # Pad the model dim to a lane-dense multiple of 128 (divisible by H).
    Dp = _round_up(D, 128)
    while Dp % H:
        Dp += 128

    # TODO(synk): emb_dropout / attn dropout / FFN dropout are identity (eval mode).
    x = params["item_emb"][seq] * jnp.float32(D) ** 0.5 + params["pos_emb"][pos]
    tmask = (seq != 0).astype(jnp.float32)[..., None]                 # (B, L, 1)
    x = x * tmask
    x = jnp.pad(x, ((0, 0), (0, 0), (0, Dp - D))).astype(jnp.float32)  # (B, L, Dp)

    if batch_tile is None:
        batch_tile = _choose_batch_tile(B, L)
    Bt = batch_tile
    assert B % Bt == 0, (B, Bt)

    packed = _pack_params(params, Dp)
    vmem_bytes = _pick_vmem_limit(packed, Bt, L, Dp)
    kernel = functools.partial(
        sasrec_kernel, n_blocks=NB, n_heads=H,
        d_pad=Dp, d_true=D, batch_tile=Bt, seq_len=L)

    def const_spec(shape, single_buffer):
        zeros = (0,) * len(shape)
        if single_buffer:
            # Constant index map -> DMA'd once; single-buffered so all-blocks
            # resident weights fit v7x's 64 MiB VMEM.
            return pl.BlockSpec(shape, lambda b, _z=zeros: _z,
                                pipeline_mode=pl.Buffered(1))
        return pl.BlockSpec(shape, lambda b, _z=zeros: _z)

    def build(single_buffer_weights):
        in_specs = [
            pl.BlockSpec((Bt, L, Dp), lambda b: (b, 0, 0)),   # activations
            pl.BlockSpec((Bt, L, 1), lambda b: (b, 0, 0)),    # timeline mask
        ] + [const_spec(w.shape, single_buffer_weights) for w in packed]
        return pl.pallas_call(
            kernel,
            out_shape=jax.ShapeDtypeStruct((B, L, Dp), jnp.bfloat16),
            grid_spec=pltpu.PrefetchScalarGridSpec(
                num_scalar_prefetch=0,
                grid=(B // Bt,),
                in_specs=in_specs,
                out_specs=pl.BlockSpec((Bt, L, Dp), lambda b: (b, 0, 0)),
            ),
            compiler_params=pltpu.CompilerParams(
                dimension_semantics=("parallel",),
                vmem_limit_bytes=vmem_bytes,
            ),
        )

    use_single_buffer = hasattr(pl, "Buffered")
    try:
        out = jax.block_until_ready(build(use_single_buffer)(x, tmask, *packed))
    except Exception:
        if not use_single_buffer:
            raise
        # Fallback: default double-buffered constant weights (still correct).
        out = jax.block_until_ready(build(False)(x, tmask, *packed))

    return out[:, :, :D].astype(jnp.float32)


# ----------------------------- reference (plain JAX) ------------------------
# Mirrors the kernel's numerics contract: bf16 matmul operands, f32
# accumulation, f32 LayerNorm / softmax / masking.


def sasrec_reference(params, seq, pos):
    D = params["emb_size"]
    NB = params["n_blocks"]
    H = params["n_heads"]
    dh = D // H
    B, L = seq.shape
    f32, bf16 = jnp.float32, jnp.bfloat16

    def ln(x, g, b, eps=1e-8):
        m = x.mean(-1, keepdims=True)
        v = ((x - m) ** 2).mean(-1, keepdims=True)
        return (x - m) / jnp.sqrt(v + eps) * g + b

    def mm(a, w_t):  # bf16 operands, f32 accumulation
        return jnp.einsum("...k,kn->...n", a.astype(bf16), w_t.astype(bf16),
                          preferred_element_type=f32)

    x = params["item_emb"][seq] * f32(D) ** 0.5 + params["pos_emb"][pos]
    tmask = (seq != 0).astype(f32)[..., None]
    x = x * tmask
    causal = jnp.where(jnp.triu(jnp.ones((L, L)), k=1) > 0, -1e30, 0.0).astype(f32)

    for blk in range(NB):
        h = ln(x, params["attn_ln_g"][blk], params["attn_ln_b"][blk])
        wq, wk, wv = params["in_proj_w"][blk]
        bq, bk, bv = params["in_proj_b"][blk]
        q = mm(h, wq.T) + bq
        k = mm(x, wk.T) + bk
        v = mm(x, wv.T) + bv

        qh = q.reshape(B, L, H, dh)
        kh = k.reshape(B, L, H, dh)
        vh = v.reshape(B, L, H, dh)
        s = jnp.einsum("bqhd,bkhd->bhqk", qh.astype(bf16), kh.astype(bf16),
                       preferred_element_type=f32) / jnp.sqrt(f32(dh))
        s = s + causal
        p = jax.nn.softmax(s, axis=-1)
        o = jnp.einsum("bhqk,bkhd->bqhd", p.astype(bf16), vh.astype(bf16),
                       preferred_element_type=f32).reshape(B, L, D)
        attn = mm(o, params["out_proj_w"][blk].T) + params["out_proj_b"][blk]
        x = h + attn

        xn = ln(x, params["fwd_ln_g"][blk], params["fwd_ln_b"][blk])
        y = jax.nn.relu(mm(xn, params["conv1_w"][blk].T) + params["conv1_b"][blk])
        y = mm(y, params["conv2_w"][blk].T) + params["conv2_b"][blk]
        x = (xn + y) * tmask

    return ln(x, params["last_ln_g"][0], params["last_ln_b"][0])


# ----------------------------- params --------------------------------------


def init_params(key, item_num, emb_size, max_len, n_blocks, n_heads):
    D = emb_size

    def xavier(k, shape):
        bound = np.sqrt(6.0 / (shape[-1] + shape[-2]))
        return jax.random.uniform(k, shape, jnp.float32, -bound, bound)

    keys = jax.random.split(key, 8)
    return {
        "emb_size": D,
        "n_blocks": n_blocks,
        "n_heads": n_heads,
        "item_emb": xavier(keys[0], (item_num + 1, D)),
        "pos_emb": xavier(keys[1], (max_len + 1, D)),
        "attn_ln_g": jnp.ones((n_blocks, D), jnp.float32),
        "attn_ln_b": jnp.zeros((n_blocks, D), jnp.float32),
        "in_proj_w": xavier(keys[2], (n_blocks, 3, D, D)),
        "in_proj_b": 0.01 * jax.random.normal(keys[3], (n_blocks, 3, D), jnp.float32),
        "out_proj_w": xavier(keys[4], (n_blocks, D, D)),
        "out_proj_b": jnp.zeros((n_blocks, D), jnp.float32),
        "fwd_ln_g": jnp.ones((n_blocks, D), jnp.float32),
        "fwd_ln_b": jnp.zeros((n_blocks, D), jnp.float32),
        "conv1_w": xavier(keys[5], (n_blocks, D, D)),
        "conv1_b": 0.01 * jax.random.normal(keys[6], (n_blocks, D), jnp.float32),
        "conv2_w": xavier(keys[7], (n_blocks, D, D)),
        "conv2_b": jnp.zeros((n_blocks, D), jnp.float32),
        "last_ln_g": jnp.ones((1, D), jnp.float32),
        "last_ln_b": jnp.zeros((1, D), jnp.float32),
    }


# ----------------------------- main -----------------------------------------

if __name__ == "__main__":
    B, L = 8, 8            # batch, max_len (sequence length)
    emb_size = 32
    n_blocks = 2
    n_heads = 2
    item_num = 50

    key = jax.random.PRNGKey(0)
    kp, ks = jax.random.split(key)
    params = init_params(kp, item_num, emb_size, L, n_blocks, n_heads)

    seq = jax.random.randint(ks, (B, L), 1, item_num + 1, dtype=jnp.int32)
    seq = seq.at[:, :2].set(0)                       # left padding -> timeline mask
    pos = jnp.tile(jnp.arange(1, L + 1, dtype=jnp.int32)[None, :], (B, 1))

    out = jax.block_until_ready(sasrec_forward(params, seq, pos))
    ref = jax.block_until_ready(sasrec_reference(params, seq, pos))

    # bf16 matmul operands (f32 accumulation) in both kernel and reference;
    # tolerance covers the approx-reciprocal softmax, the bf16 output store
    # and accumulation-order differences.
    np.testing.assert_allclose(np.asarray(out), np.asarray(ref), rtol=2e-2, atol=2e-2)

    print("KERNEL_OK")
</pallas_src>

<mosaic_0001>
module attributes {stable_mosaic.version = 11 : i64} {
  func.func @sasrec_kernel(%arg0: i32, %arg1: memref<4x8x128xf32, #tpu.memory_space<vmem>>, %arg2: memref<4x8x1xf32, #tpu.memory_space<vmem>>, %arg3: memref<2x1x128xf32, #tpu.memory_space<vmem>>, %arg4: memref<2x1x128xf32, #tpu.memory_space<vmem>>, %arg5: memref<2x128x128xbf16, #tpu.memory_space<vmem>>, %arg6: memref<2x1x128xf32, #tpu.memory_space<vmem>>, %arg7: memref<2x128x256xbf16, #tpu.memory_space<vmem>>, %arg8: memref<2x1x256xf32, #tpu.memory_space<vmem>>, %arg9: memref<2x128x128xbf16, #tpu.memory_space<vmem>>, %arg10: memref<2x1x128xf32, #tpu.memory_space<vmem>>, %arg11: memref<2x1x128xf32, #tpu.memory_space<vmem>>, %arg12: memref<2x1x128xf32, #tpu.memory_space<vmem>>, %arg13: memref<2x128x128xbf16, #tpu.memory_space<vmem>>, %arg14: memref<2x1x128xf32, #tpu.memory_space<vmem>>, %arg15: memref<2x128x128xbf16, #tpu.memory_space<vmem>>, %arg16: memref<2x1x128xf32, #tpu.memory_space<vmem>>, %arg17: memref<1x128xf32, #tpu.memory_space<vmem>>, %arg18: memref<1x128xf32, #tpu.memory_space<vmem>>, %arg19: memref<4x8x128xbf16, #tpu.memory_space<vmem>>) attributes {dimension_semantics = [#tpu.dimension_semantics<parallel>], iteration_bounds = array<i64: 2>, scalar_prefetch = 0 : i64, scratch_operands = 0 : i64, tpu.core_type = #tpu.core_type<tc>, window_params = [{transform_indices = @transform_0, window_bounds = array<i64: 4, 8, 128>}, {transform_indices = @transform_1, window_bounds = array<i64: 4, 8, 1>}, {pipeline_mode = #tpu.pipeline_mode<synchronous>, transform_indices = @transform_2, window_bounds = array<i64: 2, 1, 128>}, {pipeline_mode = #tpu.pipeline_mode<synchronous>, transform_indices = @transform_3, window_bounds = array<i64: 2, 1, 128>}, {pipeline_mode = #tpu.pipeline_mode<synchronous>, transform_indices = @transform_4, window_bounds = array<i64: 2, 128, 128>}, {pipeline_mode = #tpu.pipeline_mode<synchronous>, transform_indices = @transform_5, window_bounds = array<i64: 2, 1, 128>}, {pipeline_mode = #tpu.pipeline_mode<synchronous>, transform_indices = @transform_6, window_bounds = array<i64: 2, 128, 256>}, {pipeline_mode = #tpu.pipeline_mode<synchronous>, transform_indices = @transform_7, window_bounds = array<i64: 2, 1, 256>}, {pipeline_mode = #tpu.pipeline_mode<synchronous>, transform_indices = @transform_8, window_bounds = array<i64: 2, 128, 128>}, {pipeline_mode = #tpu.pipeline_mode<synchronous>, transform_indices = @transform_9, window_bounds = array<i64: 2, 1, 128>}, {pipeline_mode = #tpu.pipeline_mode<synchronous>, transform_indices = @transform_10, window_bounds = array<i64: 2, 1, 128>}, {pipeline_mode = #tpu.pipeline_mode<synchronous>, transform_indices = @transform_11, window_bounds = array<i64: 2, 1, 128>}, {pipeline_mode = #tpu.pipeline_mode<synchronous>, transform_indices = @transform_12, window_bounds = array<i64: 2, 128, 128>}, {pipeline_mode = #tpu.pipeline_mode<synchronous>, transform_indices = @transform_13, window_bounds = array<i64: 2, 1, 128>}, {pipeline_mode = #tpu.pipeline_mode<synchronous>, transform_indices = @transform_14, window_bounds = array<i64: 2, 128, 128>}, {pipeline_mode = #tpu.pipeline_mode<synchronous>, transform_indices = @transform_15, window_bounds = array<i64: 2, 1, 128>}, {pipeline_mode = #tpu.pipeline_mode<synchronous>, transform_indices = @transform_16, window_bounds = array<i64: 1, 128>}, {pipeline_mode = #tpu.pipeline_mode<synchronous>, transform_indices = @transform_17, window_bounds = array<i64: 1, 128>}, {transform_indices = @transform_18, window_bounds = array<i64: 4, 8, 128>}]} {
    %c0 = arith.constant 0 : index
    %c0_0 = arith.constant 0 : index
    %c0_1 = arith.constant 0 : index
    %0 = vector.load %arg1[%c0, %c0_0, %c0_1] : memref<4x8x128xf32, #tpu.memory_space<vmem>>, vector<4x8x128xf32>
    %1 = vector.shape_cast %0 : vector<4x8x128xf32> to vector<32x128xf32>
    %c0_2 = arith.constant 0 : index
    %c0_3 = arith.constant 0 : index
    %c0_4 = arith.constant 0 : index
    %2 = vector.load %arg2[%c0_2, %c0_3, %c0_4] : memref<4x8x1xf32, #tpu.memory_space<vmem>>, vector<4x8x1xf32>
    %3 = vector.shape_cast %2 : vector<4x8x1xf32> to vector<32x1xf32>
    %4 = tpu.iota {dimensions = array<i32: 0>} : vector<8x8xi32>
    %5 = tpu.iota {dimensions = array<i32: 1>} : vector<8x8xi32>
    %6 = arith.cmpi sgt, %5, %4 : vector<8x8xi32>
    %cst = arith.constant -1.000000e+30 : f32
    %cst_5 = arith.constant 0.000000e+00 : f32
    %7 = vector.broadcast %cst : f32 to vector<8x8xf32>
    %8 = vector.broadcast %cst_5 : f32 to vector<8x8xf32>
    %9 = arith.select %6, %7, %8 : vector<8x8xi1>, vector<8x8xf32>
    %10 = vector.shape_cast %9 : vector<8x8xf32> to vector<1x8x8xf32>
    %11 = vector.shape_cast %10 : vector<1x8x8xf32> to vector<1x8x8xf32>
    %12 = vector.broadcast %11 : vector<1x8x8xf32> to vector<4x8x8xf32>
    %c0_i32 = arith.constant 0 : i32
    %c2_i32 = arith.constant 2 : i32
    %13 = arith.addi %c0_i32, %c2_i32 : i32
    %c1_i32 = arith.constant 1 : i32
    %14 = scf.for %arg20 = %c0_i32 to %13 step %c1_i32 iter_args(%arg21 = %1) -> (vector<32x128xf32>)  : i32 {
      %44 = arith.index_cast %arg20 : i32 to index
      %c0_20 = arith.constant 0 : index
      %c0_21 = arith.constant 0 : index
      %45 = vector.load %arg3[%44, %c0_20, %c0_21] : memref<2x1x128xf32, #tpu.memory_space<vmem>>, vector<1x1x128xf32>
      %46 = vector.shape_cast %45 : vector<1x1x128xf32> to vector<1x128xf32>
      %47 = arith.index_cast %arg20 : i32 to index
      %c0_22 = arith.constant 0 : index
      %c0_23 = arith.constant 0 : index
      %48 = vector.load %arg4[%47, %c0_22, %c0_23] : memref<2x1x128xf32, #tpu.memory_space<vmem>>, vector<1x1x128xf32>
      %49 = vector.shape_cast %48 : vector<1x1x128xf32> to vector<1x128xf32>
      %cst_24 = arith.constant dense<0.000000e+00> : vector<32xf32>
      %50 = vector.multi_reduction <add>, %arg21, %cst_24 [1] : vector<32x128xf32> to vector<32xf32>
      %51 = vector.shape_cast %50 : vector<32xf32> to vector<32x1xf32>
      %cst_25 = arith.constant 3.125000e-02 : f32
      %52 = vector.broadcast %cst_25 : f32 to vector<32x1xf32>
      %53 = arith.mulf %51, %52 : vector<32x1xf32>
      %54 = arith.mulf %arg21, %arg21 : vector<32x128xf32>
      %cst_26 = arith.constant dense<0.000000e+00> : vector<32xf32>
      %55 = vector.multi_reduction <add>, %54, %cst_26 [1] : vector<32x128xf32> to vector<32xf32>
      %56 = vector.shape_cast %55 : vector<32xf32> to vector<32x1xf32>
      %cst_27 = arith.constant 3.125000e-02 : f32
      %57 = vector.broadcast %cst_27 : f32 to vector<32x1xf32>
      %58 = arith.mulf %56, %57 : vector<32x1xf32>
      %59 = arith.mulf %53, %53 : vector<32x1xf32>
      %60 = arith.subf %58, %59 : vector<32x1xf32>
      %cst_28 = arith.constant 0.000000e+00 : f32
      %61 = vector.broadcast %cst_28 : f32 to vector<32x1xf32>
      %62 = arith.maximumf %60, %61 : vector<32x1xf32>
      %63 = vector.broadcast %53 : vector<32x1xf32> to vector<32x128xf32>
      %64 = arith.subf %arg21, %63 : vector<32x128xf32>
      %cst_29 = arith.constant 9.99999993E-9 : f32
      %65 = vector.broadcast %cst_29 : f32 to vector<32x1xf32>
      %66 = arith.addf %62, %65 : vector<32x1xf32>
      %67 = math.rsqrt %66 : vector<32x1xf32>
      %68 = vector.broadcast %67 : vector<32x1xf32> to vector<32x128xf32>
      %69 = arith.mulf %64, %68 : vector<32x128xf32>
      %70 = vector.broadcast %46 : vector<1x128xf32> to vector<32x128xf32>
      %71 = arith.mulf %69, %70 : vector<32x128xf32>
      %72 = vector.broadcast %49 : vector<1x128xf32> to vector<32x128xf32>
      %73 = arith.addf %71, %72 : vector<32x128xf32>
      %74 = arith.truncf %73 : vector<32x128xf32> to vector<32x128xbf16>
      %75 = arith.truncf %arg21 : vector<32x128xf32> to vector<32x128xbf16>
      %76 = arith.index_cast %arg20 : i32 to index
      %c0_30 = arith.constant 0 : index
      %c0_31 = arith.constant 0 : index
      %77 = vector.load %arg5[%76, %c0_30, %c0_31] : memref<2x128x128xbf16, #tpu.memory_space<vmem>>, vector<1x128x128xbf16>
      %78 = vector.shape_cast %77 : vector<1x128x128xbf16> to vector<128x128xbf16>
      %cst_32 = arith.constant dense<0.000000e+00> : vector<32x128xf32>
      %79 = tpu.matmul %74, %78, %cst_32 {dimension_numbers = #tpu.dot_dimension_numbers<[1], [0], [0], [1], [0, 0, 1, 1], [], []>} : vector<32x128xbf16>, vector<128x128xbf16>, vector<32x128xf32> -> vector<32x128xf32>
      %80 = arith.index_cast %arg20 : i32 to index
      %c0_33 = arith.constant 0 : index
      %c0_34 = arith.constant 0 : index
      %81 = vector.load %arg6[%80, %c0_33, %c0_34] : memref<2x1x128xf32, #tpu.memory_space<vmem>>, vector<1x1x128xf32>
      %82 = vector.shape_cast %81 : vector<1x1x128xf32> to vector<1x128xf32>
      %83 = vector.broadcast %82 : vector<1x128xf32> to vector<32x128xf32>
      %84 = arith.addf %79, %83 : vector<32x128xf32>
      %85 = arith.index_cast %arg20 : i32 to index
      %c0_35 = arith.constant 0 : index
      %c0_36 = arith.constant 0 : index
      %86 = vector.load %arg7[%85, %c0_35, %c0_36] : memref<2x128x256xbf16, #tpu.memory_space<vmem>>, vector<1x128x256xbf16>
      %87 = vector.shape_cast %86 : vector<1x128x256xbf16> to vector<128x256xbf16>
      %cst_37 = arith.constant dense<0.000000e+00> : vector<32x256xf32>
      %88 = tpu.matmul %75, %87, %cst_37 {dimension_numbers = #tpu.dot_dimension_numbers<[1], [0], [0], [1], [0, 0, 1, 1], [], []>} : vector<32x128xbf16>, vector<128x256xbf16>, vector<32x256xf32> -> vector<32x256xf32>
      %89 = arith.index_cast %arg20 : i32 to index
      %c0_38 = arith.constant 0 : index
      %c0_39 = arith.constant 0 : index
      %90 = vector.load %arg8[%89, %c0_38, %c0_39] : memref<2x1x256xf32, #tpu.memory_space<vmem>>, vector<1x1x256xf32>
      %91 = vector.shape_cast %90 : vector<1x1x256xf32> to vector<1x256xf32>
      %92 = vector.broadcast %91 : vector<1x256xf32> to vector<32x256xf32>
      %93 = arith.addf %88, %92 : vector<32x256xf32>
      %94 = vector.extract_strided_slice %93 {offsets = [0, 0], sizes = [32, 128], strides = [1, 1]} : vector<32x256xf32> to vector<32x128xf32>
      %95 = vector.extract_strided_slice %93 {offsets = [0, 128], sizes = [32, 128], strides = [1, 1]} : vector<32x256xf32> to vector<32x128xf32>
      %96 = arith.index_cast %arg20 : i32 to index
      %c0_40 = arith.constant 0 : index
      %c0_41 = arith.constant 0 : index
      %97 = vector.load %arg9[%96, %c0_40, %c0_41] : memref<2x128x128xbf16, #tpu.memory_space<vmem>>, vector<1x128x128xbf16>
      %98 = vector.shape_cast %97 : vector<1x128x128xbf16> to vector<128x128xbf16>
      %99 = vector.extract_strided_slice %84 {offsets = [0, 0], sizes = [32, 64], strides = [1, 1]} : vector<32x128xf32> to vector<32x64xf32>
      %100 = vector.shape_cast %99 : vector<32x64xf32> to vector<4x8x64xf32>
      %101 = arith.truncf %100 : vector<4x8x64xf32> to vector<4x8x64xbf16>
      %102 = vector.extract_strided_slice %94 {offsets = [0, 0], sizes = [32, 64], strides = [1, 1]} : vector<32x128xf32> to vector<32x64xf32>
      %103 = vector.shape_cast %102 : vector<32x64xf32> to vector<4x8x64xf32>
      %104 = arith.truncf %103 : vector<4x8x64xf32> to vector<4x8x64xbf16>
      %105 = vector.extract_strided_slice %95 {offsets = [0, 0], sizes = [32, 64], strides = [1, 1]} : vector<32x128xf32> to vector<32x64xf32>
      %106 = vector.shape_cast %105 : vector<32x64xf32> to vector<4x8x64xf32>
      %107 = arith.truncf %106 : vector<4x8x64xf32> to vector<4x8x64xbf16>
      "tpu.trace_start"() <{level = 10 : i32, message = "bqd,bkd->bqk"}> : () -> ()
      %cst_42 = arith.constant dense<0.000000e+00> : vector<4x8x8xf32>
      %108 = tpu.matmul %101, %104, %cst_42 {dimension_numbers = #tpu.dot_dimension_numbers<[2], [2], [1], [1], [0, 0, 0, 1, 1, 1], [0], [0]>} : vector<4x8x64xbf16>, vector<4x8x64xbf16>, vector<4x8x8xf32> -> vector<4x8x8xf32>
      "tpu.trace_stop"() : () -> ()
      %109 = arith.addf %108, %12 : vector<4x8x8xf32>
      %cst_43 = arith.constant dense<0xFF800000> : vector<4x8xf32>
      %110 = vector.multi_reduction <maximumf>, %109, %cst_43 [2] : vector<4x8x8xf32> to vector<4x8xf32>
      %111 = vector.shape_cast %110 : vector<4x8xf32> to vector<4x8x1xf32>
      %112 = vector.broadcast %111 : vector<4x8x1xf32> to vector<4x8x8xf32>
      %113 = arith.subf %109, %112 : vector<4x8x8xf32>
      %114 = math.exp %113 : vector<4x8x8xf32>
      %cst_44 = arith.constant dense<0.000000e+00> : vector<4x8xf32>
      %115 = vector.multi_reduction <add>, %114, %cst_44 [2] : vector<4x8x8xf32> to vector<4x8xf32>
      %116 = vector.shape_cast %115 : vector<4x8xf32> to vector<4x8x1xf32>
      %117 = tpu.reciprocal %116 {approx = true} : vector<4x8x1xf32> -> vector<4x8x1xf32>
      %118 = vector.broadcast %117 : vector<4x8x1xf32> to vector<4x8x8xf32>
      %119 = arith.mulf %114, %118 : vector<4x8x8xf32>
      %120 = arith.truncf %119 : vector<4x8x8xf32> to vector<4x8x8xbf16>
      "tpu.trace_start"() <{level = 10 : i32, message = "bqk,bkd->bqd"}> : () -> ()
      %cst_45 = arith.constant dense<0.000000e+00> : vector<4x8x64xf32>
      %121 = tpu.matmul %120, %107, %cst_45 {dimension_numbers = #tpu.dot_dimension_numbers<[2], [1], [1], [2], [0, 0, 0, 1, 1, 2], [0], [0]>} : vector<4x8x8xbf16>, vector<4x8x64xbf16>, vector<4x8x64xf32> -> vector<4x8x64xf32>
      "tpu.trace_stop"() : () -> ()
      %122 = vector.shape_cast %121 : vector<4x8x64xf32> to vector<32x64xf32>
      %123 = arith.truncf %122 : vector<32x64xf32> to vector<32x64xbf16>
      %124 = vector.extract_strided_slice %98 {offsets = [0, 0], sizes = [64, 128], strides = [1, 1]} : vector<128x128xbf16> to vector<64x128xbf16>
      %cst_46 = arith.constant dense<0.000000e+00> : vector<32x128xf32>
      %125 = tpu.matmul %123, %124, %cst_46 {dimension_numbers = #tpu.dot_dimension_numbers<[1], [0], [0], [1], [0, 0, 1, 1], [], []>} : vector<32x64xbf16>, vector<64x128xbf16>, vector<32x128xf32> -> vector<32x128xf32>
      %126 = vector.extract_strided_slice %84 {offsets = [0, 64], sizes = [32, 64], strides = [1, 1]} : vector<32x128xf32> to vector<32x64xf32>
      %127 = vector.shape_cast %126 : vector<32x64xf32> to vector<4x8x64xf32>
      %128 = arith.truncf %127 : vector<4x8x64xf32> to vector<4x8x64xbf16>
      %129 = vector.extract_strided_slice %94 {offsets = [0, 64], sizes = [32, 64], strides = [1, 1]} : vector<32x128xf32> to vector<32x64xf32>
      %130 = vector.shape_cast %129 : vector<32x64xf32> to vector<4x8x64xf32>
      %131 = arith.truncf %130 : vector<4x8x64xf32> to vector<4x8x64xbf16>
      %132 = vector.extract_strided_slice %95 {offsets = [0, 64], sizes = [32, 64], strides = [1, 1]} : vector<32x128xf32> to vector<32x64xf32>
      %133 = vector.shape_cast %132 : vector<32x64xf32> to vector<4x8x64xf32>
      %134 = arith.truncf %133 : vector<4x8x64xf32> to vector<4x8x64xbf16>
      "tpu.trace_start"() <{level = 10 : i32, message = "bqd,bkd->bqk"}> : () -> ()
      %cst_47 = arith.constant dense<0.000000e+00> : vector<4x8x8xf32>
      %135 = tpu.matmul %128, %131, %cst_47 {dimension_numbers = #tpu.dot_dimension_numbers<[2], [2], [1], [1], [0, 0, 0, 1, 1, 1], [0], [0]>} : vector<4x8x64xbf16>, vector<4x8x64xbf16>, vector<4x8x8xf32> -> vector<4x8x8xf32>
      "tpu.trace_stop"() : () -> ()
      %136 = arith.addf %135, %12 : vector<4x8x8xf32>
      %cst_48 = arith.constant dense<0xFF800000> : vector<4x8xf32>
      %137 = vector.multi_reduction <maximumf>, %136, %cst_48 [2] : vector<4x8x8xf32> to vector<4x8xf32>
      %138 = vector.shape_cast %137 : vector<4x8xf32> to vector<4x8x1xf32>
      %139 = vector.broadcast %138 : vector<4x8x1xf32> to vector<4x8x8xf32>
      %140 = arith.subf %136, %139 : vector<4x8x8xf32>
      %141 = math.exp %140 : vector<4x8x8xf32>
      %cst_49 = arith.constant dense<0.000000e+00> : vector<4x8xf32>
      %142 = vector.multi_reduction <add>, %141, %cst_49 [2] : vector<4x8x8xf32> to vector<4x8xf32>
      %143 = vector.shape_cast %142 : vector<4x8xf32> to vector<4x8x1xf32>
      %144 = tpu.reciprocal %143 {approx = true} : vector<4x8x1xf32> -> vector<4x8x1xf32>
      %145 = vector.broadcast %144 : vector<4x8x1xf32> to vector<4x8x8xf32>
      %146 = arith.mulf %141, %145 : vector<4x8x8xf32>
      %147 = arith.truncf %146 : vector<4x8x8xf32> to vector<4x8x8xbf16>
      "tpu.trace_start"() <{level = 10 : i32, message = "bqk,bkd->bqd"}> : () -> ()
      %cst_50 = arith.constant dense<0.000000e+00> : vector<4x8x64xf32>
      %148 = tpu.matmul %147, %134, %cst_50 {dimension_numbers = #tpu.dot_dimension_numbers<[2], [1], [1], [2], [0, 0, 0, 1, 1, 2], [0], [0]>} : vector<4x8x8xbf16>, vector<4x8x64xbf16>, vector<4x8x64xf32> -> vector<4x8x64xf32>
      "tpu.trace_stop"() : () -> ()
      %149 = vector.shape_cast %148 : vector<4x8x64xf32> to vector<32x64xf32>
      %150 = arith.truncf %149 : vector<32x64xf32> to vector<32x64xbf16>
      %151 = vector.extract_strided_slice %98 {offsets = [64, 0], sizes = [64, 128], strides = [1, 1]} : vector<128x128xbf16> to vector<64x128xbf16>
      %cst_51 = arith.constant dense<0.000000e+00> : vector<32x128xf32>
      %152 = tpu.matmul %150, %151, %cst_51 {dimension_numbers = #tpu.dot_dimension_numbers<[1], [0], [0], [1], [0, 0, 1, 1], [], []>} : vector<32x64xbf16>, vector<64x128xbf16>, vector<32x128xf32> -> vector<32x128xf32>
      %153 = arith.addf %125, %152 : vector<32x128xf32>
      %154 = arith.index_cast %arg20 : i32 to index
      %c0_52 = arith.constant 0 : index
      %c0_53 = arith.constant 0 : index
      %155 = vector.load %arg10[%154, %c0_52, %c0_53] : memref<2x1x128xf32, #tpu.memory_space<vmem>>, vector<1x1x128xf32>
      %156 = vector.shape_cast %155 : vector<1x1x128xf32> to vector<1x128xf32>
      %157 = vector.broadcast %156 : vector<1x128xf32> to vector<32x128xf32>
      %158 = arith.addf %153, %157 : vector<32x128xf32>
      %159 = arith.addf %73, %158 : vector<32x128xf32>
      %160 = arith.index_cast %arg20 : i32 to index
      %c0_54 = arith.constant 0 : index
      %c0_55 = arith.constant 0 : index
      %161 = vector.load %arg11[%160, %c0_54, %c0_55] : memref<2x1x128xf32, #tpu.memory_space<vmem>>, vector<1x1x128xf32>
      %162 = vector.shape_cast %161 : vector<1x1x128xf32> to vector<1x128xf32>
      %163 = arith.index_cast %arg20 : i32 to index
      %c0_56 = arith.constant 0 : index
      %c0_57 = arith.constant 0 : index
      %164 = vector.load %arg12[%163, %c0_56, %c0_57] : memref<2x1x128xf32, #tpu.memory_space<vmem>>, vector<1x1x128xf32>
      %165 = vector.shape_cast %164 : vector<1x1x128xf32> to vector<1x128xf32>
      %cst_58 = arith.constant dense<0.000000e+00> : vector<32xf32>
      %166 = vector.multi_reduction <add>, %159, %cst_58 [1] : vector<32x128xf32> to vector<32xf32>
      %167 = vector.shape_cast %166 : vector<32xf32> to vector<32x1xf32>
      %cst_59 = arith.constant 3.125000e-02 : f32
      %168 = vector.broadcast %cst_59 : f32 to vector<32x1xf32>
      %169 = arith.mulf %167, %168 : vector<32x1xf32>
      %170 = arith.mulf %159, %159 : vector<32x128xf32>
      %cst_60 = arith.constant dense<0.000000e+00> : vector<32xf32>
      %171 = vector.multi_reduction <add>, %170, %cst_60 [1] : vector<32x128xf32> to vector<32xf32>
      %172 = vector.shape_cast %171 : vector<32xf32> to vector<32x1xf32>
      %cst_61 = arith.constant 3.125000e-02 : f32
      %173 = vector.broadcast %cst_61 : f32 to vector<32x1xf32>
      %174 = arith.mulf %172, %173 : vector<32x1xf32>
      %175 = arith.mulf %169, %169 : vector<32x1xf32>
      %176 = arith.subf %174, %175 : vector<32x1xf32>
      %cst_62 = arith.constant 0.000000e+00 : f32
      %177 = vector.broadcast %cst_62 : f32 to vector<32x1xf32>
      %178 = arith.maximumf %176, %177 : vector<32x1xf32>
      %179 = vector.broadcast %169 : vector<32x1xf32> to vector<32x128xf32>
      %180 = arith.subf %159, %179 : vector<32x128xf32>
      %cst_63 = arith.constant 9.99999993E-9 : f32
      %181 = vector.broadcast %cst_63 : f32 to vector<32x1xf32>
      %182 = arith.addf %178, %181 : vector<32x1xf32>
      %183 = math.rsqrt %182 : vector<32x1xf32>
      %184 = vector.broadcast %183 : vector<32x1xf32> to vector<32x128xf32>
      %185 = arith.mulf %180, %184 : vector<32x128xf32>
      %186 = vector.broadcast %162 : vector<1x128xf32> to vector<32x128xf32>
      %187 = arith.mulf %185, %186 : vector<32x128xf32>
      %188 = vector.broadcast %165 : vector<1x128xf32> to vector<32x128xf32>
      %189 = arith.addf %187, %188 : vector<32x128xf32>
      %190 = arith.truncf %189 : vector<32x128xf32> to vector<32x128xbf16>
      %191 = arith.index_cast %arg20 : i32 to index
      %c0_64 = arith.constant 0 : index
      %c0_65 = arith.constant 0 : index
      %192 = vector.load %arg13[%191, %c0_64, %c0_65] : memref<2x128x128xbf16, #tpu.memory_space<vmem>>, vector<1x128x128xbf16>
      %193 = vector.shape_cast %192 : vector<1x128x128xbf16> to vector<128x128xbf16>
      %cst_66 = arith.constant dense<0.000000e+00> : vector<32x128xf32>
      %194 = tpu.matmul %190, %193, %cst_66 {dimension_numbers = #tpu.dot_dimension_numbers<[1], [0], [0], [1], [0, 0, 1, 1], [], []>} : vector<32x128xbf16>, vector<128x128xbf16>, vector<32x128xf32> -> vector<32x128xf32>
      %195 = arith.index_cast %arg20 : i32 to index
      %c0_67 = arith.constant 0 : index
      %c0_68 = arith.constant 0 : index
      %196 = vector.load %arg14[%195, %c0_67, %c0_68] : memref<2x1x128xf32, #tpu.memory_space<vmem>>, vector<1x1x128xf32>
      %197 = vector.shape_cast %196 : vector<1x1x128xf32> to vector<1x128xf32>
      %198 = vector.broadcast %197 : vector<1x128xf32> to vector<32x128xf32>
      %199 = arith.addf %194, %198 : vector<32x128xf32>
      %cst_69 = arith.constant 0.000000e+00 : f32
      %200 = vector.broadcast %cst_69 : f32 to vector<32x128xf32>
      %201 = arith.maximumf %199, %200 : vector<32x128xf32>
      %202 = arith.truncf %201 : vector<32x128xf32> to vector<32x128xbf16>
      %203 = arith.index_cast %arg20 : i32 to index
      %c0_70 = arith.constant 0 : index
      %c0_71 = arith.constant 0 : index
      %204 = vector.load %arg15[%203, %c0_70, %c0_71] : memref<2x128x128xbf16, #tpu.memory_space<vmem>>, vector<1x128x128xbf16>
      %205 = vector.shape_cast %204 : vector<1x128x128xbf16> to vector<128x128xbf16>
      %cst_72 = arith.constant dense<0.000000e+00> : vector<32x128xf32>
      %206 = tpu.matmul %202, %205, %cst_72 {dimension_numbers = #tpu.dot_dimension_numbers<[1], [0], [0], [1], [0, 0, 1, 1], [], []>} : vector<32x128xbf16>, vector<128x128xbf16>, vector<32x128xf32> -> vector<32x128xf32>
      %207 = arith.index_cast %arg20 : i32 to index
      %c0_73 = arith.constant 0 : index
      %c0_74 = arith.constant 0 : index
      %208 = vector.load %arg16[%207, %c0_73, %c0_74] : memref<2x1x128xf32, #tpu.memory_space<vmem>>, vector<1x1x128xf32>
      %209 = vector.shape_cast %208 : vector<1x1x128xf32> to vector<1x128xf32>
      %210 = vector.broadcast %209 : vector<1x128xf32> to vector<32x128xf32>
      %211 = arith.addf %206, %210 : vector<32x128xf32>
      %212 = arith.addf %189, %211 : vector<32x128xf32>
      %213 = vector.broadcast %3 : vector<32x1xf32> to vector<32x128xf32>
      %214 = arith.mulf %212, %213 : vector<32x128xf32>
      scf.yield %214 : vector<32x128xf32>
    }
    %c2_i32_6 = arith.constant 2 : i32
    %c0_7 = arith.constant 0 : index
    %c0_8 = arith.constant 0 : index
    %15 = vector.load %arg17[%c0_7, %c0_8] : memref<1x128xf32, #tpu.memory_space<vmem>>, vector<1x128xf32>
    %c0_9 = arith.constant 0 : index
    %c0_10 = arith.constant 0 : index
    %16 = vector.load %arg18[%c0_9, %c0_10] : memref<1x128xf32, #tpu.memory_space<vmem>>, vector<1x128xf32>
    %cst_11 = arith.constant dense<0.000000e+00> : vector<32xf32>
    %17 = vector.multi_reduction <add>, %14, %cst_11 [1] : vector<32x128xf32> to vector<32xf32>
    %18 = vector.shape_cast %17 : vector<32xf32> to vector<32x1xf32>
    %cst_12 = arith.constant 3.125000e-02 : f32
    %19 = vector.broadcast %cst_12 : f32 to vector<32x1xf32>
    %20 = arith.mulf %18, %19 : vector<32x1xf32>
    %21 = arith.mulf %14, %14 : vector<32x128xf32>
    %cst_13 = arith.constant dense<0.000000e+00> : vector<32xf32>
    %22 = vector.multi_reduction <add>, %21, %cst_13 [1] : vector<32x128xf32> to vector<32xf32>
    %23 = vector.shape_cast %22 : vector<32xf32> to vector<32x1xf32>
    %cst_14 = arith.constant 3.125000e-02 : f32
    %24 = vector.broadcast %cst_14 : f32 to vector<32x1xf32>
    %25 = arith.mulf %23, %24 : vector<32x1xf32>
    %26 = arith.mulf %20, %20 : vector<32x1xf32>
    %27 = arith.subf %25, %26 : vector<32x1xf32>
    %cst_15 = arith.constant 0.000000e+00 : f32
    %28 = vector.broadcast %cst_15 : f32 to vector<32x1xf32>
    %29 = arith.maximumf %27, %28 : vector<32x1xf32>
    %30 = vector.broadcast %20 : vector<32x1xf32> to vector<32x128xf32>
    %31 = arith.subf %14, %30 : vector<32x128xf32>
    %cst_16 = arith.constant 9.99999993E-9 : f32
    %32 = vector.broadcast %cst_16 : f32 to vector<32x1xf32>
    %33 = arith.addf %29, %32 : vector<32x1xf32>
    %34 = math.rsqrt %33 : vector<32x1xf32>
    %35 = vector.broadcast %34 : vector<32x1xf32> to vector<32x128xf32>
    %36 = arith.mulf %31, %35 : vector<32x128xf32>
    %37 = vector.broadcast %15 : vector<1x128xf32> to vector<32x128xf32>
    %38 = arith.mulf %36, %37 : vector<32x128xf32>
    %39 = vector.broadcast %16 : vector<1x128xf32> to vector<32x128xf32>
    %40 = arith.addf %38, %39 : vector<32x128xf32>
    %41 = vector.shape_cast %40 : vector<32x128xf32> to vector<4x8x128xf32>
    %42 = arith.truncf %41 : vector<4x8x128xf32> to vector<4x8x128xbf16>
    %c0_17 = arith.constant 0 : index
    %c0_18 = arith.constant 0 : index
    %c0_19 = arith.constant 0 : index
    %43 = vector.load %arg19[%c0_17, %c0_18, %c0_19] : memref<4x8x128xbf16, #tpu.memory_space<vmem>>, vector<4x8x128xbf16>
    tpu.vector_store %arg19[%c0_17, %c0_18, %c0_19], %42 {strides = array<i32>} : memref<4x8x128xbf16, #tpu.memory_space<vmem>>, vector<4x8x128xbf16>,
    return
  }
  func.func @transform_0(%arg0: i32) -> (i32, i32, i32) {
    %c0_i32 = arith.constant 0 : i32
    %c0_i32_0 = arith.constant 0 : i32
    %c0_i32_1 = arith.constant 0 : i32
    return %arg0, %c0_i32, %c0_i32_0 : i32, i32, i32
  }
  func.func @transform_1(%arg0: i32) -> (i32, i32, i32) {
    %c0_i32 = arith.constant 0 : i32
    %c0_i32_0 = arith.constant 0 : i32
    %c0_i32_1 = arith.constant 0 : i32
    return %arg0, %c0_i32, %c0_i32_0 : i32, i32, i32
  }
  func.func @transform_2(%arg0: i32) -> (i32, i32, i32) {
    %c0_i32 = arith.constant 0 : i32
    %c0_i32_0 = arith.constant 0 : i32
    %c0_i32_1 = arith.constant 0 : i32
    %c0_i32_2 = arith.constant 0 : i32
    return %c0_i32, %c0_i32_0, %c0_i32_1 : i32, i32, i32
  }
  func.func @transform_3(%arg0: i32) -> (i32, i32, i32) {
    %c0_i32 = arith.constant 0 : i32
    %c0_i32_0 = arith.constant 0 : i32
    %c0_i32_1 = arith.constant 0 : i32
    %c0_i32_2 = arith.constant 0 : i32
    return %c0_i32, %c0_i32_0, %c0_i32_1 : i32, i32, i32
  }
  func.func @transform_4(%arg0: i32) -> (i32, i32, i32) {
    %c0_i32 = arith.constant 0 : i32
    %c0_i32_0 = arith.constant 0 : i32
    %c0_i32_1 = arith.constant 0 : i32
    %c0_i32_2 = arith.constant 0 : i32
    return %c0_i32, %c0_i32_0, %c0_i32_1 : i32, i32, i32
  }
  func.func @transform_5(%arg0: i32) -> (i32, i32, i32) {
    %c0_i32 = arith.constant 0 : i32
    %c0_i32_0 = arith.constant 0 : i32
    %c0_i32_1 = arith.constant 0 : i32
    %c0_i32_2 = arith.constant 0 : i32
    return %c0_i32, %c0_i32_0, %c0_i32_1 : i32, i32, i32
  }
  func.func @transform_6(%arg0: i32) -> (i32, i32, i32) {
    %c0_i32 = arith.constant 0 : i32
    %c0_i32_0 = arith.constant 0 : i32
    %c0_i32_1 = arith.constant 0 : i32
    %c0_i32_2 = arith.constant 0 : i32
    return %c0_i32, %c0_i32_0, %c0_i32_1 : i32, i32, i32
  }
  func.func @transform_7(%arg0: i32) -> (i32, i32, i32) {
    %c0_i32 = arith.constant 0 : i32
    %c0_i32_0 = arith.constant 0 : i32
    %c0_i32_1 = arith.constant 0 : i32
    %c0_i32_2 = arith.constant 0 : i32
    return %c0_i32, %c0_i32_0, %c0_i32_1 : i32, i32, i32
  }
  func.func @transform_8(%arg0: i32) -> (i32, i32, i32) {
    %c0_i32 = arith.constant 0 : i32
    %c0_i32_0 = arith.constant 0 : i32
    %c0_i32_1 = arith.constant 0 : i32
    %c0_i32_2 = arith.constant 0 : i32
    return %c0_i32, %c0_i32_0, %c0_i32_1 : i32, i32, i32
  }
  func.func @transform_9(%arg0: i32) -> (i32, i32, i32) {
    %c0_i32 = arith.constant 0 : i32
    %c0_i32_0 = arith.constant 0 : i32
    %c0_i32_1 = arith.constant 0 : i32
    %c0_i32_2 = arith.constant 0 : i32
    return %c0_i32, %c0_i32_0, %c0_i32_1 : i32, i32, i32
  }
  func.func @transform_10(%arg0: i32) -> (i32, i32, i32) {
    %c0_i32 = arith.constant 0 : i32
    %c0_i32_0 = arith.constant 0 : i32
    %c0_i32_1 = arith.constant 0 : i32
    %c0_i32_2 = arith.constant 0 : i32
    return %c0_i32, %c0_i32_0, %c0_i32_1 : i32, i32, i32
  }
  func.func @transform_11(%arg0: i32) -> (i32, i32, i32) {
    %c0_i32 = arith.constant 0 : i32
    %c0_i32_0 = arith.constant 0 : i32
    %c0_i32_1 = arith.constant 0 : i32
    %c0_i32_2 = arith.constant 0 : i32
    return %c0_i32, %c0_i32_0, %c0_i32_1 : i32, i32, i32
  }
  func.func @transform_12(%arg0: i32) -> (i32, i32, i32) {
    %c0_i32 = arith.constant 0 : i32
    %c0_i32_0 = arith.constant 0 : i32
    %c0_i32_1 = arith.constant 0 : i32
    %c0_i32_2 = arith.constant 0 : i32
    return %c0_i32, %c0_i32_0, %c0_i32_1 : i32, i32, i32
  }
  func.func @transform_13(%arg0: i32) -> (i32, i32, i32) {
    %c0_i32 = arith.constant 0 : i32
    %c0_i32_0 = arith.constant 0 : i32
    %c0_i32_1 = arith.constant 0 : i32
    %c0_i32_2 = arith.constant 0 : i32
    return %c0_i32, %c0_i32_0, %c0_i32_1 : i32, i32, i32
  }
  func.func @transform_14(%arg0: i32) -> (i32, i32, i32) {
    %c0_i32 = arith.constant 0 : i32
    %c0_i32_0 = arith.constant 0 : i32
    %c0_i32_1 = arith.constant 0 : i32
    %c0_i32_2 = arith.constant 0 : i32
    return %c0_i32, %c0_i32_0, %c0_i32_1 : i32, i32, i32
  }
  func.func @transform_15(%arg0: i32) -> (i32, i32, i32) {
    %c0_i32 = arith.constant 0 : i32
    %c0_i32_0 = arith.constant 0 : i32
    %c0_i32_1 = arith.constant 0 : i32
    %c0_i32_2 = arith.constant 0 : i32
    return %c0_i32, %c0_i32_0, %c0_i32_1 : i32, i32, i32
  }
  func.func @transform_16(%arg0: i32) -> (i32, i32) {
    %c0_i32 = arith.constant 0 : i32
    %c0_i32_0 = arith.constant 0 : i32
    %c0_i32_1 = arith.constant 0 : i32
    return %c0_i32, %c0_i32_0 : i32, i32
  }
  func.func @transform_17(%arg0: i32) -> (i32, i32) {
    %c0_i32 = arith.constant 0 : i32
    %c0_i32_0 = arith.constant 0 : i32
    %c0_i32_1 = arith.constant 0 : i32
    return %c0_i32, %c0_i32_0 : i32, i32
  }
  func.func @transform_18(%arg0: i32) -> (i32, i32, i32) {
    %c0_i32 = arith.constant 0 : i32
    %c0_i32_0 = arith.constant 0 : i32
    %c0_i32_1 = arith.constant 0 : i32
    return %arg0, %c0_i32, %c0_i32_0 : i32, i32, i32
  }
}

module attributes {stable_mosaic.version = 11 : i64} {
  func.func @sasrec_kernel(%arg0: i32, %arg1: memref<4x8x128xf32, #tpu.memory_space<vmem>>, %arg2: memref<4x8x1xf32, #tpu.memory_space<vmem>>, %arg3: memref<2x1x128xf32, #tpu.memory_space<vmem>>, %arg4: memref<2x1x128xf32, #tpu.memory_space<vmem>>, %arg5: memref<2x128x128xbf16, #tpu.memory_space<vmem>>, %arg6: memref<2x1x128xf32, #tpu.memory_space<vmem>>, %arg7: memref<2x128x256xbf16, #tpu.memory_space<vmem>>, %arg8: memref<2x1x256xf32, #tpu.memory_space<vmem>>, %arg9: memref<2x128x128xbf16, #tpu.memory_space<vmem>>, %arg10: memref<2x1x128xf32, #tpu.memory_space<vmem>>, %arg11: memref<2x1x128xf32, #tpu.memory_space<vmem>>, %arg12: memref<2x1x128xf32, #tpu.memory_space<vmem>>, %arg13: memref<2x128x128xbf16, #tpu.memory_space<vmem>>, %arg14: memref<2x1x128xf32, #tpu.memory_space<vmem>>, %arg15: memref<2x128x128xbf16, #tpu.memory_space<vmem>>, %arg16: memref<2x1x128xf32, #tpu.memory_space<vmem>>, %arg17: memref<1x128xf32, #tpu.memory_space<vmem>>, %arg18: memref<1x128xf32, #tpu.memory_space<vmem>>, %arg19: memref<4x8x128xbf16, #tpu.memory_space<vmem>>) attributes {dimension_semantics = [#tpu.dimension_semantics<parallel>], iteration_bounds = array<i64: 2>, scalar_prefetch = 0 : i64, scratch_operands = 0 : i64, tpu.core_type = #tpu.core_type<tc>, window_params = [{transform_indices = @transform_0, window_bounds = array<i64: 4, 8, 128>}, {transform_indices = @transform_1, window_bounds = array<i64: 4, 8, 1>}, {pipeline_mode = #tpu.pipeline_mode<synchronous>, transform_indices = @transform_2, window_bounds = array<i64: 2, 1, 128>}, {pipeline_mode = #tpu.pipeline_mode<synchronous>, transform_indices = @transform_3, window_bounds = array<i64: 2, 1, 128>}, {pipeline_mode = #tpu.pipeline_mode<synchronous>, transform_indices = @transform_4, window_bounds = array<i64: 2, 128, 128>}, {pipeline_mode = #tpu.pipeline_mode<synchronous>, transform_indices = @transform_5, window_bounds = array<i64: 2, 1, 128>}, {pipeline_mode = #tpu.pipeline_mode<synchronous>, transform_indices = @transform_6, window_bounds = array<i64: 2, 128, 256>}, {pipeline_mode = #tpu.pipeline_mode<synchronous>, transform_indices = @transform_7, window_bounds = array<i64: 2, 1, 256>}, {pipeline_mode = #tpu.pipeline_mode<synchronous>, transform_indices = @transform_8, window_bounds = array<i64: 2, 128, 128>}, {pipeline_mode = #tpu.pipeline_mode<synchronous>, transform_indices = @transform_9, window_bounds = array<i64: 2, 1, 128>}, {pipeline_mode = #tpu.pipeline_mode<synchronous>, transform_indices = @transform_10, window_bounds = array<i64: 2, 1, 128>}, {pipeline_mode = #tpu.pipeline_mode<synchronous>, transform_indices = @transform_11, window_bounds = array<i64: 2, 1, 128>}, {pipeline_mode = #tpu.pipeline_mode<synchronous>, transform_indices = @transform_12, window_bounds = array<i64: 2, 128, 128>}, {pipeline_mode = #tpu.pipeline_mode<synchronous>, transform_indices = @transform_13, window_bounds = array<i64: 2, 1, 128>}, {pipeline_mode = #tpu.pipeline_mode<synchronous>, transform_indices = @transform_14, window_bounds = array<i64: 2, 128, 128>}, {pipeline_mode = #tpu.pipeline_mode<synchronous>, transform_indices = @transform_15, window_bounds = array<i64: 2, 1, 128>}, {pipeline_mode = #tpu.pipeline_mode<synchronous>, transform_indices = @transform_16, window_bounds = array<i64: 1, 128>}, {pipeline_mode = #tpu.pipeline_mode<synchronous>, transform_indices = @transform_17, window_bounds = array<i64: 1, 128>}, {transform_indices = @transform_18, window_bounds = array<i64: 4, 8, 128>}]} {
    %c0 = arith.constant 0 : index
    %c0_0 = arith.constant 0 : index
    %c0_1 = arith.constant 0 : index
    %0 = vector.load %arg1[%c0, %c0_0, %c0_1] : memref<4x8x128xf32, #tpu.memory_space<vmem>>, vector<4x8x128xf32>
    %1 = vector.shape_cast %0 : vector<4x8x128xf32> to vector<32x128xf32>
    %c0_2 = arith.constant 0 : index
    %c0_3 = arith.constant 0 : index
    %c0_4 = arith.constant 0 : index
    %2 = vector.load %arg2[%c0_2, %c0_3, %c0_4] : memref<4x8x1xf32, #tpu.memory_space<vmem>>, vector<4x8x1xf32>
    %3 = vector.shape_cast %2 : vector<4x8x1xf32> to vector<32x1xf32>
    %4 = tpu.iota {dimensions = array<i32: 0>} : vector<8x8xi32>
    %5 = tpu.iota {dimensions = array<i32: 1>} : vector<8x8xi32>
    %6 = arith.cmpi sgt, %5, %4 : vector<8x8xi32>
    %cst = arith.constant -1.000000e+30 : f32
    %cst_5 = arith.constant 0.000000e+00 : f32
    %7 = vector.broadcast %cst : f32 to vector<8x8xf32>
    %8 = vector.broadcast %cst_5 : f32 to vector<8x8xf32>
    %9 = arith.select %6, %7, %8 : vector<8x8xi1>, vector<8x8xf32>
    %10 = vector.shape_cast %9 : vector<8x8xf32> to vector<1x8x8xf32>
    %11 = vector.shape_cast %10 : vector<1x8x8xf32> to vector<1x8x8xf32>
    %12 = vector.broadcast %11 : vector<1x8x8xf32> to vector<4x8x8xf32>
    %c0_i32 = arith.constant 0 : i32
    %c2_i32 = arith.constant 2 : i32
    %13 = arith.addi %c0_i32, %c2_i32 : i32
    %c1_i32 = arith.constant 1 : i32
    %14 = scf.for %arg20 = %c0_i32 to %13 step %c1_i32 iter_args(%arg21 = %1) -> (vector<32x128xf32>)  : i32 {
      %44 = arith.index_cast %arg20 : i32 to index
      %c0_20 = arith.constant 0 : index
      %c0_21 = arith.constant 0 : index
      %45 = vector.load %arg3[%44, %c0_20, %c0_21] : memref<2x1x128xf32, #tpu.memory_space<vmem>>, vector<1x1x128xf32>
      %46 = vector.shape_cast %45 : vector<1x1x128xf32> to vector<1x128xf32>
      %47 = arith.index_cast %arg20 : i32 to index
      %c0_22 = arith.constant 0 : index
      %c0_23 = arith.constant 0 : index
      %48 = vector.load %arg4[%47, %c0_22, %c0_23] : memref<2x1x128xf32, #tpu.memory_space<vmem>>, vector<1x1x128xf32>
      %49 = vector.shape_cast %48 : vector<1x1x128xf32> to vector<1x128xf32>
      %cst_24 = arith.constant dense<0.000000e+00> : vector<32xf32>
      %50 = vector.multi_reduction <add>, %arg21, %cst_24 [1] : vector<32x128xf32> to vector<32xf32>
      %51 = vector.shape_cast %50 : vector<32xf32> to vector<32x1xf32>
      %cst_25 = arith.constant 3.125000e-02 : f32
      %52 = vector.broadcast %cst_25 : f32 to vector<32x1xf32>
      %53 = arith.mulf %51, %52 : vector<32x1xf32>
      %54 = arith.mulf %arg21, %arg21 : vector<32x128xf32>
      %cst_26 = arith.constant dense<0.000000e+00> : vector<32xf32>
      %55 = vector.multi_reduction <add>, %54, %cst_26 [1] : vector<32x128xf32> to vector<32xf32>
      %56 = vector.shape_cast %55 : vector<32xf32> to vector<32x1xf32>
      %cst_27 = arith.constant 3.125000e-02 : f32
      %57 = vector.broadcast %cst_27 : f32 to vector<32x1xf32>
      %58 = arith.mulf %56, %57 : vector<32x1xf32>
      %59 = arith.mulf %53, %53 : vector<32x1xf32>
      %60 = arith.subf %58, %59 : vector<32x1xf32>
      %cst_28 = arith.constant 0.000000e+00 : f32
      %61 = vector.broadcast %cst_28 : f32 to vector<32x1xf32>
      %62 = arith.maximumf %60, %61 : vector<32x1xf32>
      %63 = vector.broadcast %53 : vector<32x1xf32> to vector<32x128xf32>
      %64 = arith.subf %arg21, %63 : vector<32x128xf32>
      %cst_29 = arith.constant 9.99999993E-9 : f32
      %65 = vector.broadcast %cst_29 : f32 to vector<32x1xf32>
      %66 = arith.addf %62, %65 : vector<32x1xf32>
      %67 = math.rsqrt %66 : vector<32x1xf32>
      %68 = vector.broadcast %67 : vector<32x1xf32> to vector<32x128xf32>
      %69 = arith.mulf %64, %68 : vector<32x128xf32>
      %70 = vector.broadcast %46 : vector<1x128xf32> to vector<32x128xf32>
      %71 = arith.mulf %69, %70 : vector<32x128xf32>
      %72 = vector.broadcast %49 : vector<1x128xf32> to vector<32x128xf32>
      %73 = arith.addf %71, %72 : vector<32x128xf32>
      %74 = arith.truncf %73 : vector<32x128xf32> to vector<32x128xbf16>
      %75 = arith.truncf %arg21 : vector<32x128xf32> to vector<32x128xbf16>
      %76 = arith.index_cast %arg20 : i32 to index
      %c0_30 = arith.constant 0 : index
      %c0_31 = arith.constant 0 : index
      %77 = vector.load %arg5[%76, %c0_30, %c0_31] : memref<2x128x128xbf16, #tpu.memory_space<vmem>>, vector<1x128x128xbf16>
      %78 = vector.shape_cast %77 : vector<1x128x128xbf16> to vector<128x128xbf16>
      %cst_32 = arith.constant dense<0.000000e+00> : vector<32x128xf32>
      %79 = tpu.matmul %74, %78, %cst_32 {dimension_numbers = #tpu.dot_dimension_numbers<[1], [0], [0], [1], [0, 0, 1, 1], [], []>} : vector<32x128xbf16>, vector<128x128xbf16>, vector<32x128xf32> -> vector<32x128xf32>
      %80 = arith.index_cast %arg20 : i32 to index
      %c0_33 = arith.constant 0 : index
      %c0_34 = arith.constant 0 : index
      %81 = vector.load %arg6[%80, %c0_33, %c0_34] : memref<2x1x128xf32, #tpu.memory_space<vmem>>, vector<1x1x128xf32>
      %82 = vector.shape_cast %81 : vector<1x1x128xf32> to vector<1x128xf32>
      %83 = vector.broadcast %82 : vector<1x128xf32> to vector<32x128xf32>
      %84 = arith.addf %79, %83 : vector<32x128xf32>
      %85 = arith.index_cast %arg20 : i32 to index
      %c0_35 = arith.constant 0 : index
      %c0_36 = arith.constant 0 : index
      %86 = vector.load %arg7[%85, %c0_35, %c0_36] : memref<2x128x256xbf16, #tpu.memory_space<vmem>>, vector<1x128x256xbf16>
      %87 = vector.shape_cast %86 : vector<1x128x256xbf16> to vector<128x256xbf16>
      %cst_37 = arith.constant dense<0.000000e+00> : vector<32x256xf32>
      %88 = tpu.matmul %75, %87, %cst_37 {dimension_numbers = #tpu.dot_dimension_numbers<[1], [0], [0], [1], [0, 0, 1, 1], [], []>} : vector<32x128xbf16>, vector<128x256xbf16>, vector<32x256xf32> -> vector<32x256xf32>
      %89 = arith.index_cast %arg20 : i32 to index
      %c0_38 = arith.constant 0 : index
      %c0_39 = arith.constant 0 : index
      %90 = vector.load %arg8[%89, %c0_38, %c0_39] : memref<2x1x256xf32, #tpu.memory_space<vmem>>, vector<1x1x256xf32>
      %91 = vector.shape_cast %90 : vector<1x1x256xf32> to vector<1x256xf32>
      %92 = vector.broadcast %91 : vector<1x256xf32> to vector<32x256xf32>
      %93 = arith.addf %88, %92 : vector<32x256xf32>
      %94 = vector.extract_strided_slice %93 {offsets = [0, 0], sizes = [32, 128], strides = [1, 1]} : vector<32x256xf32> to vector<32x128xf32>
      %95 = vector.extract_strided_slice %93 {offsets = [0, 128], sizes = [32, 128], strides = [1, 1]} : vector<32x256xf32> to vector<32x128xf32>
      %96 = arith.index_cast %arg20 : i32 to index
      %c0_40 = arith.constant 0 : index
      %c0_41 = arith.constant 0 : index
      %97 = vector.load %arg9[%96, %c0_40, %c0_41] : memref<2x128x128xbf16, #tpu.memory_space<vmem>>, vector<1x128x128xbf16>
      %98 = vector.shape_cast %97 : vector<1x128x128xbf16> to vector<128x128xbf16>
      %99 = vector.extract_strided_slice %84 {offsets = [0, 0], sizes = [32, 64], strides = [1, 1]} : vector<32x128xf32> to vector<32x64xf32>
      %100 = vector.shape_cast %99 : vector<32x64xf32> to vector<4x8x64xf32>
      %101 = arith.truncf %100 : vector<4x8x64xf32> to vector<4x8x64xbf16>
      %102 = vector.extract_strided_slice %94 {offsets = [0, 0], sizes = [32, 64], strides = [1, 1]} : vector<32x128xf32> to vector<32x64xf32>
      %103 = vector.shape_cast %102 : vector<32x64xf32> to vector<4x8x64xf32>
      %104 = arith.truncf %103 : vector<4x8x64xf32> to vector<4x8x64xbf16>
      %105 = vector.extract_strided_slice %95 {offsets = [0, 0], sizes = [32, 64], strides = [1, 1]} : vector<32x128xf32> to vector<32x64xf32>
      %106 = vector.shape_cast %105 : vector<32x64xf32> to vector<4x8x64xf32>
      %107 = arith.truncf %106 : vector<4x8x64xf32> to vector<4x8x64xbf16>
      "tpu.trace_start"() <{level = 10 : i32, message = "bqd,bkd->bqk"}> : () -> ()
      %cst_42 = arith.constant dense<0.000000e+00> : vector<4x8x8xf32>
      %108 = tpu.matmul %101, %104, %cst_42 {dimension_numbers = #tpu.dot_dimension_numbers<[2], [2], [1], [1], [0, 0, 0, 1, 1, 1], [0], [0]>} : vector<4x8x64xbf16>, vector<4x8x64xbf16>, vector<4x8x8xf32> -> vector<4x8x8xf32>
      "tpu.trace_stop"() : () -> ()
      %109 = arith.addf %108, %12 : vector<4x8x8xf32>
      %cst_43 = arith.constant dense<0xFF800000> : vector<4x8xf32>
      %110 = vector.multi_reduction <maximumf>, %109, %cst_43 [2] : vector<4x8x8xf32> to vector<4x8xf32>
      %111 = vector.shape_cast %110 : vector<4x8xf32> to vector<4x8x1xf32>
      %112 = vector.broadcast %111 : vector<4x8x1xf32> to vector<4x8x8xf32>
      %113 = arith.subf %109, %112 : vector<4x8x8xf32>
      %114 = math.exp %113 : vector<4x8x8xf32>
      %cst_44 = arith.constant dense<0.000000e+00> : vector<4x8xf32>
      %115 = vector.multi_reduction <add>, %114, %cst_44 [2] : vector<4x8x8xf32> to vector<4x8xf32>
      %116 = vector.shape_cast %115 : vector<4x8xf32> to vector<4x8x1xf32>
      %117 = tpu.reciprocal %116 {approx = true} : vector<4x8x1xf32> -> vector<4x8x1xf32>
      %118 = vector.broadcast %117 : vector<4x8x1xf32> to vector<4x8x8xf32>
      %119 = arith.mulf %114, %118 : vector<4x8x8xf32>
      %120 = arith.truncf %119 : vector<4x8x8xf32> to vector<4x8x8xbf16>
      "tpu.trace_start"() <{level = 10 : i32, message = "bqk,bkd->bqd"}> : () -> ()
      %cst_45 = arith.constant dense<0.000000e+00> : vector<4x8x64xf32>
      %121 = tpu.matmul %120, %107, %cst_45 {dimension_numbers = #tpu.dot_dimension_numbers<[2], [1], [1], [2], [0, 0, 0, 1, 1, 2], [0], [0]>} : vector<4x8x8xbf16>, vector<4x8x64xbf16>, vector<4x8x64xf32> -> vector<4x8x64xf32>
      "tpu.trace_stop"() : () -> ()
      %122 = vector.shape_cast %121 : vector<4x8x64xf32> to vector<32x64xf32>
      %123 = arith.truncf %122 : vector<32x64xf32> to vector<32x64xbf16>
      %124 = vector.extract_strided_slice %98 {offsets = [0, 0], sizes = [64, 128], strides = [1, 1]} : vector<128x128xbf16> to vector<64x128xbf16>
      %cst_46 = arith.constant dense<0.000000e+00> : vector<32x128xf32>
      %125 = tpu.matmul %123, %124, %cst_46 {dimension_numbers = #tpu.dot_dimension_numbers<[1], [0], [0], [1], [0, 0, 1, 1], [], []>} : vector<32x64xbf16>, vector<64x128xbf16>, vector<32x128xf32> -> vector<32x128xf32>
      %126 = vector.extract_strided_slice %84 {offsets = [0, 64], sizes = [32, 64], strides = [1, 1]} : vector<32x128xf32> to vector<32x64xf32>
      %127 = vector.shape_cast %126 : vector<32x64xf32> to vector<4x8x64xf32>
      %128 = arith.truncf %127 : vector<4x8x64xf32> to vector<4x8x64xbf16>
      %129 = vector.extract_strided_slice %94 {offsets = [0, 64], sizes = [32, 64], strides = [1, 1]} : vector<32x128xf32> to vector<32x64xf32>
      %130 = vector.shape_cast %129 : vector<32x64xf32> to vector<4x8x64xf32>
      %131 = arith.truncf %130 : vector<4x8x64xf32> to vector<4x8x64xbf16>
      %132 = vector.extract_strided_slice %95 {offsets = [0, 64], sizes = [32, 64], strides = [1, 1]} : vector<32x128xf32> to vector<32x64xf32>
      %133 = vector.shape_cast %132 : vector<32x64xf32> to vector<4x8x64xf32>
      %134 = arith.truncf %133 : vector<4x8x64xf32> to vector<4x8x64xbf16>
      "tpu.trace_start"() <{level = 10 : i32, message = "bqd,bkd->bqk"}> : () -> ()
      %cst_47 = arith.constant dense<0.000000e+00> : vector<4x8x8xf32>
      %135 = tpu.matmul %128, %131, %cst_47 {dimension_numbers = #tpu.dot_dimension_numbers<[2], [2], [1], [1], [0, 0, 0, 1, 1, 1], [0], [0]>} : vector<4x8x64xbf16>, vector<4x8x64xbf16>, vector<4x8x8xf32> -> vector<4x8x8xf32>
      "tpu.trace_stop"() : () -> ()
      %136 = arith.addf %135, %12 : vector<4x8x8xf32>
      %cst_48 = arith.constant dense<0xFF800000> : vector<4x8xf32>
      %137 = vector.multi_reduction <maximumf>, %136, %cst_48 [2] : vector<4x8x8xf32> to vector<4x8xf32>
      %138 = vector.shape_cast %137 : vector<4x8xf32> to vector<4x8x1xf32>
      %139 = vector.broadcast %138 : vector<4x8x1xf32> to vector<4x8x8xf32>
      %140 = arith.subf %136, %139 : vector<4x8x8xf32>
      %141 = math.exp %140 : vector<4x8x8xf32>
      %cst_49 = arith.constant dense<0.000000e+00> : vector<4x8xf32>
      %142 = vector.multi_reduction <add>, %141, %cst_49 [2] : vector<4x8x8xf32> to vector<4x8xf32>
      %143 = vector.shape_cast %142 : vector<4x8xf32> to vector<4x8x1xf32>
      %144 = tpu.reciprocal %143 {approx = true} : vector<4x8x1xf32> -> vector<4x8x1xf32>
      %145 = vector.broadcast %144 : vector<4x8x1xf32> to vector<4x8x8xf32>
      %146 = arith.mulf %141, %145 : vector<4x8x8xf32>
      %147 = arith.truncf %146 : vector<4x8x8xf32> to vector<4x8x8xbf16>
      "tpu.trace_start"() <{level = 10 : i32, message = "bqk,bkd->bqd"}> : () -> ()
      %cst_50 = arith.constant dense<0.000000e+00> : vector<4x8x64xf32>
      %148 = tpu.matmul %147, %134, %cst_50 {dimension_numbers = #tpu.dot_dimension_numbers<[2], [1], [1], [2], [0, 0, 0, 1, 1, 2], [0], [0]>} : vector<4x8x8xbf16>, vector<4x8x64xbf16>, vector<4x8x64xf32> -> vector<4x8x64xf32>
      "tpu.trace_stop"() : () -> ()
      %149 = vector.shape_cast %148 : vector<4x8x64xf32> to vector<32x64xf32>
      %150 = arith.truncf %149 : vector<32x64xf32> to vector<32x64xbf16>
      %151 = vector.extract_strided_slice %98 {offsets = [64, 0], sizes = [64, 128], strides = [1, 1]} : vector<128x128xbf16> to vector<64x128xbf16>
      %cst_51 = arith.constant dense<0.000000e+00> : vector<32x128xf32>
      %152 = tpu.matmul %150, %151, %cst_51 {dimension_numbers = #tpu.dot_dimension_numbers<[1], [0], [0], [1], [0, 0, 1, 1], [], []>} : vector<32x64xbf16>, vector<64x128xbf16>, vector<32x128xf32> -> vector<32x128xf32>
      %153 = arith.addf %125, %152 : vector<32x128xf32>
      %154 = arith.index_cast %arg20 : i32 to index
      %c0_52 = arith.constant 0 : index
      %c0_53 = arith.constant 0 : index
      %155 = vector.load %arg10[%154, %c0_52, %c0_53] : memref<2x1x128xf32, #tpu.memory_space<vmem>>, vector<1x1x128xf32>
      %156 = vector.shape_cast %155 : vector<1x1x128xf32> to vector<1x128xf32>
      %157 = vector.broadcast %156 : vector<1x128xf32> to vector<32x128xf32>
      %158 = arith.addf %153, %157 : vector<32x128xf32>
      %159 = arith.addf %73, %158 : vector<32x128xf32>
      %160 = arith.index_cast %arg20 : i32 to index
      %c0_54 = arith.constant 0 : index
      %c0_55 = arith.constant 0 : index
      %161 = vector.load %arg11[%160, %c0_54, %c0_55] : memref<2x1x128xf32, #tpu.memory_space<vmem>>, vector<1x1x128xf32>
      %162 = vector.shape_cast %161 : vector<1x1x128xf32> to vector<1x128xf32>
      %163 = arith.index_cast %arg20 : i32 to index
      %c0_56 = arith.constant 0 : index
      %c0_57 = arith.constant 0 : index
      %164 = vector.load %arg12[%163, %c0_56, %c0_57] : memref<2x1x128xf32, #tpu.memory_space<vmem>>, vector<1x1x128xf32>
      %165 = vector.shape_cast %164 : vector<1x1x128xf32> to vector<1x128xf32>
      %cst_58 = arith.constant dense<0.000000e+00> : vector<32xf32>
      %166 = vector.multi_reduction <add>, %159, %cst_58 [1] : vector<32x128xf32> to vector<32xf32>
      %167 = vector.shape_cast %166 : vector<32xf32> to vector<32x1xf32>
      %cst_59 = arith.constant 3.125000e-02 : f32
      %168 = vector.broadcast %cst_59 : f32 to vector<32x1xf32>
      %169 = arith.mulf %167, %168 : vector<32x1xf32>
      %170 = arith.mulf %159, %159 : vector<32x128xf32>
      %cst_60 = arith.constant dense<0.000000e+00> : vector<32xf32>
      %171 = vector.multi_reduction <add>, %170, %cst_60 [1] : vector<32x128xf32> to vector<32xf32>
      %172 = vector.shape_cast %171 : vector<32xf32> to vector<32x1xf32>
      %cst_61 = arith.constant 3.125000e-02 : f32
      %173 = vector.broadcast %cst_61 : f32 to vector<32x1xf32>
      %174 = arith.mulf %172, %173 : vector<32x1xf32>
      %175 = arith.mulf %169, %169 : vector<32x1xf32>
      %176 = arith.subf %174, %175 : vector<32x1xf32>
      %cst_62 = arith.constant 0.000000e+00 : f32
      %177 = vector.broadcast %cst_62 : f32 to vector<32x1xf32>
      %178 = arith.maximumf %176, %177 : vector<32x1xf32>
      %179 = vector.broadcast %169 : vector<32x1xf32> to vector<32x128xf32>
      %180 = arith.subf %159, %179 : vector<32x128xf32>
      %cst_63 = arith.constant 9.99999993E-9 : f32
      %181 = vector.broadcast %cst_63 : f32 to vector<32x1xf32>
      %182 = arith.addf %178, %181 : vector<32x1xf32>
      %183 = math.rsqrt %182 : vector<32x1xf32>
      %184 = vector.broadcast %183 : vector<32x1xf32> to vector<32x128xf32>
      %185 = arith.mulf %180, %184 : vector<32x128xf32>
      %186 = vector.broadcast %162 : vector<1x128xf32> to vector<32x128xf32>
      %187 = arith.mulf %185, %186 : vector<32x128xf32>
      %188 = vector.broadcast %165 : vector<1x128xf32> to vector<32x128xf32>
      %189 = arith.addf %187, %188 : vector<32x128xf32>
      %190 = arith.truncf %189 : vector<32x128xf32> to vector<32x128xbf16>
      %191 = arith.index_cast %arg20 : i32 to index
      %c0_64 = arith.constant 0 : index
      %c0_65 = arith.constant 0 : index
      %192 = vector.load %arg13[%191, %c0_64, %c0_65] : memref<2x128x128xbf16, #tpu.memory_space<vmem>>, vector<1x128x128xbf16>
      %193 = vector.shape_cast %192 : vector<1x128x128xbf16> to vector<128x128xbf16>
      %cst_66 = arith.constant dense<0.000000e+00> : vector<32x128xf32>
      %194 = tpu.matmul %190, %193, %cst_66 {dimension_numbers = #tpu.dot_dimension_numbers<[1], [0], [0], [1], [0, 0, 1, 1], [], []>} : vector<32x128xbf16>, vector<128x128xbf16>, vector<32x128xf32> -> vector<32x128xf32>
      %195 = arith.index_cast %arg20 : i32 to index
      %c0_67 = arith.constant 0 : index
      %c0_68 = arith.constant 0 : index
      %196 = vector.load %arg14[%195, %c0_67, %c0_68] : memref<2x1x128xf32, #tpu.memory_space<vmem>>, vector<1x1x128xf32>
      %197 = vector.shape_cast %196 : vector<1x1x128xf32> to vector<1x128xf32>
      %198 = vector.broadcast %197 : vector<1x128xf32> to vector<32x128xf32>
      %199 = arith.addf %194, %198 : vector<32x128xf32>
      %cst_69 = arith.constant 0.000000e+00 : f32
      %200 = vector.broadcast %cst_69 : f32 to vector<32x128xf32>
      %201 = arith.maximumf %199, %200 : vector<32x128xf32>
      %202 = arith.truncf %201 : vector<32x128xf32> to vector<32x128xbf16>
      %203 = arith.index_cast %arg20 : i32 to index
      %c0_70 = arith.constant 0 : index
      %c0_71 = arith.constant 0 : index
      %204 = vector.load %arg15[%203, %c0_70, %c0_71] : memref<2x128x128xbf16, #tpu.memory_space<vmem>>, vector<1x128x128xbf16>
      %205 = vector.shape_cast %204 : vector<1x128x128xbf16> to vector<128x128xbf16>
      %cst_72 = arith.constant dense<0.000000e+00> : vector<32x128xf32>
      %206 = tpu.matmul %202, %205, %cst_72 {dimension_numbers = #tpu.dot_dimension_numbers<[1], [0], [0], [1], [0, 0, 1, 1], [], []>} : vector<32x128xbf16>, vector<128x128xbf16>, vector<32x128xf32> -> vector<32x128xf32>
      %207 = arith.index_cast %arg20 : i32 to index
      %c0_73 = arith.constant 0 : index
      %c0_74 = arith.constant 0 : index
      %208 = vector.load %arg16[%207, %c0_73, %c0_74] : memref<2x1x128xf32, #tpu.memory_space<vmem>>, vector<1x1x128xf32>
      %209 = vector.shape_cast %208 : vector<1x1x128xf32> to vector<1x128xf32>
      %210 = vector.broadcast %209 : vector<1x128xf32> to vector<32x128xf32>
      %211 = arith.addf %206, %210 : vector<32x128xf32>
      %212 = arith.addf %189, %211 : vector<32x128xf32>
      %213 = vector.broadcast %3 : vector<32x1xf32> to vector<32x128xf32>
      %214 = arith.mulf %212, %213 : vector<32x128xf32>
      scf.yield %214 : vector<32x128xf32>
    }
    %c2_i32_6 = arith.constant 2 : i32
    %c0_7 = arith.constant 0 : index
    %c0_8 = arith.constant 0 : index
    %15 = vector.load %arg17[%c0_7, %c0_8] : memref<1x128xf32, #tpu.memory_space<vmem>>, vector<1x128xf32>
    %c0_9 = arith.constant 0 : index
    %c0_10 = arith.constant 0 : index
    %16 = vector.load %arg18[%c0_9, %c0_10] : memref<1x128xf32, #tpu.memory_space<vmem>>, vector<1x128xf32>
    %cst_11 = arith.constant dense<0.000000e+00> : vector<32xf32>
    %17 = vector.multi_reduction <add>, %14, %cst_11 [1] : vector<32x128xf32> to vector<32xf32>
    %18 = vector.shape_cast %17 : vector<32xf32> to vector<32x1xf32>
    %cst_12 = arith.constant 3.125000e-02 : f32
    %19 = vector.broadcast %cst_12 : f32 to vector<32x1xf32>
    %20 = arith.mulf %18, %19 : vector<32x1xf32>
    %21 = arith.mulf %14, %14 : vector<32x128xf32>
    %cst_13 = arith.constant dense<0.000000e+00> : vector<32xf32>
    %22 = vector.multi_reduction <add>, %21, %cst_13 [1] : vector<32x128xf32> to vector<32xf32>
    %23 = vector.shape_cast %22 : vector<32xf32> to vector<32x1xf32>
    %cst_14 = arith.constant 3.125000e-02 : f32
    %24 = vector.broadcast %cst_14 : f32 to vector<32x1xf32>
    %25 = arith.mulf %23, %24 : vector<32x1xf32>
    %26 = arith.mulf %20, %20 : vector<32x1xf32>
    %27 = arith.subf %25, %26 : vector<32x1xf32>
    %cst_15 = arith.constant 0.000000e+00 : f32
    %28 = vector.broadcast %cst_15 : f32 to vector<32x1xf32>
    %29 = arith.maximumf %27, %28 : vector<32x1xf32>
    %30 = vector.broadcast %20 : vector<32x1xf32> to vector<32x128xf32>
    %31 = arith.subf %14, %30 : vector<32x128xf32>
    %cst_16 = arith.constant 9.99999993E-9 : f32
    %32 = vector.broadcast %cst_16 : f32 to vector<32x1xf32>
    %33 = arith.addf %29, %32 : vector<32x1xf32>
    %34 = math.rsqrt %33 : vector<32x1xf32>
    %35 = vector.broadcast %34 : vector<32x1xf32> to vector<32x128xf32>
    %36 = arith.mulf %31, %35 : vector<32x128xf32>
    %37 = vector.broadcast %15 : vector<1x128xf32> to vector<32x128xf32>
    %38 = arith.mulf %36, %37 : vector<32x128xf32>
    %39 = vector.broadcast %16 : vector<1x128xf32> to vector<32x128xf32>
    %40 = arith.addf %38, %39 : vector<32x128xf32>
    %41 = vector.shape_cast %40 : vector<32x128xf32> to vector<4x8x128xf32>
    %42 = arith.truncf %41 : vector<4x8x128xf32> to vector<4x8x128xbf16>
    %c0_17 = arith.constant 0 : index
    %c0_18 = arith.constant 0 : index
    %c0_19 = arith.constant 0 : index
    %43 = vector.load %arg19[%c0_17, %c0_18, %c0_19] : memref<4x8x128xbf16, #tpu.memory_space<vmem>>, vector<4x8x128xbf16>
    tpu.vector_store %arg19[%c0_17, %c0_18, %c0_19], %42 {strides = array<i32>} : memref<4x8x128xbf16, #tpu.memory_space<vmem>>, vector<4x8x128xbf16>,
    return
  }
  func.func @transform_0(%arg0: i32) -> (i32, i32, i32) {
    %c0_i32 = arith.constant 0 : i32
    %c0_i32_0 = arith.constant 0 : i32
    %c0_i32_1 = arith.constant 0 : i32
    return %arg0, %c0_i32, %c0_i32_0 : i32, i32, i32
  }
  func.func @transform_1(%arg0: i32) -> (i32, i32, i32) {
    %c0_i32 = arith.constant 0 : i32
    %c0_i32_0 = arith.constant 0 : i32
    %c0_i32_1 = arith.constant 0 : i32
    return %arg0, %c0_i32, %c0_i32_0 : i32, i32, i32
  }
  func.func @transform_2(%arg0: i32) -> (i32, i32, i32) {
    %c0_i32 = arith.constant 0 : i32
    %c0_i32_0 = arith.constant 0 : i32
    %c0_i32_1 = arith.constant 0 : i32
    %c0_i32_2 = arith.constant 0 : i32
    return %c0_i32, %c0_i32_0, %c0_i32_1 : i32, i32, i32
  }
  func.func @transform_3(%arg0: i32) -> (i32, i32, i32) {
    %c0_i32 = arith.constant 0 : i32
    %c0_i32_0 = arith.constant 0 : i32
    %c0_i32_1 = arith.constant 0 : i32
    %c0_i32_2 = arith.constant 0 : i32
    return %c0_i32, %c0_i32_0, %c0_i32_1 : i32, i32, i32
  }
  func.func @transform_4(%arg0: i32) -> (i32, i32, i32) {
    %c0_i32 = arith.constant 0 : i32
    %c0_i32_0 = arith.constant 0 : i32
    %c0_i32_1 = arith.constant 0 : i32
    %c0_i32_2 = arith.constant 0 : i32
    return %c0_i32, %c0_i32_0, %c0_i32_1 : i32, i32, i32
  }
  func.func @transform_5(%arg0: i32) -> (i32, i32, i32) {
    %c0_i32 = arith.constant 0 : i32
    %c0_i32_0 = arith.constant 0 : i32
    %c0_i32_1 = arith.constant 0 : i32
    %c0_i32_2 = arith.constant 0 : i32
    return %c0_i32, %c0_i32_0, %c0_i32_1 : i32, i32, i32
  }
  func.func @transform_6(%arg0: i32) -> (i32, i32, i32) {
    %c0_i32 = arith.constant 0 : i32
    %c0_i32_0 = arith.constant 0 : i32
    %c0_i32_1 = arith.constant 0 : i32
    %c0_i32_2 = arith.constant 0 : i32
    return %c0_i32, %c0_i32_0, %c0_i32_1 : i32, i32, i32
  }
  func.func @transform_7(%arg0: i32) -> (i32, i32, i32) {
    %c0_i32 = arith.constant 0 : i32
    %c0_i32_0 = arith.constant 0 : i32
    %c0_i32_1 = arith.constant 0 : i32
    %c0_i32_2 = arith.constant 0 : i32
    return %c0_i32, %c0_i32_0, %c0_i32_1 : i32, i32, i32
  }
  func.func @transform_8(%arg0: i32) -> (i32, i32, i32) {
    %c0_i32 = arith.constant 0 : i32
    %c0_i32_0 = arith.constant 0 : i32
    %c0_i32_1 = arith.constant 0 : i32
    %c0_i32_2 = arith.constant 0 : i32
    return %c0_i32, %c0_i32_0, %c0_i32_1 : i32, i32, i32
  }
  func.func @transform_9(%arg0: i32) -> (i32, i32, i32) {
    %c0_i32 = arith.constant 0 : i32
    %c0_i32_0 = arith.constant 0 : i32
    %c0_i32_1 = arith.constant 0 : i32
    %c0_i32_2 = arith.constant 0 : i32
    return %c0_i32, %c0_i32_0, %c0_i32_1 : i32, i32, i32
  }
  func.func @transform_10(%arg0: i32) -> (i32, i32, i32) {
    %c0_i32 = arith.constant 0 : i32
    %c0_i32_0 = arith.constant 0 : i32
    %c0_i32_1 = arith.constant 0 : i32
    %c0_i32_2 = arith.constant 0 : i32
    return %c0_i32, %c0_i32_0, %c0_i32_1 : i32, i32, i32
  }
  func.func @transform_11(%arg0: i32) -> (i32, i32, i32) {
    %c0_i32 = arith.constant 0 : i32
    %c0_i32_0 = arith.constant 0 : i32
    %c0_i32_1 = arith.constant 0 : i32
    %c0_i32_2 = arith.constant 0 : i32
    return %c0_i32, %c0_i32_0, %c0_i32_1 : i32, i32, i32
  }
  func.func @transform_12(%arg0: i32) -> (i32, i32, i32) {
    %c0_i32 = arith.constant 0 : i32
    %c0_i32_0 = arith.constant 0 : i32
    %c0_i32_1 = arith.constant 0 : i32
    %c0_i32_2 = arith.constant 0 : i32
    return %c0_i32, %c0_i32_0, %c0_i32_1 : i32, i32, i32
  }
  func.func @transform_13(%arg0: i32) -> (i32, i32, i32) {
    %c0_i32 = arith.constant 0 : i32
    %c0_i32_0 = arith.constant 0 : i32
    %c0_i32_1 = arith.constant 0 : i32
    %c0_i32_2 = arith.constant 0 : i32
    return %c0_i32, %c0_i32_0, %c0_i32_1 : i32, i32, i32
  }
  func.func @transform_14(%arg0: i32) -> (i32, i32, i32) {
    %c0_i32 = arith.constant 0 : i32
    %c0_i32_0 = arith.constant 0 : i32
    %c0_i32_1 = arith.constant 0 : i32
    %c0_i32_2 = arith.constant 0 : i32
    return %c0_i32, %c0_i32_0, %c0_i32_1 : i32, i32, i32
  }
  func.func @transform_15(%arg0: i32) -> (i32, i32, i32) {
    %c0_i32 = arith.constant 0 : i32
    %c0_i32_0 = arith.constant 0 : i32
    %c0_i32_1 = arith.constant 0 : i32
    %c0_i32_2 = arith.constant 0 : i32
    return %c0_i32, %c0_i32_0, %c0_i32_1 : i32, i32, i32
  }
  func.func @transform_16(%arg0: i32) -> (i32, i32) {
    %c0_i32 = arith.constant 0 : i32
    %c0_i32_0 = arith.constant 0 : i32
    %c0_i32_1 = arith.constant 0 : i32
    return %c0_i32, %c0_i32_0 : i32, i32
  }
  func.func @transform_17(%arg0: i32) -> (i32, i32) {
    %c0_i32 = arith.constant 0 : i32
    %c0_i32_0 = arith.constant 0 : i32
    %c0_i32_1 = arith.constant 0 : i32
    return %c0_i32, %c0_i32_0 : i32, i32
  }
  func.func @transform_18(%arg0: i32) -> (i32, i32, i32) {
    %c0_i32 = arith.constant 0 : i32
    %c0_i32_0 = arith.constant 0 : i32
    %c0_i32_1 = arith.constant 0 : i32
    return %arg0, %c0_i32, %c0_i32_0 : i32, i32, i32
  }
}

</mosaic_0001>

<bundles_post_ra>
// kernel: tpu_custom_call.1
= control target key start
LH: loop header
LB: loop body
LE: loop exit
PB: predicated region body
PF: predicated region fallthrough
CT: control target
= control target key end

     0   :  { %s4465_s0 = inlined_call_operand.vmem [shape: f32[8,8,128], index: 0, kind: input, shape index: {}]   ;;  %s4466_s1 = inlined_call_operand.vmem [shape: f32[8,8,1], index: 1, kind: input, shape index: {}]   ;;  %s4467_s2 = inlined_call_operand.vmem [shape: f32[2,1,128], index: 2, kind: input, shape index: {}]   ;;  %s4468_s3 = inlined_call_operand.vmem [shape: f32[2,1,128], index: 3, kind: input, shape index: {}]   ;;  %s4469_s4 = inlined_call_operand.hbm [shape: bf16[2,128,128], index: 4, kind: input, shape index: {}]   ;;  %s4470_s5 = inlined_call_operand.vmem [shape: f32[2,1,128], index: 5, kind: input, shape index: {}]   ;;  %s4471_s6 = inlined_call_operand.hbm [shape: bf16[2,128,256], index: 6, kind: input, shape index: {}]   ;;  %s4472_s7 = inlined_call_operand.vmem [shape: f32[2,1,256], index: 7, kind: input, shape index: {}]   ;;  %s4473_s8 = inlined_call_operand.hbm [shape: bf16[2,128,128], index: 8, kind: input, shape index: {}]   ;;  %s4474_s9 = inlined_call_operand.vmem [shape: f32[2,1,128], index: 9, kind: input, shape index: {}]   ;;  %s4475_s10 = inlined_call_operand.vmem [shape: f32[2,1,128], index: 10, kind: input, shape index: {}]   ;;  %s4476_s11 = inlined_call_operand.vmem [shape: f32[2,1,128], index: 11, kind: input, shape index: {}]   ;;  %s4477_s12 = inlined_call_operand.hbm [shape: bf16[2,128,128], index: 12, kind: input, shape index: {}]   ;;  %s4478_s13 = inlined_call_operand.vmem [shape: f32[2,1,128], index: 13, kind: input, shape index: {}]   ;;  %s4479_s14 = inlined_call_operand.hbm [shape: bf16[2,128,128], index: 14, kind: input, shape index: {}]   ;;  %s4480_s15 = inlined_call_operand.vmem [shape: f32[2,1,128], index: 15, kind: input, shape index: {}]   ;;  %s4481_s16 = inlined_call_operand.vmem [shape: f32[1,128], index: 16, kind: input, shape index: {}]   ;;  %s4482_s17 = inlined_call_operand.vmem [shape: f32[1,128], index: 17, kind: input, shape index: {}]   ;;  %s4483_s18 = inlined_call_operand.hbm [shape: bf16[8,8,128], index: 18, kind: output, shape index: {}]  }
   0x1   :  { %4496 = sst [smem:[#allocation23_spill]] %s4465_s0 }
   0x2   :  { %4497 = sst [smem:[#allocation24_spill]] %s4466_s1 }
   0x3   :  { %4498 = sst [smem:[#allocation25_spill]] %s4467_s2 }
   0x4   :  { %4499 = sst [smem:[#allocation26_spill]] %s4478_s13 }
   0x5   :  { %4500 = sst [smem:[#allocation27_spill]] %s4480_s15 }
   0x6   :  { %4501 = sst [smem:[#allocation28_spill]] %s4481_s16 }
   0x7   :  { %4502 = sst [smem:[#allocation29_spill]] %s4482_s17 }
   0x8   :  { %4503 = sst [smem:[#allocation30_spill]] %s4483_s18 }
   0x9   :  { %23 = vsyncpa [#allocation3], 0 }
   0xa   :  { %24 = vsyncpa [#allocation6], 0 }
   0xb   :  { %25 = vsyncpa [#allocation9], 0 }
   0xc   :  { %26 = vsyncpa [#allocation4], 0 }
   0xd   :  { %28 = vsyncpa [#allocation4 + $0x1], 0  ;;  %s3781_s27 = smov 0   ;;  %s3783_s28 = smov 0  }
   0xe   :  { %s3785_s29 = smov 0   ;;  %s3787_s30 = smov 0  }
   0xf LB: > { %4504 = sst [smem:[#allocation16_spill]] %s3635_s27  ;;  %s3802_s0 = sadd.s32 4294967295, %s3647_s30   ;;  %s3647_s30 = sphi %s3787_s30, %s4545_s30   ;;  %s3643_s29 = sphi %s3785_s29, %s4547_s29   ;;  %s3639_s28 = sphi %s3783_s28, %s4549_s28   ;;  %s3635_s27 = sphi %s3781_s27, %s4548_s27  }
  0x10   : > { %4505 = sst [smem:[#allocation17_spill]] %s3643_s29  ;;  %s2773_s19 = sadd.s32 4294967294, %s3647_s30  }
  0x11   : > { %4506 = sst [smem:[#allocation18_spill]] %s3647_s30  ;;  %s3806_s1 = sadd.s32 1, %s3647_s30  }
  0x12   : > { %4507 = sst [smem:[#allocation19_spill]] %s3806_s1  ;;  %s429_s20 = sadd.s32 1, %s3643_s29 }
  0x13   : > { %s426_s21 = ssub.s32 %s3647_s30, %s3806_s1  ;;  %p439_p0 = scmp.ne.s32.totalorder %s3643_s29, %s3639_s28 }
  0x14   : > { %p427_p1 = scmp.eq.s32.totalorder %s426_s21, 0  ;;  %p440_p2 = scmp.eq.s32.totalorder %s3802_s0, 1 }
  0x15   : > { %p445_p3 = scmp.ne.s32.totalorder %s3639_s28, %s3635_s27  ;;  %p446_p4 = scmp.eq.s32.totalorder %s2773_s19, 1 }
  0x16   : > { %s3817_s22 = scalar_select %p427_p1, %s3643_s29, %s429_s20  }
  0x17   : > { %p3819_p5 = por %p440_p2, %p439_p0  ;;  %p3823_p6 = por %p446_p4, %p445_p3 }
  0x18   : > { %4508 = sst [smem:[#allocation20_spill]] %s3817_s22  ;;  %p2774_p7 = scmp.ge.s32.totalorder %s3647_s30, 1 }
  0x19   : > { %s4509_s2 = scalar_select %p3819_p5, 1, 0 }
  0x1a   : > { %s4511_s23 = scalar_select %p3823_p6, 1, 0 }
  0x1b   : > { %4510 = sst [smem:[#allocation21_spill]] %s4509_s2  ;;  %p453_p8 = scmp.lt.s32.totalorder %s3647_s30, 3 }
  0x1c   : > { %4512 = sst [smem:[#allocation22_spill]] %s4511_s23  ;;  %p4491_p9 = scmp.eq.s32.totalorder %s3802_s0, 0 }
  0x1d   : > { %p3830_p10 = pnand %p2774_p7, %p453_p8  ;;  %s3669_s25 = smov [#allocation5]  }
  0x1e   : > { %s487_s26 = sshll.u32 %s3669_s25, 4  ;;  %s3670_s20 = smov [#allocation8]   ;;  %s488_s26 = int_to_ptr.vmem [resolvable:$true] %s487_s26 }
  0x1f   : > { %s4513_s24 = scalar_select %p3830_p10, 1, 0 }
  0x20   : > { %p3180_p11 = pneg %p3830_p10  ;;  %s525_s21 = sshll.u32 %s3670_s20, 4  ;;  %s526_s21 = int_to_ptr.vmem [resolvable:$true] %s525_s21 }
  0x21   : > { %s3413_s1 = scalar_lea.hbm %s4471_s6, 4096 }
  0x22   : > { %p3838_p12 = pnand %p4491_p9, %p3180_p11  ;;  %p3414_p13 = scmp.ne.s32.totalorder %s4471_s6, %s3413_s1 }
  0x23   : > { %p3420_p3 = scmp.lt.u32.totalorder %s3413_s1, %s4471_s6 }
  0x24   : > { %p3850_p0 = pneg %p3838_p12 }
  0x26   : > { %p3416_p1 = pnand %p3850_p0, %p3414_p13 }
  0x28   : > { %p3417_p2 = pneg %p3416_p1 }
  0x2a   : > { %p3422_p4 = pnand %p3420_p3, %p3417_p2 }
  0x2c   : > { %3425 = shalt.err (!%p3422_p4)
}
  0x2d   : > { %s3426_s29 = scalar_lea.vmem %s488_s26, 4096  ;;  %p3434_p9 = scmp.lt.s32.totalorder %s488_s26, %s488_s26 }
  0x2e   : > { %p3427_p7 = scmp.ne.s32.totalorder %s488_s26, %s3426_s29  ;;  %p3435_p6 = scmp.lt.s32.totalorder %s3426_s29, %s3426_s29 }
  0x30   : > { %p3429_p8 = pnand %p3427_p7, %p3850_p0  ;;  %p3436_p5 = por %p3435_p6, %p3434_p9 }
  0x32   : > { %p3430_p11 = pneg %p3429_p8 }
  0x34   : > { %p3437_p10 = pnand %p3436_p5, %p3430_p11 }
  0x36   : > { %3440 = shalt.err (!%p3437_p10)
}
  0x37   : > { %s3671_s27 = smov 128   ;;  %s3672_s22 = smov 8  }
  0x38   : > { %3186 = dma.hbm_to_vmem [thread:$0]  (!%p3838_p12), %s4471_s6, 4096, %s488_s26, [#allocation6], %s3671_s27, %s3671_s27, %s3672_s22  }
  0x39   : > { %s3673_s1 = smov [#allocation2]   ;;  %s3441_s17 = scalar_lea.hbm %s4477_s12, 2048 }
  0x3a   : > { %s471_s23 = sshll.u32 %s3673_s1, 4  ;;  %p3442_p5 = scmp.ne.s32.totalorder %s4477_s12, %s3441_s17  ;;  %s472_s23 = int_to_ptr.vmem [resolvable:$true] %s471_s23 }
  0x3b   : > { %p3448_p10 = scmp.lt.u32.totalorder %s3441_s17, %s4477_s12 }
  0x3c   : > { %p3444_p6 = pnand %p3442_p5, %p3850_p0 }
  0x3e   : > { %p3445_p9 = pneg %p3444_p6 }
  0x40   : > { %p3450_p13 = pnand %p3448_p10, %p3445_p9 }
  0x42   : > { %3453 = shalt.err (!%p3450_p13)
}
  0x43   : > { %s3454_s26 = scalar_lea.vmem %s526_s21, 2048  ;;  %p3462_p4 = scmp.lt.s32.totalorder %s526_s21, %s526_s21 }
  0x44   : > { %p3455_p1 = scmp.ne.s32.totalorder %s526_s21, %s3454_s26  ;;  %p3463_p7 = scmp.lt.s32.totalorder %s3454_s26, %s3454_s26 }
  0x46   : > { %p3457_p2 = pnand %p3455_p1, %p3850_p0  ;;  %p3464_p8 = por %p3463_p7, %p3462_p4 }
  0x48   : > { %p3458_p3 = pneg %p3457_p2 }
  0x4a   : > { %p3465_p11 = pnand %p3464_p8, %p3458_p3 }
  0x4c   : > { %3468 = shalt.err (!%p3465_p11)
}
  0x4d   : > { %s3674_s16 = smov 64   ;;  %s3675_s2 = smov 4  }
  0x4e   : > { %3192 = dma.hbm_to_vmem [thread:$0]  (!%p3838_p12), %s4477_s12, 2048, %s526_s21, [#allocation9], %s3674_s16, %s3674_s16, %s3675_s2  }
  0x4f   : > { %s3469_s22 = scalar_lea.hbm %s4469_s4, 2048 }
  0x50   : > { %p3470_p5 = scmp.ne.s32.totalorder %s4469_s4, %s3469_s22  ;;  %p3476_p10 = scmp.lt.u32.totalorder %s3469_s22, %s4469_s4 }
  0x52   : > { %p3472_p6 = pnand %p3470_p5, %p3850_p0 }
  0x54   : > { %p3473_p9 = pneg %p3472_p6 }
  0x56   : > { %p3478_p13 = pnand %p3476_p10, %p3473_p9 }
  0x58   : > { %3481 = shalt.err (!%p3478_p13)
}
  0x59   : > { %s3482_s29 = scalar_lea.vmem %s472_s23, 2048  ;;  %p3490_p4 = scmp.lt.s32.totalorder %s472_s23, %s472_s23 }
  0x5a   : > { %p3483_p1 = scmp.ne.s32.totalorder %s472_s23, %s3482_s29  ;;  %p3491_p7 = scmp.lt.s32.totalorder %s3482_s29, %s3482_s29 }
  0x5c   : > { %p3485_p2 = pnand %p3483_p1, %p3850_p0  ;;  %p3492_p8 = por %p3491_p7, %p3490_p4 }
  0x5e   : > { %p3486_p3 = pneg %p3485_p2 }
  0x60   : > { %p3493_p11 = pnand %p3492_p8, %p3486_p3 }
  0x62   : > { %3496 = shalt.err (!%p3493_p11)
}
  0x63   : > { %3183 = dma.hbm_to_vmem [thread:$0]  (!%p3838_p12), %s4469_s4, 2048, %s472_s23, [#allocation3], %s3674_s16, %s3674_s16, %s3675_s2  }
  0x64   : > { %s3676_s13 = smov [#allocation7]   ;;  %s3677_s17 = smov [#allocation10]  }
  0x65   : > { %s503_s15 = sshll.u32 %s3676_s13, 4  ;;  %s541_s27 = sshll.u32 %s3677_s17, 4  ;;  %s504_s15 = int_to_ptr.vmem [resolvable:$true] %s503_s15  ;;  %s542_s27 = int_to_ptr.vmem [resolvable:$true] %s541_s27 }
  0x66   : > { %s3497_s30 = scalar_lea.hbm %s4473_s8, 2048 }
  0x67   : > { %p3498_p5 = scmp.ne.s32.totalorder %s4473_s8, %s3497_s30  ;;  %p3504_p10 = scmp.lt.u32.totalorder %s3497_s30, %s4473_s8 }
  0x69   : > { %p3500_p6 = pnand %p3498_p5, %p3850_p0 }
  0x6b   : > { %p3501_p9 = pneg %p3500_p6 }
  0x6d   : > { %p3506_p13 = pnand %p3504_p10, %p3501_p9 }
  0x6f   : > { %3509 = shalt.err (!%p3506_p13)
}
  0x70   : > { %s3510_s23 = scalar_lea.vmem %s504_s15, 2048  ;;  %p3518_p4 = scmp.lt.s32.totalorder %s504_s15, %s504_s15 }
  0x71   : > { %p3511_p1 = scmp.ne.s32.totalorder %s504_s15, %s3510_s23  ;;  %p3519_p7 = scmp.lt.s32.totalorder %s3510_s23, %s3510_s23 }
  0x73   : > { %p3513_p2 = pnand %p3511_p1, %p3850_p0  ;;  %p3520_p8 = por %p3519_p7, %p3518_p4 }
  0x75   : > { %p3514_p3 = pneg %p3513_p2 }
  0x77   : > { %p3521_p11 = pnand %p3520_p8, %p3514_p3 }
  0x79   : > { %3524 = shalt.err (!%p3521_p11)
}
  0x7a   : > { %3189 = dma.hbm_to_vmem [thread:$0]  (!%p3838_p12), %s4473_s8, 2048, %s504_s15, [#allocation6], %s3674_s16, %s3674_s16, %s3675_s2  }
  0x7b   : > { %s3525_s18 = scalar_lea.hbm %s4479_s14, 2048 }
  0x7c   : > { %p3526_p5 = scmp.ne.s32.totalorder %s4479_s14, %s3525_s18  ;;  %p3532_p10 = scmp.lt.u32.totalorder %s3525_s18, %s4479_s14 }
  0x7e   : > { %p3528_p6 = pnand %p3526_p5, %p3850_p0 }
  0x80   : > { %p3529_p9 = pneg %p3528_p6 }
  0x82   : > { %p3534_p13 = pnand %p3532_p10, %p3529_p9 }
  0x84   : > { %3537 = shalt.err (!%p3534_p13)
}
  0x85   : > { %s3538_s21 = scalar_lea.vmem %s542_s27, 2048  ;;  %p3546_p4 = scmp.lt.s32.totalorder %s542_s27, %s542_s27 }
  0x86   : > { %p3539_p1 = scmp.ne.s32.totalorder %s542_s27, %s3538_s21  ;;  %p3547_p7 = scmp.lt.s32.totalorder %s3538_s21, %s3538_s21 }
  0x88   : > { %p3541_p2 = pnand %p3539_p1, %p3850_p0  ;;  %p3548_p8 = por %p3547_p7, %p3546_p4 }
  0x8a   : > { %p3542_p3 = pneg %p3541_p2 }
  0x8c   : > { %p3549_p11 = pnand %p3548_p8, %p3542_p3 }
  0x8e   : > { %3552 = shalt.err (!%p3549_p11)
}
  0x8f   : > { %3195 = dma.hbm_to_vmem [thread:$0]  (!%p3838_p12), %s4479_s14, 2048, %s542_s27, [#allocation9], %s3674_s16, %s3674_s16, %s3675_s2  }
  0x90   : > { %p4516_p5 = scmp.ne.s32.totalorder %s4513_s24, 0 }
  0x91   : > { %p4517_p0 = scmp.eq.s32.totalorder (!%p4516_p5), %s3802_s0, 0 }
  0x92   : > { %584 = sbr.rel (%p4516_p5) target bundleno = 3030 (0xbd6), region = 92 }
  0x99   : > { %3618 = dma.done.wait (%p4517_p0), [#allocation3], 2048   ;;  %p4518_p6 = pmov %p4517_p0 }
  0x9a   : > { %p4519_p9 = pmov %p4517_p0 }
  0x9b   : > { %3620 = vsyncadd (%p4518_p6), [#allocation3], 4294965248 }
  0x9c   : > { %3622 = dma.done.wait (%p4519_p9), [#allocation6], 6144   ;;  %p4520_p10 = pmov %p4517_p0 }
  0x9d   : > { %p4521_p13 = pmov %p4517_p0 }
  0x9e   : > { %3624 = vsyncadd (%p4520_p10), [#allocation6], 4294961152 }
  0x9f   : > { %3626 = dma.done.wait (%p4521_p13), [#allocation9], 4096   ;;  %p4522_p12 = pmov %p4517_p0 }
  0xa0   : > { %s2788_s24 = sshll.u32 %s3802_s0, 2  ;;  %s656_s19 = sand.u32 1, %s3639_s28   ;;  %v681_v0 = vlaneseq  ;;  %v3678_v3 = vmov 0.0  }
  0xa1   : > { %3628 = vsyncadd (%p4522_p12), [#allocation9], 4294963200  ;;  %p660_p1 = scmp.lt.s32.totalorder %s2788_s24, 7  ;;  %s2787_s25 = sshll.u32 %s656_s19, 4 }
  0xa2   : > { %v3968_v1 = vshrl.u32 %v681_v0, 7  ;;  %v684_v2 = vand.u32 127, %v681_v0  ;;  %s4523_s26 = sld [smem:[#allocation23_spill]]  ;;  %s4524_s18 = sld [smem:[#allocation24_spill]] }
  0xa3   : > { %s4551_s24 = smov (!%p660_p1, %s2788_s24), 7  ;;  %s3987_s1 = scalar_lea.vmem [#allocation11], %s2787_s25 }
  0xa4   : > { %vm685_vm0 = vcmp.gt.s32.totalorder %v684_v2, %v3968_v1  ;;  %s2789_s16 = sshll.u32 %s4551_s24, 3  ;;  %s3997_s20 = smov 0  }
  0xa5   : > { %v3971_v4 = vsel %vm685_vm0, -1e+30, %v3678_v3 }
  0xa8   : > { %s663_s13 = scalar_lea.vmem %s4523_s26, %s2789_s16  ;;  %s669_s30 = scalar_lea.vmem %s4524_s18, %s2789_s16 }
  0xa9   : > { %v673_v5 = vld [vmem:[%s663_s13] sm:$0xff]   ;;  %v674_v6 = vld [vmem:[%s663_s13 + $0x8] sm:$0xff]   ;;  %v675_v7 = vld [vmem:[%s663_s13 + $0x10] sm:$0xff]  }
  0xaa   : > { %v676_v8 = vld [vmem:[%s663_s13 + $0x18] sm:$0xff]   ;;  %v3979_v9 = vld [vmem:[%s669_s30] sm:$0xff]  ;;  %v3981_v10 = vld [vmem:[%s669_s30 + $0x8] sm:$0xff] }
  0xab   : > { %v3983_v11 = vld [vmem:[%s669_s30 + $0x10] sm:$0xff]  ;;  %v3985_v12 = vld [vmem:[%s669_s30 + $0x18] sm:$0xff] }
  0xac LB: >> { %701 = vadd.xlane.f32.xlu0 %v3663_v5  ;;  %705 = vadd.xlane.f32.xlu1 %v3655_v7  ;;  %s2884_s29 = sshll.u32 %s3667_s20, 7  ;;  %v713_v15 = vmul.f32 %v3663_v5, %v3663_v5  ;;  %v714_v16 = vmul.f32 %v3659_v6, %v3659_v6  ;;  %v715_v17 = vmul.f32 %v3655_v7, %v3655_v7  ;;  %s4035_s15 = sshll.u32 %s3667_s20, 6  ;;  %v3679_v38 = vmov 0   ;;  %s3667_s20 = sphi %s3997_s20, %s692_s20   ;;  %v3663_v5 = vphi %v673_v5, %v4535_v5   ;;  %v3659_v6 = vphi %v674_v6, %v4534_v6   ;;  %v3655_v7 = vphi %v675_v7, %v4533_v7   ;;  %v3651_v8 = vphi %v676_v8, %v4532_v8  }
  0xad   : >> { %s4017_s21 = scalar_lea.vmem [#allocation5], %s2884_s29  ;;  %v716_v18 = vmul.f32 %v3651_v8, %v3651_v8  ;;  %s4039_s23 = scalar_lea.vmem [#allocation2], %s4035_s15  ;;  %1050 = vmatprep.mubr.bf16.mxu1 %v3679_v38  ;;  %3300 = vset.pattern.permute.xlu1 %v3679_v38  ;;  %v779_v40 = vpack.c.bf16 %v3659_v6, %v3663_v5  ;;  %v780_v43 = vpack.c.bf16 %v3651_v8, %v3655_v7  ;;  %v3680_v44 = vmov 0.0  }
  0xae   : >> { %v3301_v13 = vld [vmem:[%s4017_s21 + $0x4] ss:$8 sps:$4 sm:$0xff]   ;;  %v3303_v14 = vld [vmem:[%s4017_s21] ss:$8 sps:$4 sm:$0xff]   ;;  %v3304_v19 = vld [vmem:[%s4017_s21 + $0x14] ss:$8 sps:$4 sm:$0xff]   ;;  %3299 = vset.pattern.permute.xlu0 %v3679_v38  ;;  %s699_s13 = scalar_lea.vmem %s4468_s3, %s3667_s20  ;;  %s2134_s27 = scalar_lea.vmem %s4474_s9, %s3667_s20 }
  0xaf   : >> { %1018 = vmatprep.subr.bf16.mxu1 %v3301_v13  ;;  %v3306_v20 = vld [vmem:[%s4017_s21 + $0x10] ss:$8 sps:$4 sm:$0xff]   ;;  %v3307_v21 = vld [vmem:[%s4017_s21 + $0x24] ss:$8 sps:$4 sm:$0xff]   ;;  %v3309_v22 = vld [vmem:[%s4017_s21 + $0x20] ss:$8 sps:$4 sm:$0xff]   ;;  %s2150_s22 = scalar_lea.vmem %s4475_s10, %s3667_s20  ;;  %s2152_s29 = scalar_lea.vmem %s4476_s11, %s3667_s20 }
  0xb0   : >> { %703 = vadd.xlane.f32.xlu0 %v3659_v6  ;;  %707 = vadd.xlane.f32.xlu1 %v3651_v8  ;;  %v3310_v23 = vld [vmem:[%s4039_s23] sm:$0xff]   ;;  %v3311_v24 = vld [vmem:[%s4017_s21 + $0x34] ss:$8 sps:$4 sm:$0xff]   ;;  %v3313_v25 = vld [vmem:[%s4017_s21 + $0x30] ss:$8 sps:$4 sm:$0xff]   ;;  %s4525_s16 = sld [smem:[#allocation25_spill]] }
  0xb1   : >> { %1019 = vmatpush1.bf16.msra.mxu1 %v3303_v14  ;;  %2974 = vmatprep.subr.bf16.mxu0 %v3310_v23  ;;  %v3314_v26 = vld [vmem:[%s4039_s23 + $0x8] sm:$0xff]   ;;  %v3318_v29 = vld [vmem:[%s4039_s23 + $0x10] sm:$0xff]   ;;  %v3322_v32 = vld [vmem:[%s4039_s23 + $0x18] sm:$0xff]   ;;  %s2807_s17 = sshll.u32 %s3667_s20, 1  ;;  %vm1101_vm1 = vcmask 523264   ;;  %vm1338_vm2 = vcmask 1043456  }
  0xb2   : >> { %1020 = vmatprep.subr.bf16.mxu1 %v3304_v19  ;;  %2975 = vmatpush3.bf16.msra.mxu0 %v3310_v23  ;;  %v3315_v27 = vld [vmem:[%s4017_s21 + $0x44] ss:$8 sps:$4 sm:$0xff]   ;;  %v3317_v28 = vld [vmem:[%s4017_s21 + $0x40] ss:$8 sps:$4 sm:$0xff]   ;;  %v3319_v30 = vld [vmem:[%s4017_s21 + $0x54] ss:$8 sps:$4 sm:$0xff]   ;;  %s925_s30 = scalar_lea.vmem %s4472_s7, %s2807_s17 }
  0xb3   : >> { %2976 = vmatprep.subr.bf16.mxu0 %v3314_v26  ;;  %v3321_v31 = vld [vmem:[%s4017_s21 + $0x50] ss:$8 sps:$4 sm:$0xff]   ;;  %v3323_v33 = vld [vmem:[%s4017_s21 + $0x64] ss:$8 sps:$4 sm:$0xff]   ;;  %v3325_v34 = vld [vmem:[%s4017_s21 + $0x60] ss:$8 sps:$4 sm:$0xff]  }
  0xb4   : >> { %717 = vadd.xlane.f32.xlu0 %v713_v15  ;;  %719 = vadd.xlane.f32.xlu1 %v714_v16  ;;  %v3326_v35 = vld [vmem:[%s4039_s23 + $0x20] sm:$0xff]   ;;  %v3327_v36 = vld [vmem:[%s4017_s21 + $0x74] ss:$8 sps:$4 sm:$0xff]   ;;  %v3330_v37 = vld [vmem:[%s4039_s23 + $0x28] sm:$0xff]   ;;  %vm3681_vm3 = vmmov 0   ;;  %vm1286_vm4 = vcmask 64512  }
  0xb5   : >> { %1021 = vmatpush1.bf16.msra.mxu1 %v3306_v20  ;;  %v3329_v39 = vld [vmem:[%s4017_s21 + $0x70] ss:$8 sps:$4 sm:$0xff]   ;;  %s3682_s24 = smov 64   ;;  %s4282_s25 = scalar_lea.vmem [#allocation7], %s4035_s15 }
  0xb6   : >> { %1022 = vmatprep.subr.bf16.mxu1 %v3307_v21  ;;  %2977 = vmatpush3.bf16.msra.mxu0 %v3314_v26  ;;  %v3331_v41 = vld [vmem:[%s4039_s23 + $0x30] sm:$0xff]   ;;  %v3332_v42 = vld [vmem:[%s4039_s23 + $0x38] sm:$0xff]   ;;  %s697_s2 = scalar_lea.vmem %s4525_s16, %s3667_s20  ;;  %s800_s23 = scalar_lea.vmem %s4470_s5, %s3667_s20 }
  0xb7   : >> { %2978 = vmatprep.subr.bf16.mxu0 %v3318_v29  ;;  %v2792_v26 = vld [vmem:[%s697_s2] ss:$0 sm:$0xff]  ;;  %s2233_s26 = scalar_lea.vmem [#allocation8], %s4035_s15 }
  0xb8   : >> { %721 = vadd.xlane.f32.xlu0 %v715_v17  ;;  %723 = vadd.xlane.f32.xlu1 %v716_v18 }
  0xb9   : >> { %1023 = vmatpush1.bf16.msra.mxu1 %v3309_v22 }
  0xba   : >> { %1024 = vmatprep.subr.bf16.mxu1 %v3311_v24  ;;  %2979 = vmatpush3.bf16.msra.mxu0 %v3318_v29  ;;  %v2793_v29 = vld [vmem:[%s699_s13] ss:$0 sm:$0xff]  ;;  %s4336_s13 = scalar_lea.vmem [#allocation10], %s4035_s15 }
  0xbb   : >> { %2980 = vmatprep.subr.bf16.mxu0 %v3322_v32 }
  0xbd   : >> { %1025 = vmatpush1.bf16.msra.mxu1 %v3313_v25 }
  0xbe   : >> { %1026 = vmatprep.subr.bf16.mxu1 %v3315_v27  ;;  %2981 = vmatpush3.bf16.msra.mxu0 %v3322_v32 }
  0xbf   : >> { %2982 = vmatprep.subr.bf16.mxu0 %v3326_v35 }
  0xc1   : >> { %1027 = vmatpush1.bf16.msra.mxu1 %v3317_v28 }
  0xc2   : >> { %1028 = vmatprep.subr.bf16.mxu1 %v3319_v30  ;;  %2983 = vmatpush3.bf16.msra.mxu0 %v3326_v35 }
  0xc3   : >> { %2984 = vmatprep.subr.bf16.mxu0 %v3330_v37 }
  0xc5   : >> { %1029 = vmatpush1.bf16.msra.mxu1 %v3321_v31 }
  0xc6   : >> { %1030 = vmatprep.subr.bf16.mxu1 %v3323_v33  ;;  %2985 = vmatpush3.bf16.msra.mxu0 %v3330_v37 }
  0xc7   : >> { %2986 = vmatprep.subr.bf16.mxu0 %v3331_v41 }
  0xc9   : >> { %1031 = vmatpush1.bf16.msra.mxu1 %v3325_v34 }
  0xca   : >> { %1032 = vmatprep.subr.bf16.mxu1 %v3327_v36  ;;  %2987 = vmatpush3.bf16.msra.mxu0 %v3331_v41 }
  0xcb   : >> { %2988 = vmatprep.subr.bf16.mxu0 %v3332_v42 }
  0xcd   : >> { %1033 = vmatpush1.bf16.msra.mxu1 %v3329_v39 }
  0xce   : >> { %2989 = vmatpush3.bf16.msra.mxu0 %v3332_v42  ;;  %3018 = vmatprep.subr.bf16.mxu1 %v3680_v44 }
  0xcf   : >> { %2994 = vmatprep.subr.bf16.mxu0 %v3680_v44 }
  0xd0   : >> { %1051 = vmatmul.mubr.bf16.vlgmr.msra.gmra.mrb[0].mxu1 %v779_v40 }
  0xd1   : >> { %1060 = vmatprep.mubr.bf16.mxu1 %v3679_v38 }
  0xd8   : >> { %1061 = vmatmul.mubr.bf16.gmra.mrb[4].mxu1 %v780_v43  ;;  %v930_v43 = vsub.s32 0, %v3968_v1 }
  0xd9   : >> { %3020 = vmatprep.mubr.msk.bf16.mxu1 %vm3681_vm3, %v3680_v44 }
 0x139   : >> { %v702_v45 = vpop.xlane.xlu0 %701  ;;  %v706_v46 = vpop.xlane.xlu1 %705 }
 0x13a   : >> { %v709_v49 = vmul.f32 0.03125, %v702_v45  ;;  %v711_v51 = vmul.f32 0.03125, %v706_v46  ;;  %v926_v45 = vld [vmem:[%s925_s30] sm:$0x3]  ;;  %v934_v46 = vsub.s32 1, %v3968_v1 }
 0x13c   : >> { %v729_v55 = vmul.f32 %v709_v49, %v709_v49  ;;  %v731_v61 = vmul.f32 %v711_v51, %v711_v51  ;;  %v741_v23 = vsub.f32 %v3663_v5, %v709_v49  ;;  %v743_v31 = vsub.f32 %v3655_v7, %v711_v51 }
 0x13d   : >> { %v704_v47 = vpop.xlane.xlu0 %703  ;;  %v708_v48 = vpop.xlane.xlu1 %707 }
 0x13e   : >> { %v710_v50 = vmul.f32 0.03125, %v704_v47  ;;  %v712_v52 = vmul.f32 0.03125, %v708_v48  ;;  %v931_v47 = vrot.slane %v926_v45, %v930_v43  ;;  %v935_v48 = vrot.slane %v926_v45, %v934_v46 }
 0x140   : >> { %v730_v56 = vmul.f32 %v710_v50, %v710_v50  ;;  %v732_v62 = vmul.f32 %v712_v52, %v712_v52  ;;  %v742_v25 = vsub.f32 %v3659_v6, %v710_v50  ;;  %v744_v34 = vsub.f32 %v3651_v8, %v712_v52 }
 0x141   : >> { %v718_v53 = vpop.xlane.xlu0 %717  ;;  %v720_v54 = vpop.xlane.xlu1 %719 }
 0x142   : >> { %v725_v57 = vmul.f32 0.03125, %v718_v53  ;;  %v726_v58 = vmul.f32 0.03125, %v720_v54 }
 0x144   : >> { %v733_v59 = vsub.f32 %v725_v57, %v729_v55  ;;  %v734_v60 = vsub.f32 %v726_v58, %v730_v56 }
 0x145   : >> { %v722_v63 = vpop.xlane.xlu0 %721  ;;  %v724_v0 = vpop.xlane.xlu1 %723 }
 0x146   : >> { %v737_v2 = vmax.f32 %v733_v59, 0.0  ;;  %v738_v3 = vmax.f32 %v734_v60, 0.0  ;;  %v727_v13 = vmul.f32 0.03125, %v722_v63  ;;  %v728_v14 = vmul.f32 0.03125, %v724_v0 }
 0x148   : >> { %v745_v15 = vadd.f32 1e-08, %v737_v2  ;;  %v746_v16 = vadd.f32 1e-08, %v738_v3  ;;  %v735_v17 = vsub.f32 %v727_v13, %v731_v61  ;;  %v736_v18 = vsub.f32 %v728_v14, %v732_v62 }
 0x14a   : >> { %3357 = vrsqrt.f32 %v745_v15  ;;  %v739_v19 = vmax.f32 %v735_v17, 0.0  ;;  %v740_v20 = vmax.f32 %v736_v18, 0.0  ;;  %v2796_v15 = vld [vmem:[%s800_s23] ss:$0 sm:$0xff] }
 0x14b   : >> { %3359 = vrsqrt.f32 %v746_v16 }
 0x14c   : >> { %v747_v21 = vadd.f32 1e-08, %v739_v19  ;;  %v748_v22 = vadd.f32 1e-08, %v740_v20 }
 0x14e   : >> { %3361 = vrsqrt.f32 %v747_v21 }
 0x14f   : >> { %3363 = vrsqrt.f32 %v748_v22 }
 0x154   : >> { %v3358_v24 = vpop.eup %3357 }
 0x155   : >> { %v3360_v27 = vpop.eup %3359  ;;  %v753_v28 = vmul.f32 %v3358_v24, %v741_v23 }
 0x156   : >> { %v754_v30 = vmul.f32 %v3360_v27, %v742_v25 }
 0x157   : >> { %v763_v32 = vmul.f32 %v2792_v26, %v753_v28 }
 0x158   : >> { %v3362_v33 = vpop.eup %3361  ;;  %v764_v5 = vmul.f32 %v2792_v26, %v754_v30 }
 0x159   : >> { %v3364_v35 = vpop.eup %3363  ;;  %v4077_v36 = vadd.f32 %v2793_v29, %v763_v32  ;;  %v755_v37 = vmul.f32 %v3362_v33, %v743_v31 }
 0x15a   : >> { %v4079_v38 = vadd.f32 %v2793_v29, %v764_v5  ;;  %v756_v6 = vmul.f32 %v3364_v35, %v744_v34 }
 0x15b   : >> { %v765_v39 = vmul.f32 %v2792_v26, %v755_v37 }
 0x15c   : >> { %v777_v40 = vpack.c.bf16 %v4079_v38, %v4077_v36  ;;  %v766_v41 = vmul.f32 %v2792_v26, %v756_v6 }
 0x15d   : >> { %v4083_v42 = vadd.f32 %v2793_v29, %v765_v39 }
 0x15e   : >> { %2990 = vmatprep.mubr.bf16.mxu0 %v777_v40  ;;  %v4085_v7 = vadd.f32 %v2793_v29, %v766_v41 }
 0x160   : >> { %v778_v8 = vpack.c.bf16 %v4085_v7, %v4083_v42 }
 0x162   : >> { %2991 = vmatmul.mubr.bf16.vlgmr.msra.gmra.mrb[0].mxu0 %v778_v8 }
 0x163   : >> { %2996 = vmatprep.mubr.msk.bf16.mxu0 %vm3681_vm3, %v3680_v44 }
 0x1a3   : >> { %v1052_v49 = vpop.f32.mrb[0].mxu1 }
 0x1a4   : >> { %v1053_v50 = vadd.f32 %v1052_v49, %v931_v47  ;;  %v1054_v51 = vpop.f32.mrb[1].mxu1 }
 0x1a5   : >> { %v1055_v52 = vadd.f32 %v1054_v51, %v935_v48  ;;  %v1056_v53 = vpop.f32.mrb[2].mxu1 }
 0x1a6   : >> { %v4095_v54 = vpack.c.bf16 %v1053_v50, %v1053_v50  ;;  %v1057_v55 = vadd.f32 %v1056_v53, %v931_v47  ;;  %v1058_v56 = vpop.f32.mrb[3].mxu1 }
 0x1a7   : >> { %v4097_v57 = vpack.c.bf16 %v1055_v52, %v1055_v52  ;;  %v1059_v58 = vadd.f32 %v1058_v56, %v935_v48 }
 0x1a8   : >> { %v1106_v59 = vsel %vm1101_vm1, %v4095_v54, 0  ;;  %v4117_v18 = vpack.c.bf16 %v1057_v55, %v1057_v55 }
 0x1a9   : >> { %v1340_v60 = vsel %vm1338_vm2, %v4097_v57, 0  ;;  %2995 = vmatpush3.bf16.xpose.msra.mxu0 %v1106_v59  ;;  %v4150_v33 = vpack.c.bf16 %v1059_v58, %v1059_v58 }
 0x1aa   : >> { %3019 = vmatpush3.bf16.msra.mxu1 %v1340_v60  ;;  %3000 = vmatprep.subr.bf16.mxu0 %v3680_v44  ;;  %v1152_v23 = vsel %vm1101_vm1, %v4117_v18, 0 }
 0x1ab   : >> { %3030 = vmatprep.subr.bf16.mxu1 %v3680_v44  ;;  %v1062_v61 = vpop.f32.mrb[4].mxu1  ;;  %v1386_v5 = vsel %vm1338_vm2, %v4150_v33, 0 }
 0x1ac   : >> { %v1063_v62 = vadd.f32 %v1062_v61, %v931_v47  ;;  %v1064_v63 = vpop.f32.mrb[5].mxu1 }
 0x1ad   : >> { %v4109_v0 = vadd.f32 %v1064_v63, %v935_v48  ;;  %v1066_v2 = vpop.f32.mrb[6].mxu1 }
 0x1ae   : >> { %v1067_v3 = vadd.f32 %v1066_v2, %v931_v47  ;;  %v1068_v13 = vpop.f32.mrb[7].mxu1  ;;  %v4127_v25 = vpack.c.bf16 %v1063_v62, %v1063_v62 }
 0x1af   : >> { %v4111_v14 = vadd.f32 %v1068_v13, %v935_v48 }
 0x1b0   : >> { %v1198_v27 = vsel %vm1101_vm1, %v4127_v25, 0  ;;  %v4138_v29 = vpack.c.bf16 %v1067_v3, %v1067_v3 }
 0x1b2   : >> { %v1244_v31 = vsel %vm1101_vm1, %v4138_v29, 0 }
 0x235   : >> { %v2992_v16 = vpop.f32.mrb[0].mxu0 }
 0x236   : >> { %v890_v17 = vpop.f32.mrb[1].mxu0  ;;  %v899_v28 = vadd.f32 %v2992_v16, %v2796_v15 }
 0x237   : >> { %v891_v19 = vadd.f32 %v2796_v15, %v890_v17  ;;  %v2993_v20 = vpop.f32.mrb[2].mxu0 }
 0x238   : >> { %v893_v21 = vpop.f32.mrb[3].mxu0  ;;  %v4141_v30 = vpack.c.bf16 %v899_v28, %v899_v28  ;;  %v902_v32 = vadd.f32 %v2993_v20, %v2796_v15 }
 0x239   : >> { %v4119_v22 = vpack.c.bf16 %v891_v19, %v891_v19  ;;  %v894_v24 = vadd.f32 %v2796_v15, %v893_v21 }
 0x23a   : >> { %v4152_v34 = vpack.c.bf16 %v902_v32, %v902_v32 }
 0x23b   : >> { %2997 = vmatmul.mubr.msk.bf16.vlgmr.msra.gmra.mrb[4].mxu0 %vm1101_vm1, %v4119_v22  ;;  %v4130_v26 = vpack.c.bf16 %v894_v24, %v894_v24 }
 0x23c   : >> { %3001 = vmatpush3.bf16.xpose.msra.mxu0 %v1152_v23  ;;  %3002 = vmatprep.mubr.msk.bf16.mxu0 %vm3681_vm3, %v3680_v44 }
 0x23d   : >> { %3006 = vmatprep.subr.bf16.mxu0 %v3680_v44 }
 0x243   : >> { %3003 = vmatmul.mubr.msk.bf16.vlgmr.msra.gmra.mrb[8].mxu0 %vm1101_vm1, %v4130_v26 }
 0x244   : >> { %3007 = vmatpush3.bf16.xpose.msra.mxu0 %v1198_v27  ;;  %3008 = vmatprep.mubr.msk.bf16.mxu0 %vm3681_vm3, %v3680_v44 }
 0x245   : >> { %3012 = vmatprep.subr.bf16.mxu0 %v3680_v44 }
 0x24b   : >> { %3009 = vmatmul.mubr.msk.bf16.vlgmr.msra.gmra.mrb[12].mxu0 %vm1101_vm1, %v4141_v30 }
 0x24c   : >> { %3013 = vmatpush3.bf16.xpose.msra.mxu0 %v1244_v31  ;;  %3014 = vmatprep.mubr.msk.bf16.mxu0 %vm3681_vm3, %v3680_v44 }
 0x24d   : >> { %3024 = vmatprep.subr.bf16.mxu0 %v3680_v44 }
 0x253   : >> { %3015 = vmatmul.mubr.msk.bf16.vlgmr.msra.gmra.mrb[16].mxu0 %vm1101_vm1, %v4152_v34 }
 0x254   : >> { %3025 = vmatpush3.bf16.msra.mxu0 %v1386_v5  ;;  %3026 = vmatprep.mubr.msk.bf16.mxu0 %vm3681_vm3, %v3680_v44 }
 0x255   : >> { %3036 = vmatprep.subr.bf16.mxu0 %v3680_v44 }
 0x30e   : >> { %v1142_v35 = vpop.f32.mrb[4].mxu0 }
 0x30f   : >> { %v1143_v37 = vadd.f32 %v1142_v35, %v3971_v4  ;;  %v2998_v6 = vpop.f32.mrb[5].mxu0 }
 0x310   : >> { %v1145_v39 = vpop.f32.mrb[6].mxu0 }
 0x311   : >> { %v2999_v40 = vpop.f32.mrb[7].mxu0  ;;  %v1287_v41 = vsel %vm1286_vm4, %v1143_v37, -inf }
 0x312   : >> { %1288 = vmax.xlane.f32.xlu0 %v1287_v41 }
 0x316   : >> { %v1188_v8 = vpop.f32.mrb[8].mxu0 }
 0x317   : >> { %v1189_v43 = vadd.f32 %v1188_v8, %v3971_v4  ;;  %v3004_v45 = vpop.f32.mrb[9].mxu0 }
 0x318   : >> { %v1191_v46 = vpop.f32.mrb[10].mxu0 }
 0x319   : >> { %v3005_v47 = vpop.f32.mrb[11].mxu0  ;;  %v1290_v48 = vsel %vm1286_vm4, %v1189_v43, -inf }
 0x31a   : >> { %1291 = vmax.xlane.f32.xlu1 %v1290_v48 }
 0x31e   : >> { %v1234_v49 = vpop.f32.mrb[12].mxu0 }
 0x31f   : >> { %v1235_v50 = vadd.f32 %v1234_v49, %v3971_v4  ;;  %v3010_v51 = vpop.f32.mrb[13].mxu0 }
 0x320   : >> { %v1237_v52 = vpop.f32.mrb[14].mxu0 }
 0x321   : >> { %v3011_v53 = vpop.f32.mrb[15].mxu0  ;;  %v1293_v55 = vsel %vm1286_vm4, %v1235_v50, -inf }
 0x322   : >> { %1294 = vmax.xlane.f32.xlu0 %v1293_v55 }
 0x326   : >> { %v1280_v56 = vpop.f32.mrb[16].mxu0 }
 0x327   : >> { %v1281_v58 = vadd.f32 %v1280_v56, %v3971_v4  ;;  %v3016_v59 = vpop.f32.mrb[17].mxu0 }
 0x328   : >> { %v1283_v60 = vpop.f32.mrb[18].mxu0 }
 0x329   : >> { %v3017_v61 = vpop.f32.mrb[19].mxu0  ;;  %v1296_v62 = vsel %vm1286_vm4, %v1281_v58, -inf }
 0x32a   : >> { %1297 = vmax.xlane.f32.xlu1 %v1296_v62 }
 0x39f   : >> { %v1289_v63 = vpop.xlane.xlu0 %1288 }
 0x3a0   : >> { %v1299_v2 = vsub.f32 %v1143_v37, %v1289_v63 }
 0x3a2   : >> { %v1303_v3 = vmul.f32 1.442695, %v1299_v2 }
 0x3a4   : >> { %3365 = vpow2.f32 %v1303_v3 }
 0x3a7   : >> { %v1292_v13 = vpop.xlane.xlu1 %1291 }
 0x3a8   : >> { %v1300_v15 = vsub.f32 %v1189_v43, %v1292_v13 }
 0x3aa   : >> { %v1305_v16 = vmul.f32 1.442695, %v1300_v15 }
 0x3ac   : >> { %3367 = vpow2.f32 %v1305_v16 }
 0x3ae   : >> { %v3366_v17 = vpop.eup %3365 }
 0x3af   : >> { %v1295_v19 = vpop.xlane.xlu0 %1294  ;;  %v1311_v20 = vsel %vm1286_vm4, %v3366_v17, 0.0 }
 0x3b0   : >> { %v1301_v21 = vsub.f32 %v1235_v50, %v1295_v19  ;;  %1312 = vadd.xlane.f32.xlu0 %v1311_v20 }
 0x3b2   : >> { %v1307_v23 = vmul.f32 1.442695, %v1301_v21 }
 0x3b4   : >> { %3369 = vpow2.f32 %v1307_v23 }
 0x3b6   : >> { %v3368_v24 = vpop.eup %3367 }
 0x3b7   : >> { %v1314_v27 = vsel %vm1286_vm4, %v3368_v24, 0.0  ;;  %v1298_v32 = vpop.xlane.xlu1 %1297 }
 0x3b8   : >> { %1315 = vadd.xlane.f32.xlu1 %v1314_v27  ;;  %v1302_v5 = vsub.f32 %v1281_v58, %v1298_v32 }
 0x3ba   : >> { %v1309_v35 = vmul.f32 1.442695, %v1302_v5 }
 0x3bc   : >> { %3371 = vpow2.f32 %v1309_v35 }
 0x3be   : >> { %v3370_v28 = vpop.eup %3369 }
 0x3bf   : >> { %v1317_v31 = vsel %vm1286_vm4, %v3370_v28, 0.0 }
 0x3c0   : >> { %1318 = vadd.xlane.f32.xlu0 %v1317_v31 }
 0x3c6   : >> { %v3372_v37 = vpop.eup %3371 }
 0x3c7   : >> { %v1320_v6 = vsel %vm1286_vm4, %v3372_v37, 0.0 }
 0x3c9   : >> { %1578 = vrot.lane.b32.xlu1 %v4117_v18, %s3682_s24 }
 0x3cd   : >> { %1523 = vrot.lane.b32.xlu1 %v4119_v22, %s3682_s24 }
 0x3d6   : >> { %1526 = vrot.lane.b32.xlu0 %v4095_v54, %s3682_s24 }
 0x3da   : >> { %1630 = vrot.lane.b32.xlu0 %v4127_v25, %s3682_s24  ;;  %v4191_v25 = vpack.c.bf16 %v4109_v0, %v4109_v0  ;;  %v4201_v0 = vpack.c.bf16 %v4111_v14, %v4111_v14 }
 0x3dc   : >> { %v1478_v8 = vsel %vm1338_vm2, %v4201_v0, 0 }
 0x3de   : >> { %1627 = vrot.lane.b32.xlu0 %v4141_v30, %s3682_s24 }
 0x3f1   : >> { %1321 = vadd.xlane.f32.xlu1 %v1320_v6 }
 0x402   : >> { %1575 = vrot.lane.b32.xlu1 %v4130_v26, %s3682_s24  ;;  %v1432_v26 = vsel %vm1338_vm2, %v4191_v25, 0 }
 0x406   : >> { %1682 = vrot.lane.b32.xlu1 %v4138_v29, %s3682_s24 }
 0x40a   : >> { %1679 = vrot.lane.b32.xlu1 %v4152_v34, %s3682_s24 }
 0x43d   : >> { %v1313_v54 = vpop.xlane.xlu0 %1312 }
 0x43e   : >> { %3373 = vrcp.f32 %v1313_v54 }
 0x445   : >> { %v1316_v18 = vpop.xlane.xlu1 %1315 }
 0x446   : >> { %3375 = vrcp.f32 %v1316_v18 }
 0x448   : >> { %v3374_v22 = vpop.eup %3373 }
 0x449   : >> { %v1327_v30 = vmul.f32 %v3374_v22, %v3366_v17  ;;  %v1579_v48 = vpop.permute.xlu1 %1578 }
 0x44a   : >> { %v1584_v60 = vsel %vm1101_vm1, %v1579_v48, 0 }
 0x44b   : >> { %v1331_v39 = vpack.c.bf16 %v1327_v30, %v1327_v30 }
 0x44d   : >> { %3021 = vmatmul.mubr.msk.bf16.vlgmr.msra.gmra.mrb[8].mxu1 %vm1286_vm4, %v1331_v39  ;;  %v1319_v29 = vpop.xlane.xlu0 %1318  ;;  %v1524_v50 = vpop.permute.xlu1 %1523 }
 0x44e   : >> { %3031 = vmatpush3.bf16.msra.mxu1 %v1432_v26  ;;  %3377 = vrcp.f32 %v1319_v29  ;;  %3032 = vmatprep.mubr.msk.bf16.mxu1 %vm3681_vm3, %v3680_v44 }
 0x44f   : >> { %3042 = vmatprep.subr.bf16.mxu1 %v3680_v44 }
 0x450   : >> { %v3376_v34 = vpop.eup %3375 }
 0x451   : >> { %v1328_v40 = vmul.f32 %v3376_v34, %v3368_v24  ;;  %v1527_v46 = vpop.permute.xlu0 %1526 }
 0x452   : >> { %v1532_v14 = vsel %vm1101_vm1, %v1527_v46, 0 }
 0x453   : >> { %v1332_v41 = vpack.c.bf16 %v1328_v40, %v1328_v40 }
 0x455   : >> { %3027 = vmatmul.mubr.msk.bf16.vlgmr.msra.gmra.mrb[20].mxu0 %vm1286_vm4, %v1332_v41  ;;  %v1631_v49 = vpop.permute.xlu0 %1630 }
 0x456   : >> { %3037 = vmatpush3.bf16.msra.mxu0 %v1478_v8  ;;  %3038 = vmatprep.mubr.msk.bf16.mxu0 %vm3681_vm3, %v3680_v44  ;;  %v1636_v51 = vsel %vm1101_vm1, %v1631_v49, 0 }
 0x457   : >> { %3048 = vmatprep.subr.bf16.mxu0 %v3680_v44 }
 0x458   : >> { %v3378_v43 = vpop.eup %3377 }
 0x459   : >> { %v1329_v45 = vmul.f32 %v3378_v43, %v3370_v28  ;;  %v1628_v52 = vpop.permute.xlu0 %1627 }
 0x45b   : >> { %v1333_v47 = vpack.c.bf16 %v1329_v45, %v1329_v45 }
 0x45d   : >> { %3033 = vmatmul.mubr.msk.bf16.vlgmr.msra.gmra.mrb[12].mxu1 %vm1286_vm4, %v1333_v47 }
 0x45e   : >> { %3043 = vmatpush3.bf16.xpose.msra.mxu1 %v1532_v14  ;;  %3044 = vmatprep.mubr.msk.bf16.mxu1 %vm3681_vm3, %v3680_v44 }
 0x45f   : >> { %3054 = vmatprep.subr.bf16.mxu1 %v3680_v44 }
 0x465   : >> { %3045 = vmatmul.mubr.msk.bf16.vlgmr.msra.gmra.mrb[16].mxu1 %vm1101_vm1, %v1524_v50 }
 0x466   : >> { %3055 = vmatpush3.bf16.xpose.msra.mxu1 %v1636_v51  ;;  %3056 = vmatprep.mubr.msk.bf16.mxu1 %vm3681_vm3, %v3680_v44 }
 0x467   : >> { %3066 = vmatprep.subr.bf16.mxu1 %v3680_v44 }
 0x46d   : >> { %3057 = vmatmul.mubr.msk.bf16.vlgmr.msra.gmra.mrb[20].mxu1 %vm1101_vm1, %v1628_v52 }
 0x46e   : >> { %3068 = vmatprep.mubr.msk.bf16.mxu1 %vm3681_vm3, %v3680_v44 }
 0x47e   : >> { %v1322_v53 = vpop.xlane.xlu1 %1321 }
 0x47f   : >> { %3379 = vrcp.f32 %v1322_v53 }
 0x482   : >> { %v1576_v59 = vpop.permute.xlu1 %1575 }
 0x486   : >> { %v1683_v61 = vpop.permute.xlu1 %1682 }
 0x487   : >> { %v1688_v62 = vsel %vm1101_vm1, %v1683_v61, 0 }
 0x489   : >> { %v3380_v55 = vpop.eup %3379 }
 0x48a   : >> { %v1330_v56 = vmul.f32 %v3380_v55, %v3372_v37  ;;  %v1680_v63 = vpop.permute.xlu1 %1679 }
 0x48c   : >> { %v1334_v58 = vpack.c.bf16 %v1330_v56, %v1330_v56 }
 0x48e   : >> { %3039 = vmatmul.mubr.msk.bf16.vlgmr.msra.gmra.mrb[24].mxu0 %vm1286_vm4, %v1334_v58 }
 0x48f   : >> { %3049 = vmatpush3.bf16.xpose.msra.mxu0 %v1584_v60  ;;  %3050 = vmatprep.mubr.msk.bf16.mxu0 %vm3681_vm3, %v3680_v44 }
 0x490   : >> { %3060 = vmatprep.subr.bf16.mxu0 %v3680_v44 }
 0x496   : >> { %3051 = vmatmul.mubr.msk.bf16.vlgmr.msra.gmra.mrb[28].mxu0 %vm1101_vm1, %v1576_v59 }
 0x497   : >> { %3061 = vmatpush3.bf16.xpose.msra.mxu0 %v1688_v62  ;;  %3062 = vmatprep.mubr.msk.bf16.mxu0 %vm3681_vm3, %v3680_v44 }
 0x498   : >> { %3072 = vmatprep.subr.bf16.mxu0 %v3680_v44 }
 0x49e   : >> { %3063 = vmatmul.mubr.msk.bf16.vlgmr.msra.gmra.mrb[32].mxu0 %vm1101_vm1, %v1680_v63 }
 0x49f   : >> { %3074 = vmatprep.mubr.msk.bf16.mxu0 %vm3681_vm3, %v3680_v44 }
 0x520   : >> { %v4235_v2 = vpop.f32.mrb[8].mxu1 }
 0x521   : >> { %v3022_v3 = vpop.f32.mrb[9].mxu1 }
 0x522   : >> { %v1379_v13 = vpop.f32.mrb[10].mxu1 }
 0x523   : >> { %v3023_v15 = vpop.f32.mrb[11].mxu1 }
 0x528   : >> { %v4237_v16 = vpop.f32.mrb[20].mxu0 }
 0x529   : >> { %v1520_v17 = vpack.c.bf16 %v4237_v16, %v4235_v2  ;;  %v3028_v19 = vpop.f32.mrb[21].mxu0  ;;  %v2853_v2 = vld [vmem:[%s2134_s27] ss:$0 sm:$0xff]  ;;  %s4527_s27 = sld [smem:[#allocation27_spill]] }
 0x52a   : >> { %v1425_v20 = vpop.f32.mrb[22].mxu0 }
 0x52b   : >> { %v3029_v21 = vpop.f32.mrb[23].mxu0 }
 0x530   : >> { %v4241_v23 = vpop.f32.mrb[12].mxu1 }
 0x531   : >> { %v3034_v24 = vpop.f32.mrb[13].mxu1 }
 0x532   : >> { %v1471_v27 = vpop.f32.mrb[14].mxu1 }
 0x533   : >> { %v3035_v28 = vpop.f32.mrb[15].mxu1 }
 0x538   : >> { %v1568_v31 = vpop.f32.mrb[16].mxu1 }
 0x539   : >> { %v1569_v32 = vadd.f32 %v1568_v31, %v3971_v4  ;;  %v3046_v5 = vpop.f32.mrb[17].mxu1 }
 0x53a   : >> { %v1571_v35 = vpop.f32.mrb[18].mxu1 }
 0x53b   : >> { %v3047_v37 = vpop.f32.mrb[19].mxu1  ;;  %v1730_v6 = vsel %vm1286_vm4, %v1569_v32, -inf }
 0x53c   : >> { %1731 = vmax.xlane.f32.xlu0 %v1730_v6 }
 0x540   : >> { %v1672_v54 = vpop.f32.mrb[20].mxu1 }
 0x541   : >> { %v1673_v18 = vadd.f32 %v1672_v54, %v3971_v4  ;;  %v3058_v22 = vpop.f32.mrb[21].mxu1 }
 0x542   : >> { %v1675_v30 = vpop.f32.mrb[22].mxu1 }
 0x543   : >> { %v3059_v39 = vpop.f32.mrb[23].mxu1  ;;  %v1736_v26 = vsel %vm1286_vm4, %v1673_v18, -inf }
 0x544   : >> { %1737 = vmax.xlane.f32.xlu0 %v1736_v26 }
 0x561   : >> { %v4247_v29 = vpop.f32.mrb[24].mxu0 }
 0x562   : >> { %v1521_v34 = vpack.c.bf16 %v4247_v29, %v4241_v23  ;;  %v3040_v40 = vpop.f32.mrb[25].mxu0 }
 0x563   : >> { %v1517_v41 = vpop.f32.mrb[26].mxu0 }
 0x564   : >> { %v3041_v8 = vpop.f32.mrb[27].mxu0 }
 0x569   : >> { %v1620_v43 = vpop.f32.mrb[28].mxu0 }
 0x56a   : >> { %v1621_v45 = vadd.f32 %v1620_v43, %v3971_v4  ;;  %v3052_v46 = vpop.f32.mrb[29].mxu0 }
 0x56b   : >> { %v1623_v47 = vpop.f32.mrb[30].mxu0 }
 0x56c   : >> { %v3053_v14 = vpop.f32.mrb[31].mxu0  ;;  %v1733_v48 = vsel %vm1286_vm4, %v1621_v45, -inf }
 0x56d   : >> { %1734 = vmax.xlane.f32.xlu1 %v1733_v48 }
 0x571   : >> { %v1724_v49 = vpop.f32.mrb[32].mxu0 }
 0x572   : >> { %v1725_v50 = vadd.f32 %v1724_v49, %v3971_v4  ;;  %v3064_v51 = vpop.f32.mrb[33].mxu0 }
 0x573   : >> { %v1727_v52 = vpop.f32.mrb[34].mxu0 }
 0x574   : >> { %v3065_v53 = vpop.f32.mrb[35].mxu0  ;;  %v1739_v55 = vsel %vm1286_vm4, %v1725_v50, -inf  ;;  %v3333_v52 = vld [vmem:[%s4282_s25 + $0x20] sm:$0xff]  }
 0x575   : >> { %1740 = vmax.xlane.f32.xlu0 %v1739_v55  ;;  %v3335_v53 = vld [vmem:[%s4282_s25 + $0x30] sm:$0xff]   ;;  %v3336_v55 = vld [vmem:[%s4282_s25 + $0x38] sm:$0xff]  }
 0x5c9   : >> { %v1732_v56 = vpop.xlane.xlu0 %1731 }
 0x5ca   : >> { %v1742_v58 = vsub.f32 %v1569_v32, %v1732_v56  ;;  %v3337_v56 = vld [vmem:[%s4282_s25] sm:$0xff]  }
 0x5cc   : >> { %v1746_v59 = vmul.f32 1.442695, %v1742_v58 }
 0x5ce   : >> { %3381 = vpow2.f32 %v1746_v59 }
 0x5d1   : >> { %v1738_v60 = vpop.xlane.xlu0 %1737 }
 0x5d2   : >> { %v1744_v61 = vsub.f32 %v1673_v18, %v1738_v60 }
 0x5d4   : >> { %v1750_v62 = vmul.f32 1.442695, %v1744_v61 }
 0x5d6   : >> { %3383 = vpow2.f32 %v1750_v62 }
 0x5d8   : >> { %v3382_v63 = vpop.eup %3381 }
 0x5d9   : >> { %v1754_v3 = vsel %vm1286_vm4, %v3382_v63, 0.0 }
 0x5da   : >> { %1755 = vadd.xlane.f32.xlu0 %v1754_v3 }
 0x5e0   : >> { %v3384_v13 = vpop.eup %3383 }
 0x5e1   : >> { %v1760_v15 = vsel %vm1286_vm4, %v3384_v13, 0.0 }
 0x5e2   : >> { %1761 = vadd.xlane.f32.xlu0 %v1760_v15 }
 0x5f8   : >> { %1779 = vrot.lane.b32.xlu0 %v4097_v57, %s3682_s24 }
 0x5fa   : >> { %v1735_v19 = vpop.xlane.xlu1 %1734 }
 0x5fb   : >> { %v1743_v20 = vsub.f32 %v1621_v45, %v1735_v19 }
 0x5fd   : >> { %v1748_v21 = vmul.f32 1.442695, %v1743_v20 }
 0x5ff   : >> { %3385 = vpow2.f32 %v1748_v21 }
 0x602   : >> { %v1741_v28 = vpop.xlane.xlu0 %1740 }
 0x603   : >> { %v1745_v31 = vsub.f32 %v1725_v50, %v1741_v28 }
 0x605   : >> { %v1752_v32 = vmul.f32 1.442695, %v1745_v31 }
 0x607   : >> { %3387 = vpow2.f32 %v1752_v32  ;;  %v3338_v32 = vld [vmem:[%s4282_s25 + $0x8] sm:$0xff]  }
 0x609   : >> { %v3386_v24 = vpop.eup %3385 }
 0x60a   : >> { %v1757_v27 = vsel %vm1286_vm4, %v3386_v24, 0.0 }
 0x60b   : >> { %1758 = vadd.xlane.f32.xlu1 %v1757_v27 }
 0x611   : >> { %v3388_v5 = vpop.eup %3387 }
 0x612   : >> { %v1763_v57 = vsel %vm1286_vm4, %v3388_v5, 0.0 }
 0x61c   : >> { %1828 = vrot.lane.b32.xlu1 %v4150_v33, %s3682_s24 }
 0x620   : >> { %1877 = vrot.lane.b32.xlu1 %v4191_v25, %s3682_s24 }
 0x644   : >> { %1764 = vadd.xlane.f32.xlu1 %v1763_v57 }
 0x655   : >> { %1926 = vrot.lane.b32.xlu1 %v4201_v0, %s3682_s24  ;;  %s4526_s24 = sld [smem:[#allocation26_spill]] }
 0x667   : >> { %v1756_v35 = vpop.xlane.xlu0 %1755 }
 0x668   : >> { %3389 = vrcp.f32 %v1756_v35  ;;  %v3339_v35 = vld [vmem:[%s4282_s25 + $0x10] sm:$0xff]  }
 0x66f   : >> { %v1762_v37 = vpop.xlane.xlu0 %1761 }
 0x670   : >> { %3391 = vrcp.f32 %v1762_v37  ;;  %v3340_v37 = vld [vmem:[%s4282_s25 + $0x18] sm:$0xff]  }
 0x672   : >> { %v3390_v6 = vpop.eup %3389 }
 0x673   : >> { %v1770_v54 = vmul.f32 %v3390_v6, %v3382_v63  ;;  %v1780_v33 = vpop.permute.xlu0 %1779 }
 0x674   : >> { %v1785_v18 = vsel %vm1338_vm2, %v1780_v33, 0 }
 0x675   : >> { %3067 = vmatpush3.bf16.msra.mxu1 %v1785_v18  ;;  %v1774_v25 = vpack.c.bf16 %v1770_v54, %v1770_v54 }
 0x676   : >> { %3078 = vmatprep.subr.bf16.mxu1 %v3680_v44 }
 0x678   : >> { %3069 = vmatmul.mubr.msk.bf16.vlgmr.msra.gmra.mrb[24].mxu1 %vm1286_vm4, %v1774_v25 }
 0x679   : >> { %3080 = vmatprep.mubr.msk.bf16.mxu1 %vm3681_vm3, %v3680_v44 }
 0x67a   : >> { %v3392_v0 = vpop.eup %3391 }
 0x67b   : >> { %v1772_v26 = vmul.f32 %v3392_v0, %v3384_v13 }
 0x67d   : >> { %v1776_v43 = vpack.c.bf16 %v1772_v26, %v1772_v26  ;;  %v3343_v26 = vld [vmem:[%s2233_s26 + $0x10] sm:$0xff]  }
 0x698   : >> { %v1759_v22 = vpop.xlane.xlu1 %1758 }
 0x699   : >> { %3393 = vrcp.f32 %v1759_v22 }
 0x69c   : >> { %v1829_v30 = vpop.permute.xlu1 %1828 }
 0x69d   : >> { %v1834_v39 = vsel %vm1338_vm2, %v1829_v30, 0 }
 0x69e   : >> { %3073 = vmatpush3.bf16.msra.mxu0 %v1834_v39  ;;  %v3342_v39 = vld [vmem:[%s2233_s26 + $0x8] sm:$0xff]  }
 0x69f   : >> { %3084 = vmatprep.subr.bf16.mxu0 %v3680_v44 }
 0x6a0   : >> { %v1878_v40 = vpop.permute.xlu1 %1877 }
 0x6a1   : >> { %v1883_v41 = vsel %vm1338_vm2, %v1878_v40, 0  ;;  %v3344_v40 = vld [vmem:[%s2233_s26 + $0x18] sm:$0xff]  }
 0x6a2   : >> { %3079 = vmatpush3.bf16.msra.mxu1 %v1883_v41  ;;  %v3345_v41 = vld [vmem:[%s2233_s26 + $0x20] sm:$0xff]  }
 0x6a3   : >> { %v3394_v8 = vpop.eup %3393  ;;  %3090 = vmatprep.subr.bf16.mxu1 %v3333_v52 }
 0x6a4   : >> { %v1771_v45 = vmul.f32 %v3394_v8, %v3386_v24  ;;  %v3346_v8 = vld [vmem:[%s2233_s26 + $0x28] sm:$0xff]  }
 0x6a5   : >> { %3081 = vmatmul.mubr.msk.bf16.vlgmr.msra.gmra.mrb[28].mxu1 %vm1286_vm4, %v1776_v43  ;;  %v3347_v43 = vld [vmem:[%s2233_s26 + $0x30] sm:$0xff]  }
 0x6a6   : >> { %v1775_v46 = vpack.c.bf16 %v1771_v45, %v1771_v45  ;;  %3091 = vmatpush3.bf16.msra.mxu1 %v3333_v52  ;;  %v3348_v45 = vld [vmem:[%s2233_s26 + $0x38] sm:$0xff]  }
 0x6a8   : >> { %3075 = vmatmul.mubr.msk.bf16.vlgmr.msra.gmra.mrb[36].mxu0 %vm1286_vm4, %v1775_v46  ;;  %v3349_v46 = vld [vmem:[%s4336_s13] sm:$0xff]  }
 0x6a9   : >> { %3086 = vmatprep.mubr.msk.bf16.mxu0 %vm3681_vm3, %v3680_v44  ;;  %v3334_v44 = vld [vmem:[%s4282_s25 + $0x28] sm:$0xff]   ;;  %s2250_s25 = scalar_lea.vmem %s4526_s24, %s3667_s20 }
 0x6aa   : >> { %3092 = vmatprep.subr.bf16.mxu1 %v3334_v44 }
 0x6ab   : >> { %3093 = vmatpush3.bf16.msra.mxu1 %v3334_v44 }
 0x6ac   : >> { %3094 = vmatprep.subr.bf16.mxu1 %v3335_v53 }
 0x6af   : >> { %3095 = vmatpush3.bf16.msra.mxu1 %v3335_v53 }
 0x6b0   : >> { %3096 = vmatprep.subr.bf16.mxu1 %v3336_v55 }
 0x6b3   : >> { %3097 = vmatpush3.bf16.msra.mxu1 %v3336_v55 }
 0x6b4   : >> { %3102 = vmatprep.subr.bf16.mxu1 %v3337_v56 }
 0x6d1   : >> { %v1765_v47 = vpop.xlane.xlu1 %1764 }
 0x6d2   : >> { %3395 = vrcp.f32 %v1765_v47  ;;  %v3350_v47 = vld [vmem:[%s4336_s13 + $0x8] sm:$0xff]  }
 0x6d5   : >> { %v1927_v14 = vpop.permute.xlu1 %1926 }
 0x6d6   : >> { %v1932_v48 = vsel %vm1338_vm2, %v1927_v14, 0  ;;  %v3351_v14 = vld [vmem:[%s4336_s13 + $0x10] sm:$0xff]  }
 0x6d7   : >> { %3085 = vmatpush3.bf16.msra.mxu0 %v1932_v48  ;;  %v3352_v48 = vld [vmem:[%s4336_s13 + $0x18] sm:$0xff]  }
 0x6dc   : >> { %v3396_v49 = vpop.eup %3395 }
 0x6dd   : >> { %v1773_v50 = vmul.f32 %v3396_v49, %v3388_v5  ;;  %v3353_v49 = vld [vmem:[%s4336_s13 + $0x20] sm:$0xff]  }
 0x6df   : >> { %v1777_v51 = vpack.c.bf16 %v1773_v50, %v1773_v50  ;;  %v3354_v50 = vld [vmem:[%s4336_s13 + $0x28] sm:$0xff]  }
 0x6e1   : >> { %3087 = vmatmul.mubr.msk.bf16.vlgmr.msra.gmra.mrb[40].mxu0 %vm1286_vm4, %v1777_v51 }
 0x74b   : >> { %v1821_v58 = vpop.f32.mrb[24].mxu1 }
 0x74c   : >> { %v3070_v59 = vpop.f32.mrb[25].mxu1 }
 0x74d   : >> { %v1824_v60 = vpop.f32.mrb[26].mxu1 }
 0x74e   : >> { %v3071_v61 = vpop.f32.mrb[27].mxu1 }
 0x778   : >> { %v1919_v62 = vpop.f32.mrb[28].mxu1 }
 0x779   : >> { %v3082_v63 = vpop.f32.mrb[29].mxu1 }
 0x77a   : >> { %v1922_v3 = vpop.f32.mrb[30].mxu1 }
 0x77b   : >> { %v1870_v13 = vpop.f32.mrb[36].mxu0  ;;  %v3083_v15 = vpop.f32.mrb[31].mxu1 }
 0x77c   : >> { %v1974_v19 = vpack.c.bf16 %v1870_v13, %v1821_v58  ;;  %v3076_v20 = vpop.f32.mrb[37].mxu0 }
 0x77d   : >> { %v1873_v21 = vpop.f32.mrb[38].mxu0 }
 0x77e   : >> { %v3077_v24 = vpop.f32.mrb[39].mxu0  ;;  %3098 = vmatprep.mubr.msk.bf16.mxu1 %vm1101_vm1, %v1974_v19 }
 0x7b4   : >> { %v1968_v27 = vpop.f32.mrb[40].mxu0 }
 0x7b5   : >> { %v1975_v28 = vpack.c.bf16 %v1968_v27, %v1919_v62  ;;  %v3088_v31 = vpop.f32.mrb[41].mxu0 }
 0x7b6   : >> { %v1971_v5 = vpop.f32.mrb[42].mxu0 }
 0x7b7   : >> { %v3089_v57 = vpop.f32.mrb[43].mxu0  ;;  %3099 = vmatmul.mubr.msk.bf16.vlgmr.msra.gmra.mrb[32].mxu1 %vm1101_vm1, %v1975_v28 }
 0x7b8   : >> { %3103 = vmatpush3.bf16.msra.mxu1 %v3337_v56  ;;  %3110 = vmatprep.mubr.msk.bf16.mxu1 %vm1101_vm1, %v1520_v17 }
 0x7b9   : >> { %3104 = vmatprep.subr.bf16.mxu1 %v3338_v32 }
 0x7bc   : >> { %3105 = vmatpush3.bf16.msra.mxu1 %v3338_v32 }
 0x7bd   : >> { %3106 = vmatprep.subr.bf16.mxu1 %v3339_v35 }
 0x7c0   : >> { %3107 = vmatpush3.bf16.msra.mxu1 %v3339_v35 }
 0x7c1   : >> { %3108 = vmatprep.subr.bf16.mxu1 %v3340_v37 }
 0x7c4   : >> { %3109 = vmatpush3.bf16.msra.mxu1 %v3340_v37 }
 0x7c5   : >> { %3134 = vmatprep.subr.bf16.mxu1 %v3349_v46 }
 0x7c7   : >> { %3111 = vmatmul.mubr.msk.bf16.vlgmr.msra.gmra.mrb[32].mxu1 %vm1101_vm1, %v1521_v34 }
 0x7c8   : >> { %3135 = vmatpush3.bf16.msra.mxu1 %v3349_v46 }
 0x7c9   : >> { %3136 = vmatprep.subr.bf16.mxu1 %v3350_v47 }
 0x7cc   : >> { %3137 = vmatpush3.bf16.msra.mxu1 %v3350_v47 }
 0x7cd   : >> { %3138 = vmatprep.subr.bf16.mxu1 %v3351_v14 }
 0x7d0   : >> { %3139 = vmatpush3.bf16.msra.mxu1 %v3351_v14 }
 0x7d1   : >> { %3140 = vmatprep.subr.bf16.mxu1 %v3352_v48 }
 0x7d4   : >> { %3141 = vmatpush3.bf16.msra.mxu1 %v3352_v48 }
 0x7d5   : >> { %3142 = vmatprep.subr.bf16.mxu1 %v3353_v49 }
 0x7d8   : >> { %3143 = vmatpush3.bf16.msra.mxu1 %v3353_v49 }
 0x7d9   : >> { %3144 = vmatprep.subr.bf16.mxu1 %v3354_v50 }
 0x7dc   : >> { %3145 = vmatpush3.bf16.msra.mxu1 %v3354_v50  ;;  %v3355_v50 = vld [vmem:[%s4336_s13 + $0x30] sm:$0xff]  }
 0x7dd   : >> { %3146 = vmatprep.subr.bf16.mxu1 %v3355_v50 }
 0x7e0   : >> { %3147 = vmatpush3.bf16.msra.mxu1 %v3355_v50 }
 0x89a   : >> { %v3112_v16 = vpop.f32.mrb[32].mxu1 }
 0x89b   : >> { %v2144_v17 = vadd.f32 %v3112_v16, %v2853_v2  ;;  %v2119_v6 = vpop.f32.mrb[33].mxu1 }
 0x89c   : >> { %v3113_v54 = vpop.f32.mrb[34].mxu1  ;;  %v2142_v18 = vadd.f32 %v2853_v2, %v2119_v6 }
 0x89d   : >> { %v4307_v33 = vadd.f32 %v2144_v17, %v4083_v42  ;;  %v2122_v25 = vpop.f32.mrb[35].mxu1  ;;  %v2145_v23 = vadd.f32 %v3113_v54, %v2853_v2 }
 0x89e   : >> { %v2143_v22 = vadd.f32 %v2853_v2, %v2122_v25  ;;  %v4314_v34 = vadd.f32 %v2142_v18, %v4077_v36 }
 0x89f   : >> { %2158 = vadd.xlane.f32.xlu0 %v4307_v33  ;;  %v4319_v42 = vadd.f32 %v2145_v23, %v4085_v7  ;;  %v2168_v30 = vmul.f32 %v4307_v33, %v4307_v33  ;;  %v3341_v7 = vld [vmem:[%s2233_s26] sm:$0xff]   ;;  %s2379_s26 = scalar_lea.vmem %s4527_s27, %s3667_s20  ;;  %s692_s20 = sadd.s32 1, %s3667_s20  }
 0x8a0   : >> { %v4311_v29 = vadd.f32 %v2143_v22, %v4079_v38  ;;  %v2166_v36 = vmul.f32 %v4314_v34, %v4314_v34  ;;  %3114 = vmatprep.subr.bf16.mxu0 %v3341_v7  ;;  %v2854_v23 = vld [vmem:[%s2150_s22] ss:$0 sm:$0xff]  ;;  %p689_p2 = scmp.ge.s32.totalorder %s692_s20, 2  }
 0x8a1   : >> { %v2169_v38 = vmul.f32 %v4319_v42, %v4319_v42  ;;  %3115 = vmatpush3.bf16.msra.mxu0 %v3341_v7  ;;  %s4536_s15 = sld [smem:[#allocation28_spill]] (%p689_p2)  ;;  %s4537_s18 = sld [smem:[#allocation29_spill]] (%p689_p2) }
 0x8a2   : >> { %2156 = vadd.xlane.f32.xlu1 %v4311_v29  ;;  %v2167_v0 = vmul.f32 %v4311_v29, %v4311_v29  ;;  %3116 = vmatprep.subr.bf16.mxu0 %v3342_v39  ;;  %s4538_s30 = sld [smem:[#allocation21_spill]] (%p689_p2)  ;;  %s2612_s21 = sshll.u32 (%p689_p2), %s3987_s1, 4  ;;  %s4419_s21 = int_to_ptr.vmem [resolvable:$true] %s2612_s21 }
 0x8a3   : >> { %2154 = vadd.xlane.f32.xlu0 %v4314_v34  ;;  %s4424_s2 = scalar_lea.sflag (%p689_p2), [#allocation4], %s656_s19  ;;  %s3683_s27 = smov (%p689_p2), [#allocation11]  }
 0x8a5   : >> { %3117 = vmatpush3.bf16.msra.mxu0 %v3342_v39 }
 0x8a6   : >> { %2172 = vadd.xlane.f32.xlu1 %v2167_v0  ;;  %3118 = vmatprep.subr.bf16.mxu0 %v3343_v26 }
 0x8a7   : >> { %2160 = vadd.xlane.f32.xlu0 %v4319_v42 }
 0x8a8   : > { %p4540_p4 = scmp.ne.s32.totalorder (%p689_p2), %s4538_s30, 0 }
 0x8a9   : >> { %3119 = vmatpush3.bf16.msra.mxu0 %v3343_v26 }
 0x8aa   : >> { %2176 = vadd.xlane.f32.xlu1 %v2169_v38  ;;  %3120 = vmatprep.subr.bf16.mxu0 %v3344_v40 }
 0x8ab   : >> { %2170 = vadd.xlane.f32.xlu0 %v2166_v36 }
 0x8ad   : >> { %3121 = vmatpush3.bf16.msra.mxu0 %v3344_v40 }
 0x8ae   : >> { %3122 = vmatprep.subr.bf16.mxu0 %v3345_v41 }
 0x8af   : >> { %2174 = vadd.xlane.f32.xlu0 %v2168_v30 }
 0x8b1   : >> { %3123 = vmatpush3.bf16.msra.mxu0 %v3345_v41 }
 0x8b2   : >> { %3124 = vmatprep.subr.bf16.mxu0 %v3346_v8 }
 0x8b5   : >> { %3125 = vmatpush3.bf16.msra.mxu0 %v3346_v8 }
 0x8b6   : >> { %3126 = vmatprep.subr.bf16.mxu0 %v3347_v43 }
 0x8b9   : >> { %3127 = vmatpush3.bf16.msra.mxu0 %v3347_v43 }
 0x8ba   : >> { %3128 = vmatprep.subr.bf16.mxu0 %v3348_v45 }
 0x8bb   : >> { %2495 = vperm.xlu1 %3300, %v3981_v10  }
 0x8bd   : >> { %3129 = vmatpush3.bf16.msra.mxu0 %v3348_v45 }
 0x8bf   : >> { %2500 = vperm.xlu1 %3300, %v3983_v11  }
 0x8c3   : >> { %2505 = vperm.xlu1 %3300, %v3985_v12  }
 0x8c5   : >> { %2490 = vperm.xlu0 %3299, %v3979_v9  }
 0x92c   : >> { %v2159_v51 = vpop.xlane.xlu0 %2158 }
 0x92d   : >> { %v2164_v20 = vmul.f32 0.03125, %v2159_v51  ;;  %v3356_v51 = vld [vmem:[%s4336_s13 + $0x38] sm:$0xff]  }
 0x92e   : >> { %3148 = vmatprep.subr.bf16.mxu1 %v3356_v51 }
 0x92f   : >> { %v2157_v52 = vpop.xlane.xlu1 %2156  ;;  %v2184_v57 = vmul.f32 %v2164_v20, %v2164_v20  ;;  %v2196_v40 = vsub.f32 %v4307_v33, %v2164_v20  ;;  %3149 = vmatpush3.bf16.msra.mxu1 %v3356_v51  ;;  %v2857_v33 = vld [vmem:[%s2250_s25] ss:$0 sm:$0xff]  ;;  %s4539_s25 = sld [smem:[#allocation30_spill]] (%p689_p2) }
 0x930   : >> { %v2163_v44 = vmul.f32 0.03125, %v2157_v52  ;;  %v2155_v53 = vpop.xlane.xlu0 %2154  ;;  %v2867_v20 = vld [vmem:[%s2379_s26] ss:$0 sm:$0xff]  ;;  %s3557_s26 = sshll.u32 (%p689_p2), %s3683_s27, 4  ;;  %s3558_s26 = int_to_ptr.vmem [resolvable:$false] %s3557_s26 }
 0x931   : >> { %v2162_v60 = vmul.f32 0.03125, %v2155_v53  ;;  %s3559_s20 = scalar_lea.vmem (%p689_p2), %s3558_s26, 512  ;;  %p3560_p11 = scmp.lt.s32.totalorder (%p689_p2), %s4419_s21, %s3558_s26 }
 0x932   : >> { %v2183_v56 = vmul.f32 %v2163_v44, %v2163_v44  ;;  %v2195_v25 = vsub.f32 %v4311_v29, %v2163_v44  ;;  %v2855_v29 = vld [vmem:[%s2152_s29] ss:$0 sm:$0xff]  ;;  %s2888_s29 = sshll.u32 (%p689_p2), %s3802_s0, 8  ;;  %s3553_s0 = scalar_lea.vmem (%p689_p2), %s4419_s21, 256 }
 0x933   : >> { %v2173_v55 = vpop.xlane.xlu1 %2172  ;;  %v2182_v21 = vmul.f32 %v2162_v60, %v2162_v60  ;;  %v2194_v38 = vsub.f32 %v4314_v34, %v2162_v60  ;;  %p3554_p3 = scmp.ne.s32.totalorder (%p689_p2), %s4419_s21, %s3553_s0  ;;  %p3561_p5 = scmp.lt.s32.totalorder (%p689_p2), %s3559_s20, %s3553_s0 }
 0x934   : >> { %v2179_v58 = vmul.f32 0.03125, %v2173_v55  ;;  %v2161_v59 = vpop.xlane.xlu0 %2160 }
 0x935   : >> { %v2165_v61 = vmul.f32 0.03125, %v2161_v59  ;;  %s4417_s16 = scalar_lea.hbm (%p689_p2), %s4539_s25, %s2888_s29  ;;  %p3555_p7 = pnand (%p689_p2), %p3554_p3, %p4540_p4 }
 0x936   : >> { %v2187_v62 = vsub.f32 %v2179_v58, %v2183_v56  ;;  %p3562_p0 = por (%p689_p2), %p3561_p5, %p3560_p11 }
 0x937   : >> { %v2185_v63 = vmul.f32 %v2165_v61, %v2165_v61  ;;  %v2177_v3 = vpop.xlane.xlu1 %2176  ;;  %v2197_v36 = vsub.f32 %v4319_v42, %v2165_v61  ;;  %p3556_p8 = pneg (%p689_p2), %p3555_p7 }
 0x938   : >> { %v2191_v13 = vmax.f32 %v2187_v62, 0.0  ;;  %v2181_v15 = vmul.f32 0.03125, %v2177_v3  ;;  %v2171_v19 = vpop.xlane.xlu0 %2170 }
 0x939   : >> { %v2178_v24 = vmul.f32 0.03125, %v2171_v19  ;;  %p3563_p6 = pnand (%p689_p2), %p3562_p0, %p3556_p8 }
 0x93a   : >> { %v2199_v27 = vadd.f32 1e-08, %v2191_v13  ;;  %v2189_v28 = vsub.f32 %v2181_v15, %v2185_v63 }
 0x93b   : >> { %v2186_v31 = vsub.f32 %v2178_v24, %v2182_v21  ;;  %v2496_v19 = vpop.permute.xlu1 %2495 }
 0x93c   : >> { %3397 = vrsqrt.f32 %v2199_v27  ;;  %v2193_v32 = vmax.f32 %v2189_v28, 0.0  ;;  %v2175_v5 = vpop.xlane.xlu0 %2174 }
 0x93d   : >> { %v2190_v35 = vmax.f32 %v2186_v31, 0.0  ;;  %v2180_v37 = vmul.f32 0.03125, %v2175_v5 }
 0x93e   : >> { %v2201_v2 = vadd.f32 1e-08, %v2193_v32 }
 0x93f   : >> { %v2198_v16 = vadd.f32 1e-08, %v2190_v35  ;;  %v2188_v17 = vsub.f32 %v2180_v37, %v2184_v57  ;;  %v2501_v21 = vpop.permute.xlu1 %2500 }
 0x940   : >> { %3399 = vrsqrt.f32 %v2201_v2 }
 0x941   : >> { %3401 = vrsqrt.f32 %v2198_v16  ;;  %v2192_v6 = vmax.f32 %v2188_v17, 0.0 }
 0x943   : >> { %v2200_v54 = vadd.f32 1e-08, %v2192_v6 }
 0x944   : >> { %v2491_v37 = vpop.permute.xlu0 %2490 }
 0x945   : >> { %3403 = vrsqrt.f32 %v2200_v54  ;;  %v2506_v54 = vpop.permute.xlu1 %2505 }
 0x946   : >> { %v3398_v18 = vpop.eup %3397 }
 0x947   : >> { %v2207_v22 = vmul.f32 %v3398_v18, %v2195_v25 }
 0x949   : >> { %v2217_v39 = vmul.f32 %v2854_v23, %v2207_v22 }
 0x94a   : >> { %v3400_v0 = vpop.eup %3399 }
 0x94b   : >> { %v3402_v30 = vpop.eup %3401  ;;  %v2209_v26 = vmul.f32 %v3400_v0, %v2197_v36  ;;  %v2227_v45 = vadd.f32 %v2855_v29, %v2217_v39 }
 0x94c   : >> { %v2206_v7 = vmul.f32 %v3402_v30, %v2194_v38 }
 0x94d   : >> { %v2219_v42 = vmul.f32 %v2854_v23, %v2209_v26 }
 0x94e   : >> { %v2216_v41 = vmul.f32 %v2854_v23, %v2206_v7 }
 0x94f   : >> { %v3404_v8 = vpop.eup %3403  ;;  %v2229_v48 = vadd.f32 %v2855_v29, %v2219_v42 }
 0x950   : >> { %v2226_v43 = vadd.f32 %v2855_v29, %v2216_v41  ;;  %v2208_v34 = vmul.f32 %v3404_v8, %v2196_v40 }
 0x952   : >> { %v2230_v46 = vpack.c.bf16 %v2227_v45, %v2226_v43  ;;  %v2218_v47 = vmul.f32 %v2854_v23, %v2208_v34 }
 0x954   : >> { %3130 = vmatprep.mubr.bf16.mxu0 %v2230_v46  ;;  %v2228_v14 = vadd.f32 %v2855_v29, %v2218_v47 }
 0x956   : >> { %v2231_v49 = vpack.c.bf16 %v2229_v48, %v2228_v14 }
 0x958   : >> { %3131 = vmatmul.mubr.bf16.vlgmr.msra.gmra.mrb[44].mxu0 %v2231_v49 }
 0xa2b   : >> { %v3132_v52 = vpop.f32.mrb[44].mxu0 }
 0xa2c   : >> { %v2349_v44 = vadd.f32 %v3132_v52, %v2857_v33  ;;  %v2340_v53 = vpop.f32.mrb[45].mxu0 }
 0xa2d   : >> { %v2341_v55 = vadd.f32 %v2857_v33, %v2340_v53  ;;  %v3133_v56 = vpop.f32.mrb[46].mxu0 }
 0xa2e   : >> { %v2352_v58 = vadd.f32 %v3133_v56, %v2857_v33  ;;  %v2343_v59 = vpop.f32.mrb[47].mxu0  ;;  %v2357_v61 = vmax.f32 %v2349_v44, 0.0 }
 0xa2f   : >> { %v2344_v60 = vadd.f32 %v2857_v33, %v2343_v59  ;;  %v2355_v63 = vmax.f32 %v2341_v55, 0.0 }
 0xa30   : >> { %v2358_v62 = vmax.f32 %v2352_v58, 0.0 }
 0xa31   : >> { %v2356_v3 = vmax.f32 %v2344_v60, 0.0 }
 0xa32   : >> { %v2360_v13 = vpack.c.bf16 %v2358_v62, %v2357_v61 }
 0xa33   : >> { %v2359_v15 = vpack.c.bf16 %v2356_v3, %v2355_v63  ;;  %v2876_v63 = vld [vmem:[%s4536_s15] ss:$0 sm:$0xff] (%p689_p2) }
 0xa35   : >> { %3150 = vmatprep.mubr.bf16.mxu1 %v2359_v15 }
 0xa36   : >> { %3151 = vmatmul.mubr.bf16.vlgmr.msra.gmra.mrb[36].mxu1 %v2360_v13 }
 0xb09   : >> { %v3152_v24 = vpop.f32.mrb[36].mxu1 }
 0xb0a   : >> { %v2478_v27 = vadd.f32 %v3152_v24, %v2867_v20  ;;  %v2469_v28 = vpop.f32.mrb[37].mxu1 }
 0xb0b   : >> { %v2470_v31 = vadd.f32 %v2867_v20, %v2469_v28  ;;  %v3153_v32 = vpop.f32.mrb[38].mxu1 }
 0xb0c   : >> { %v2486_v5 = vadd.f32 %v2478_v27, %v2228_v14  ;;  %v2481_v57 = vadd.f32 %v3153_v32, %v2867_v20  ;;  %v2472_v35 = vpop.f32.mrb[39].mxu1 }
 0xb0d   : >> { %v2473_v2 = vadd.f32 %v2867_v20, %v2472_v35  ;;  %v2484_v16 = vadd.f32 %v2470_v31, %v2226_v43 }
 0xb0e   : >> { %v4366_v7 = vmul.f32 %v2501_v21, %v2486_v5   ;;  %v2487_v6 = vadd.f32 %v2481_v57, %v2229_v48  ;;  %691 = sbr.rel (!%p689_p2) target bundleno = 172 (0xac), region = 172 }
 0xb0f   : >> { %v2485_v18 = vadd.f32 %v2473_v2, %v2227_v45  ;;  %v4368_v5 = vmul.f32 %v2491_v37, %v2484_v16  }
 0xb10   : >> { %v4528_v17 = vmov %v4366_v7  ;;  %v4370_v8 = vmul.f32 %v2506_v54, %v2487_v6  }
 0xb11   : >> { %v4529_v25 = vmov %v4368_v5  ;;  %v4372_v6 = vmul.f32 %v2496_v19, %v2485_v18   ;;  %v4533_v7 = vmov %v4528_v17  ;;  %2518 = vadd.xlane.f32.xlu1 (%p689_p2), %v4528_v17  ;;  %v2528_v1 = vmul.f32 (%p689_p2), %v4528_v17, %v4528_v17  ;;  %v2877_v19 = vld [vmem:[%s4537_s18] ss:$0 sm:$0xff] (%p689_p2) }
 0xb12   : >> { %v4530_v22 = vmov %v4370_v8  ;;  %v4535_v5 = vmov %v4529_v25  ;;  %2514 = vadd.xlane.f32.xlu0 (%p689_p2), %v4529_v25  ;;  %v2526_v38 = vmul.f32 (%p689_p2), %v4529_v25, %v4529_v25 }
 0xb13   : >> { %v4531_v23 = vmov %v4372_v6  ;;  %v4532_v8 = vmov %v4530_v22  ;;  %v2529_v36 = vmul.f32 (%p689_p2), %v4530_v22, %v4530_v22 }
 0xb14   : >> { %v4534_v6 = vmov %v4531_v23  ;;  %v2527_v0 = vmul.f32 (%p689_p2), %v4531_v23, %v4531_v23 }
 0xb15   : > { %2520 = vadd.xlane.f32.xlu1 %v4530_v22 }
 0xb16   : > { %2516 = vadd.xlane.f32.xlu0 %v4531_v23 }
 0xb19   : > { %2532 = vadd.xlane.f32.xlu1 %v2527_v0 }
 0xb1a   : > { %2530 = vadd.xlane.f32.xlu0 %v2526_v38 }
 0xb1d   : > { %2536 = vadd.xlane.f32.xlu1 %v2529_v36 }
 0xb1e   : > { %2534 = vadd.xlane.f32.xlu0 %v2528_v1 }
 0xb9e   : > { %v2519_v4 = vpop.xlane.xlu1 %2518 }
 0xb9f   : > { %v2515_v9 = vpop.xlane.xlu0 %2514  ;;  %v2524_v7 = vmul.f32 0.03125, %v2519_v4 }
 0xba0   : > { %v2522_v12 = vmul.f32 0.03125, %v2515_v9 }
 0xba1   : > { %v2544_v42 = vmul.f32 %v2524_v7, %v2524_v7  ;;  %v2556_v27 = vsub.f32 %v4528_v17, %v2524_v7 }
 0xba2   : > { %v2521_v10 = vpop.xlane.xlu1 %2520  ;;  %v2542_v40 = vmul.f32 %v2522_v12, %v2522_v12  ;;  %v2554_v62 = vsub.f32 %v4529_v25, %v2522_v12 }
 0xba3   : > { %v2517_v11 = vpop.xlane.xlu0 %2516  ;;  %v2525_v39 = vmul.f32 0.03125, %v2521_v10 }
 0xba4   : > { %v2523_v30 = vmul.f32 0.03125, %v2517_v11 }
 0xba5   : > { %v2545_v46 = vmul.f32 %v2525_v39, %v2525_v39  ;;  %v2557_v20 = vsub.f32 %v4530_v22, %v2525_v39 }
 0xba6   : > { %v2533_v26 = vpop.xlane.xlu1 %2532  ;;  %v2543_v41 = vmul.f32 %v2523_v30, %v2523_v30  ;;  %v2555_v60 = vsub.f32 %v4531_v23, %v2523_v30 }
 0xba7   : > { %v2531_v29 = vpop.xlane.xlu0 %2530  ;;  %v2539_v8 = vmul.f32 0.03125, %v2533_v26 }
 0xba8   : > { %v2538_v43 = vmul.f32 0.03125, %v2531_v29 }
 0xba9   : > { %v2547_v45 = vsub.f32 %v2539_v8, %v2543_v41 }
 0xbaa   : > { %v2546_v34 = vsub.f32 %v2538_v43, %v2542_v40  ;;  %v2537_v47 = vpop.xlane.xlu1 %2536 }
 0xbab   : > { %v2535_v14 = vpop.xlane.xlu0 %2534  ;;  %v2551_v48 = vmax.f32 %v2547_v45, 0.0  ;;  %v2541_v50 = vmul.f32 0.03125, %v2537_v47 }
 0xbac   : > { %v2550_v49 = vmax.f32 %v2546_v34, 0.0  ;;  %v2540_v51 = vmul.f32 0.03125, %v2535_v14 }
 0xbad   : > { %v2559_v33 = vadd.f32 1e-08, %v2551_v48  ;;  %v2549_v44 = vsub.f32 %v2541_v50, %v2545_v46 }
 0xbae   : > { %v2558_v52 = vadd.f32 1e-08, %v2550_v49  ;;  %v2548_v53 = vsub.f32 %v2540_v51, %v2544_v42 }
 0xbaf   : > { %3405 = vrsqrt.f32 %v2559_v33  ;;  %v2553_v55 = vmax.f32 %v2549_v44, 0.0 }
 0xbb0   : > { %v2552_v56 = vmax.f32 %v2548_v53, 0.0  ;;  %3407 = vrsqrt.f32 %v2558_v52 }
 0xbb1   : > { %v2561_v58 = vadd.f32 1e-08, %v2553_v55 }
 0xbb2   : > { %v2560_v59 = vadd.f32 1e-08, %v2552_v56 }
 0xbb3   : > { %3409 = vrsqrt.f32 %v2561_v58 }
 0xbb4   : > { %3411 = vrsqrt.f32 %v2560_v59 }
 0xbb9   : > { %v3406_v61 = vpop.eup %3405 }
 0xbba   : > { %v3408_v3 = vpop.eup %3407  ;;  %v2567_v13 = vmul.f32 %v3406_v61, %v2555_v60 }
 0xbbb   : > { %v2566_v15 = vmul.f32 %v3408_v3, %v2554_v62 }
 0xbbc   : > { %v2577_v21 = vmul.f32 %v2876_v63, %v2567_v13 }
 0xbbd   : > { %v3410_v24 = vpop.eup %3409  ;;  %v2576_v28 = vmul.f32 %v2876_v63, %v2566_v15 }
 0xbbe   : > { %v3412_v31 = vpop.eup %3411  ;;  %v2569_v32 = vmul.f32 %v3410_v24, %v2557_v20  ;;  %v2587_v5 = vadd.f32 %v2877_v19, %v2577_v21 }
 0xbbf   : > { %v2568_v57 = vmul.f32 %v3412_v31, %v2556_v27  ;;  %v2586_v35 = vadd.f32 %v2877_v19, %v2576_v28 }
 0xbc0   : > { %v2579_v37 = vmul.f32 %v2876_v63, %v2569_v32 }
 0xbc1   : > { %v2578_v2 = vmul.f32 %v2876_v63, %v2568_v57  ;;  %v2892_v16 = vpack.c.bf16 %v2587_v5, %v2586_v35 }
 0xbc2   : > { %v2589_v6 = vadd.f32 %v2877_v19, %v2579_v37 }
 0xbc3   : > { %v2588_v54 = vadd.f32 %v2877_v19, %v2578_v2  ;;  %2893 = vst [vmem:[%s3987_s1] sm:$0xff] %v2892_v16  }
 0xbc5   : > { %v2897_v17 = vpack.c.bf16 %v2589_v6, %v2588_v54 }
 0xbc7   : > { %2899 = vst [vmem:[%s3987_s1 + $0x8] sm:$0xff] %v2897_v17  }
 0xbc8   : > { %3566 = shalt.err (!%p3563_p6)
}
 0xbc9   : > { %s3567_s19 = scalar_lea.hbm %s4417_s16, 256  ;;  %s3571_s15 = scalar_lea.hbm %s4539_s25, 512 }
 0xbca   : > { %p3568_p9 = scmp.ne.s32.totalorder %s4417_s16, %s3567_s19  ;;  %p3572_p12 = scmp.lt.u32.totalorder %s4417_s16, %s4539_s25 }
 0xbcb   : > { %p3573_p1 = scmp.lt.u32.totalorder %s3571_s15, %s3567_s19  ;;  %p3575_p3 = scmp.lt.u32.totalorder %s3567_s19, %s4417_s16 }
 0xbcc   : > { %p3569_p10 = pnand %p3568_p9, %p4540_p4 }
 0xbcd   : > { %p3574_p2 = por %p3573_p1, %p3572_p12 }
 0xbce   : > { %p3570_p13 = pneg %p3569_p10 }
 0xbcf   : > { %p3576_p7 = por %p3575_p3, %p3574_p2 }
 0xbd1   : > { %p3577_p8 = pnand %p3576_p7, %p3570_p13 }
 0xbd3   : > { %3580 = shalt.err (!%p3577_p8)
}
 0xbd4   : > { %s3684_s18 = smov 64   ;;  %s3685_s29 = smov 4  }
 0xbd5   : > { %3178 = dma.vmem_to_hbm [thread:$0]  (%p4540_p4), %s4419_s21, 256, %s4417_s16, %s4424_s2, %s3684_s18, %s3684_s18, %s3685_s29  }
 0xbd6 PF: > { %s4541_s23 = sld [smem:[#allocation18_spill]]  ;;  %s4542_s24 = sld [smem:[#allocation16_spill]] }
 0xbd7   : > { %s4543_s0 = sld [smem:[#allocation22_spill]] }
 0xbdc   : > { %p3210_p11 = scmp.ge.s32.totalorder %s4541_s23, 2  ;;  %s2627_s27 = sand.u32 1, %s4542_s24  }
 0xbdd   : > { %p4544_p5 = scmp.ne.s32.totalorder %s4543_s0, 0  ;;  %s2628_s26 = scalar_lea.sflag [#allocation4], %s2627_s27 }
 0xbdf   : > { %p3197_p0 = pnand %p3210_p11, %p4544_p5 }
 0xbe1   : > { %3630 = dma.done.wait (!%p3197_p0), %s2628_s26, 256  }
 0xbe2   : > { %3632 = vsyncadd (!%p3197_p0), %s2628_s26, 4294967040  ;;  %s4545_s30 = sld [smem:[#allocation19_spill]]  ;;  %s4546_s20 = sld [smem:[#allocation17_spill]] }
 0xbe3   : > { %s4547_s29 = sld [smem:[#allocation20_spill]]  ;;  %s4548_s27 = smov %s3639_s28 }
 0xbe8   : > { %p31_p6 = scmp.ge.s32.totalorder %s4545_s30, 4   ;;  %s4549_s28 = smov %s4546_s20 }
 0xbea   :  { %33 = sbr.rel (!%p31_p6) target bundleno = 15 (0xf), region = 183 }
 0xbf1   :  { %2633 = vsyncpa [#allocation3], 1 }
 0xbf2   :  { %2635 = vsyncpa [#allocation3 + $0x1], 1 }
 0xbf3   :  { %2636 = vsyncpa [#allocation6], 1 }
 0xbf4   :  { %2637 = vsyncpa [#allocation9], 1 }
 0xbf5   :  { %2638 = vsyncpa [#allocation4], 1 }
 0xbf6   :  { %2640 = vsyncpa [#allocation4 + $0x1], 1 }

// kernel: tpu_custom_call.1
= control target key start
LH: loop header
LB: loop body
LE: loop exit
PB: predicated region body
PF: predicated region fallthrough
CT: control target
= control target key end

     0   :  { %s4465_s0 = inlined_call_operand.vmem [shape: f32[8,8,128], index: 0, kind: input, shape index: {}]   ;;  %s4466_s1 = inlined_call_operand.vmem [shape: f32[8,8,1], index: 1, kind: input, shape index: {}]   ;;  %s4467_s2 = inlined_call_operand.vmem [shape: f32[2,1,128], index: 2, kind: input, shape index: {}]   ;;  %s4468_s3 = inlined_call_operand.vmem [shape: f32[2,1,128], index: 3, kind: input, shape index: {}]   ;;  %s4469_s4 = inlined_call_operand.hbm [shape: bf16[2,128,128], index: 4, kind: input, shape index: {}]   ;;  %s4470_s5 = inlined_call_operand.vmem [shape: f32[2,1,128], index: 5, kind: input, shape index: {}]   ;;  %s4471_s6 = inlined_call_operand.hbm [shape: bf16[2,128,256], index: 6, kind: input, shape index: {}]   ;;  %s4472_s7 = inlined_call_operand.vmem [shape: f32[2,1,256], index: 7, kind: input, shape index: {}]   ;;  %s4473_s8 = inlined_call_operand.hbm [shape: bf16[2,128,128], index: 8, kind: input, shape index: {}]   ;;  %s4474_s9 = inlined_call_operand.vmem [shape: f32[2,1,128], index: 9, kind: input, shape index: {}]   ;;  %s4475_s10 = inlined_call_operand.vmem [shape: f32[2,1,128], index: 10, kind: input, shape index: {}]   ;;  %s4476_s11 = inlined_call_operand.vmem [shape: f32[2,1,128], index: 11, kind: input, shape index: {}]   ;;  %s4477_s12 = inlined_call_operand.hbm [shape: bf16[2,128,128], index: 12, kind: input, shape index: {}]   ;;  %s4478_s13 = inlined_call_operand.vmem [shape: f32[2,1,128], index: 13, kind: input, shape index: {}]   ;;  %s4479_s14 = inlined_call_operand.hbm [shape: bf16[2,128,128], index: 14, kind: input, shape index: {}]   ;;  %s4480_s15 = inlined_call_operand.vmem [shape: f32[2,1,128], index: 15, kind: input, shape index: {}]   ;;  %s4481_s16 = inlined_call_operand.vmem [shape: f32[1,128], index: 16, kind: input, shape index: {}]   ;;  %s4482_s17 = inlined_call_operand.vmem [shape: f32[1,128], index: 17, kind: input, shape index: {}]   ;;  %s4483_s18 = inlined_call_operand.hbm [shape: bf16[8,8,128], index: 18, kind: output, shape index: {}]  }
   0x1   :  { %4496 = sst [smem:[#allocation23_spill]] %s4465_s0 }
   0x2   :  { %4497 = sst [smem:[#allocation24_spill]] %s4466_s1 }
   0x3   :  { %4498 = sst [smem:[#allocation25_spill]] %s4467_s2 }
   0x4   :  { %4499 = sst [smem:[#allocation26_spill]] %s4478_s13 }
   0x5   :  { %4500 = sst [smem:[#allocation27_spill]] %s4480_s15 }
   0x6   :  { %4501 = sst [smem:[#allocation28_spill]] %s4481_s16 }
   0x7   :  { %4502 = sst [smem:[#allocation29_spill]] %s4482_s17 }
   0x8   :  { %4503 = sst [smem:[#allocation30_spill]] %s4483_s18 }
   0x9   :  { %23 = vsyncpa [#allocation3], 0 }
   0xa   :  { %24 = vsyncpa [#allocation6], 0 }
   0xb   :  { %25 = vsyncpa [#allocation9], 0 }
   0xc   :  { %26 = vsyncpa [#allocation4], 0 }
   0xd   :  { %28 = vsyncpa [#allocation4 + $0x1], 0  ;;  %s3781_s27 = smov 0   ;;  %s3783_s28 = smov 0  }
   0xe   :  { %s3785_s29 = smov 0   ;;  %s3787_s30 = smov 0  }
   0xf LB: > { %4504 = sst [smem:[#allocation16_spill]] %s3635_s27  ;;  %s3802_s0 = sadd.s32 4294967295, %s3647_s30   ;;  %s3647_s30 = sphi %s3787_s30, %s4545_s30   ;;  %s3643_s29 = sphi %s3785_s29, %s4547_s29   ;;  %s3639_s28 = sphi %s3783_s28, %s4549_s28   ;;  %s3635_s27 = sphi %s3781_s27, %s4548_s27  }
  0x10   : > { %4505 = sst [smem:[#allocation17_spill]] %s3643_s29  ;;  %s2773_s19 = sadd.s32 4294967294, %s3647_s30  }
  0x11   : > { %4506 = sst [smem:[#allocation18_spill]] %s3647_s30  ;;  %s3806_s1 = sadd.s32 1, %s3647_s30  }
  0x12   : > { %4507 = sst [smem:[#allocation19_spill]] %s3806_s1  ;;  %s429_s20 = sadd.s32 1, %s3643_s29 }
  0x13   : > { %s426_s21 = ssub.s32 %s3647_s30, %s3806_s1  ;;  %p439_p0 = scmp.ne.s32.totalorder %s3643_s29, %s3639_s28 }
  0x14   : > { %p427_p1 = scmp.eq.s32.totalorder %s426_s21, 0  ;;  %p440_p2 = scmp.eq.s32.totalorder %s3802_s0, 1 }
  0x15   : > { %p445_p3 = scmp.ne.s32.totalorder %s3639_s28, %s3635_s27  ;;  %p446_p4 = scmp.eq.s32.totalorder %s2773_s19, 1 }
  0x16   : > { %s3817_s22 = scalar_select %p427_p1, %s3643_s29, %s429_s20  }
  0x17   : > { %p3819_p5 = por %p440_p2, %p439_p0  ;;  %p3823_p6 = por %p446_p4, %p445_p3 }
  0x18   : > { %4508 = sst [smem:[#allocation20_spill]] %s3817_s22  ;;  %p2774_p7 = scmp.ge.s32.totalorder %s3647_s30, 1 }
  0x19   : > { %s4509_s2 = scalar_select %p3819_p5, 1, 0 }
  0x1a   : > { %s4511_s23 = scalar_select %p3823_p6, 1, 0 }
  0x1b   : > { %4510 = sst [smem:[#allocation21_spill]] %s4509_s2  ;;  %p453_p8 = scmp.lt.s32.totalorder %s3647_s30, 3 }
  0x1c   : > { %4512 = sst [smem:[#allocation22_spill]] %s4511_s23  ;;  %p4491_p9 = scmp.eq.s32.totalorder %s3802_s0, 0 }
  0x1d   : > { %p3830_p10 = pnand %p2774_p7, %p453_p8  ;;  %s3669_s25 = smov [#allocation5]  }
  0x1e   : > { %s487_s26 = sshll.u32 %s3669_s25, 4  ;;  %s3670_s20 = smov [#allocation8]   ;;  %s488_s26 = int_to_ptr.vmem [resolvable:$true] %s487_s26 }
  0x1f   : > { %s4513_s24 = scalar_select %p3830_p10, 1, 0 }
  0x20   : > { %p3180_p11 = pneg %p3830_p10  ;;  %s525_s21 = sshll.u32 %s3670_s20, 4  ;;  %s526_s21 = int_to_ptr.vmem [resolvable:$true] %s525_s21 }
  0x21   : > { %s3413_s1 = scalar_lea.hbm %s4471_s6, 4096 }
  0x22   : > { %p3838_p12 = pnand %p4491_p9, %p3180_p11  ;;  %p3414_p13 = scmp.ne.s32.totalorder %s4471_s6, %s3413_s1 }
  0x23   : > { %p3420_p3 = scmp.lt.u32.totalorder %s3413_s1, %s4471_s6 }
  0x24   : > { %p3850_p0 = pneg %p3838_p12 }
  0x26   : > { %p3416_p1 = pnand %p3850_p0, %p3414_p13 }
  0x28   : > { %p3417_p2 = pneg %p3416_p1 }
  0x2a   : > { %p3422_p4 = pnand %p3420_p3, %p3417_p2 }
  0x2c   : > { %3425 = shalt.err (!%p3422_p4)
}
  0x2d   : > { %s3426_s29 = scalar_lea.vmem %s488_s26, 4096  ;;  %p3434_p9 = scmp.lt.s32.totalorder %s488_s26, %s488_s26 }
  0x2e   : > { %p3427_p7 = scmp.ne.s32.totalorder %s488_s26, %s3426_s29  ;;  %p3435_p6 = scmp.lt.s32.totalorder %s3426_s29, %s3426_s29 }
  0x30   : > { %p3429_p8 = pnand %p3427_p7, %p3850_p0  ;;  %p3436_p5 = por %p3435_p6, %p3434_p9 }
  0x32   : > { %p3430_p11 = pneg %p3429_p8 }
  0x34   : > { %p3437_p10 = pnand %p3436_p5, %p3430_p11 }
  0x36   : > { %3440 = shalt.err (!%p3437_p10)
}
  0x37   : > { %s3671_s27 = smov 128   ;;  %s3672_s22 = smov 8  }
  0x38   : > { %3186 = dma.hbm_to_vmem [thread:$0]  (!%p3838_p12), %s4471_s6, 4096, %s488_s26, [#allocation6], %s3671_s27, %s3671_s27, %s3672_s22  }
  0x39   : > { %s3673_s1 = smov [#allocation2]   ;;  %s3441_s17 = scalar_lea.hbm %s4477_s12, 2048 }
  0x3a   : > { %s471_s23 = sshll.u32 %s3673_s1, 4  ;;  %p3442_p5 = scmp.ne.s32.totalorder %s4477_s12, %s3441_s17  ;;  %s472_s23 = int_to_ptr.vmem [resolvable:$true] %s471_s23 }
  0x3b   : > { %p3448_p10 = scmp.lt.u32.totalorder %s3441_s17, %s4477_s12 }
  0x3c   : > { %p3444_p6 = pnand %p3442_p5, %p3850_p0 }
  0x3e   : > { %p3445_p9 = pneg %p3444_p6 }
  0x40   : > { %p3450_p13 = pnand %p3448_p10, %p3445_p9 }
  0x42   : > { %3453 = shalt.err (!%p3450_p13)
}
  0x43   : > { %s3454_s26 = scalar_lea.vmem %s526_s21, 2048  ;;  %p3462_p4 = scmp.lt.s32.totalorder %s526_s21, %s526_s21 }
  0x44   : > { %p3455_p1 = scmp.ne.s32.totalorder %s526_s21, %s3454_s26  ;;  %p3463_p7 = scmp.lt.s32.totalorder %s3454_s26, %s3454_s26 }
  0x46   : > { %p3457_p2 = pnand %p3455_p1, %p3850_p0  ;;  %p3464_p8 = por %p3463_p7, %p3462_p4 }
  0x48   : > { %p3458_p3 = pneg %p3457_p2 }
  0x4a   : > { %p3465_p11 = pnand %p3464_p8, %p3458_p3 }
  0x4c   : > { %3468 = shalt.err (!%p3465_p11)
}
  0x4d   : > { %s3674_s16 = smov 64   ;;  %s3675_s2 = smov 4  }
  0x4e   : > { %3192 = dma.hbm_to_vmem [thread:$0]  (!%p3838_p12), %s4477_s12, 2048, %s526_s21, [#allocation9], %s3674_s16, %s3674_s16, %s3675_s2  }
  0x4f   : > { %s3469_s22 = scalar_lea.hbm %s4469_s4, 2048 }
  0x50   : > { %p3470_p5 = scmp.ne.s32.totalorder %s4469_s4, %s3469_s22  ;;  %p3476_p10 = scmp.lt.u32.totalorder %s3469_s22, %s4469_s4 }
  0x52   : > { %p3472_p6 = pnand %p3470_p5, %p3850_p0 }
  0x54   : > { %p3473_p9 = pneg %p3472_p6 }
  0x56   : > { %p3478_p13 = pnand %p3476_p10, %p3473_p9 }
  0x58   : > { %3481 = shalt.err (!%p3478_p13)
}
  0x59   : > { %s3482_s29 = scalar_lea.vmem %s472_s23, 2048  ;;  %p3490_p4 = scmp.lt.s32.totalorder %s472_s23, %s472_s23 }
  0x5a   : > { %p3483_p1 = scmp.ne.s32.totalorder %s472_s23, %s3482_s29  ;;  %p3491_p7 = scmp.lt.s32.totalorder %s3482_s29, %s3482_s29 }
  0x5c   : > { %p3485_p2 = pnand %p3483_p1, %p3850_p0  ;;  %p3492_p8 = por %p3491_p7, %p3490_p4 }
  0x5e   : > { %p3486_p3 = pneg %p3485_p2 }
  0x60   : > { %p3493_p11 = pnand %p3492_p8, %p3486_p3 }
  0x62   : > { %3496 = shalt.err (!%p3493_p11)
}
  0x63   : > { %3183 = dma.hbm_to_vmem [thread:$0]  (!%p3838_p12), %s4469_s4, 2048, %s472_s23, [#allocation3], %s3674_s16, %s3674_s16, %s3675_s2  }
  0x64   : > { %s3676_s13 = smov [#allocation7]   ;;  %s3677_s17 = smov [#allocation10]  }
  0x65   : > { %s503_s15 = sshll.u32 %s3676_s13, 4  ;;  %s541_s27 = sshll.u32 %s3677_s17, 4  ;;  %s504_s15 = int_to_ptr.vmem [resolvable:$true] %s503_s15  ;;  %s542_s27 = int_to_ptr.vmem [resolvable:$true] %s541_s27 }
  0x66   : > { %s3497_s30 = scalar_lea.hbm %s4473_s8, 2048 }
  0x67   : > { %p3498_p5 = scmp.ne.s32.totalorder %s4473_s8, %s3497_s30  ;;  %p3504_p10 = scmp.lt.u32.totalorder %s3497_s30, %s4473_s8 }
  0x69   : > { %p3500_p6 = pnand %p3498_p5, %p3850_p0 }
  0x6b   : > { %p3501_p9 = pneg %p3500_p6 }
  0x6d   : > { %p3506_p13 = pnand %p3504_p10, %p3501_p9 }
  0x6f   : > { %3509 = shalt.err (!%p3506_p13)
}
  0x70   : > { %s3510_s23 = scalar_lea.vmem %s504_s15, 2048  ;;  %p3518_p4 = scmp.lt.s32.totalorder %s504_s15, %s504_s15 }
  0x71   : > { %p3511_p1 = scmp.ne.s32.totalorder %s504_s15, %s3510_s23  ;;  %p3519_p7 = scmp.lt.s32.totalorder %s3510_s23, %s3510_s23 }
  0x73   : > { %p3513_p2 = pnand %p3511_p1, %p3850_p0  ;;  %p3520_p8 = por %p3519_p7, %p3518_p4 }
  0x75   : > { %p3514_p3 = pneg %p3513_p2 }
  0x77   : > { %p3521_p11 = pnand %p3520_p8, %p3514_p3 }
  0x79   : > { %3524 = shalt.err (!%p3521_p11)
}
  0x7a   : > { %3189 = dma.hbm_to_vmem [thread:$0]  (!%p3838_p12), %s4473_s8, 2048, %s504_s15, [#allocation6], %s3674_s16, %s3674_s16, %s3675_s2  }
  0x7b   : > { %s3525_s18 = scalar_lea.hbm %s4479_s14, 2048 }
  0x7c   : > { %p3526_p5 = scmp.ne.s32.totalorder %s4479_s14, %s3525_s18  ;;  %p3532_p10 = scmp.lt.u32.totalorder %s3525_s18, %s4479_s14 }
  0x7e   : > { %p3528_p6 = pnand %p3526_p5, %p3850_p0 }
  0x80   : > { %p3529_p9 = pneg %p3528_p6 }
  0x82   : > { %p3534_p13 = pnand %p3532_p10, %p3529_p9 }
  0x84   : > { %3537 = shalt.err (!%p3534_p13)
}
  0x85   : > { %s3538_s21 = scalar_lea.vmem %s542_s27, 2048  ;;  %p3546_p4 = scmp.lt.s32.totalorder %s542_s27, %s542_s27 }
  0x86   : > { %p3539_p1 = scmp.ne.s32.totalorder %s542_s27, %s3538_s21  ;;  %p3547_p7 = scmp.lt.s32.totalorder %s3538_s21, %s3538_s21 }
  0x88   : > { %p3541_p2 = pnand %p3539_p1, %p3850_p0  ;;  %p3548_p8 = por %p3547_p7, %p3546_p4 }
  0x8a   : > { %p3542_p3 = pneg %p3541_p2 }
  0x8c   : > { %p3549_p11 = pnand %p3548_p8, %p3542_p3 }
  0x8e   : > { %3552 = shalt.err (!%p3549_p11)
}
  0x8f   : > { %3195 = dma.hbm_to_vmem [thread:$0]  (!%p3838_p12), %s4479_s14, 2048, %s542_s27, [#allocation9], %s3674_s16, %s3674_s16, %s3675_s2  }
  0x90   : > { %p4516_p5 = scmp.ne.s32.totalorder %s4513_s24, 0 }
  0x91   : > { %p4517_p0 = scmp.eq.s32.totalorder (!%p4516_p5), %s3802_s0, 0 }
  0x92   : > { %584 = sbr.rel (%p4516_p5) target bundleno = 3030 (0xbd6), region = 92 }
  0x99   : > { %3618 = dma.done.wait (%p4517_p0), [#allocation3], 2048   ;;  %p4518_p6 = pmov %p4517_p0 }
  0x9a   : > { %p4519_p9 = pmov %p4517_p0 }
  0x9b   : > { %3620 = vsyncadd (%p4518_p6), [#allocation3], 4294965248 }
  0x9c   : > { %3622 = dma.done.wait (%p4519_p9), [#allocation6], 6144   ;;  %p4520_p10 = pmov %p4517_p0 }
  0x9d   : > { %p4521_p13 = pmov %p4517_p0 }
  0x9e   : > { %3624 = vsyncadd (%p4520_p10), [#allocation6], 4294961152 }
  0x9f   : > { %3626 = dma.done.wait (%p4521_p13), [#allocation9], 4096   ;;  %p4522_p12 = pmov %p4517_p0 }
  0xa0   : > { %s2788_s24 = sshll.u32 %s3802_s0, 2  ;;  %s656_s19 = sand.u32 1, %s3639_s28   ;;  %v681_v0 = vlaneseq  ;;  %v3678_v3 = vmov 0.0  }
  0xa1   : > { %3628 = vsyncadd (%p4522_p12), [#allocation9], 4294963200  ;;  %p660_p1 = scmp.lt.s32.totalorder %s2788_s24, 7  ;;  %s2787_s25 = sshll.u32 %s656_s19, 4 }
  0xa2   : > { %v3968_v1 = vshrl.u32 %v681_v0, 7  ;;  %v684_v2 = vand.u32 127, %v681_v0  ;;  %s4523_s26 = sld [smem:[#allocation23_spill]]  ;;  %s4524_s18 = sld [smem:[#allocation24_spill]] }
  0xa3   : > { %s4551_s24 = smov (!%p660_p1, %s2788_s24), 7  ;;  %s3987_s1 = scalar_lea.vmem [#allocation11], %s2787_s25 }
  0xa4   : > { %vm685_vm0 = vcmp.gt.s32.totalorder %v684_v2, %v3968_v1  ;;  %s2789_s16 = sshll.u32 %s4551_s24, 3  ;;  %s3997_s20 = smov 0  }
  0xa5   : > { %v3971_v4 = vsel %vm685_vm0, -1e+30, %v3678_v3 }
  0xa8   : > { %s663_s13 = scalar_lea.vmem %s4523_s26, %s2789_s16  ;;  %s669_s30 = scalar_lea.vmem %s4524_s18, %s2789_s16 }
  0xa9   : > { %v673_v5 = vld [vmem:[%s663_s13] sm:$0xff]   ;;  %v674_v6 = vld [vmem:[%s663_s13 + $0x8] sm:$0xff]   ;;  %v675_v7 = vld [vmem:[%s663_s13 + $0x10] sm:$0xff]  }
  0xaa   : > { %v676_v8 = vld [vmem:[%s663_s13 + $0x18] sm:$0xff]   ;;  %v3979_v9 = vld [vmem:[%s669_s30] sm:$0xff]  ;;  %v3981_v10 = vld [vmem:[%s669_s30 + $0x8] sm:$0xff] }
  0xab   : > { %v3983_v11 = vld [vmem:[%s669_s30 + $0x10] sm:$0xff]  ;;  %v3985_v12 = vld [vmem:[%s669_s30 + $0x18] sm:$0xff] }
  0xac LB: >> { %701 = vadd.xlane.f32.xlu0 %v3663_v5  ;;  %705 = vadd.xlane.f32.xlu1 %v3655_v7  ;;  %s2884_s29 = sshll.u32 %s3667_s20, 7  ;;  %v713_v15 = vmul.f32 %v3663_v5, %v3663_v5  ;;  %v714_v16 = vmul.f32 %v3659_v6, %v3659_v6  ;;  %v715_v17 = vmul.f32 %v3655_v7, %v3655_v7  ;;  %s4035_s15 = sshll.u32 %s3667_s20, 6  ;;  %v3679_v38 = vmov 0   ;;  %s3667_s20 = sphi %s3997_s20, %s692_s20   ;;  %v3663_v5 = vphi %v673_v5, %v4535_v5   ;;  %v3659_v6 = vphi %v674_v6, %v4534_v6   ;;  %v3655_v7 = vphi %v675_v7, %v4533_v7   ;;  %v3651_v8 = vphi %v676_v8, %v4532_v8  }
  0xad   : >> { %s4017_s21 = scalar_lea.vmem [#allocation5], %s2884_s29  ;;  %v716_v18 = vmul.f32 %v3651_v8, %v3651_v8  ;;  %s4039_s23 = scalar_lea.vmem [#allocation2], %s4035_s15  ;;  %1050 = vmatprep.mubr.bf16.mxu1 %v3679_v38  ;;  %3300 = vset.pattern.permute.xlu1 %v3679_v38  ;;  %v779_v40 = vpack.c.bf16 %v3659_v6, %v3663_v5  ;;  %v780_v43 = vpack.c.bf16 %v3651_v8, %v3655_v7  ;;  %v3680_v44 = vmov 0.0  }
  0xae   : >> { %v3301_v13 = vld [vmem:[%s4017_s21 + $0x4] ss:$8 sps:$4 sm:$0xff]   ;;  %v3303_v14 = vld [vmem:[%s4017_s21] ss:$8 sps:$4 sm:$0xff]   ;;  %v3304_v19 = vld [vmem:[%s4017_s21 + $0x14] ss:$8 sps:$4 sm:$0xff]   ;;  %3299 = vset.pattern.permute.xlu0 %v3679_v38  ;;  %s699_s13 = scalar_lea.vmem %s4468_s3, %s3667_s20  ;;  %s2134_s27 = scalar_lea.vmem %s4474_s9, %s3667_s20 }
  0xaf   : >> { %1018 = vmatprep.subr.bf16.mxu1 %v3301_v13  ;;  %v3306_v20 = vld [vmem:[%s4017_s21 + $0x10] ss:$8 sps:$4 sm:$0xff]   ;;  %v3307_v21 = vld [vmem:[%s4017_s21 + $0x24] ss:$8 sps:$4 sm:$0xff]   ;;  %v3309_v22 = vld [vmem:[%s4017_s21 + $0x20] ss:$8 sps:$4 sm:$0xff]   ;;  %s2150_s22 = scalar_lea.vmem %s4475_s10, %s3667_s20  ;;  %s2152_s29 = scalar_lea.vmem %s4476_s11, %s3667_s20 }
  0xb0   : >> { %703 = vadd.xlane.f32.xlu0 %v3659_v6  ;;  %707 = vadd.xlane.f32.xlu1 %v3651_v8  ;;  %v3310_v23 = vld [vmem:[%s4039_s23] sm:$0xff]   ;;  %v3311_v24 = vld [vmem:[%s4017_s21 + $0x34] ss:$8 sps:$4 sm:$0xff]   ;;  %v3313_v25 = vld [vmem:[%s4017_s21 + $0x30] ss:$8 sps:$4 sm:$0xff]   ;;  %s4525_s16 = sld [smem:[#allocation25_spill]] }
  0xb1   : >> { %1019 = vmatpush1.bf16.msra.mxu1 %v3303_v14  ;;  %2974 = vmatprep.subr.bf16.mxu0 %v3310_v23  ;;  %v3314_v26 = vld [vmem:[%s4039_s23 + $0x8] sm:$0xff]   ;;  %v3318_v29 = vld [vmem:[%s4039_s23 + $0x10] sm:$0xff]   ;;  %v3322_v32 = vld [vmem:[%s4039_s23 + $0x18] sm:$0xff]   ;;  %s2807_s17 = sshll.u32 %s3667_s20, 1  ;;  %vm1101_vm1 = vcmask 523264   ;;  %vm1338_vm2 = vcmask 1043456  }
  0xb2   : >> { %1020 = vmatprep.subr.bf16.mxu1 %v3304_v19  ;;  %2975 = vmatpush3.bf16.msra.mxu0 %v3310_v23  ;;  %v3315_v27 = vld [vmem:[%s4017_s21 + $0x44] ss:$8 sps:$4 sm:$0xff]   ;;  %v3317_v28 = vld [vmem:[%s4017_s21 + $0x40] ss:$8 sps:$4 sm:$0xff]   ;;  %v3319_v30 = vld [vmem:[%s4017_s21 + $0x54] ss:$8 sps:$4 sm:$0xff]   ;;  %s925_s30 = scalar_lea.vmem %s4472_s7, %s2807_s17 }
  0xb3   : >> { %2976 = vmatprep.subr.bf16.mxu0 %v3314_v26  ;;  %v3321_v31 = vld [vmem:[%s4017_s21 + $0x50] ss:$8 sps:$4 sm:$0xff]   ;;  %v3323_v33 = vld [vmem:[%s4017_s21 + $0x64] ss:$8 sps:$4 sm:$0xff]   ;;  %v3325_v34 = vld [vmem:[%s4017_s21 + $0x60] ss:$8 sps:$4 sm:$0xff]  }
  0xb4   : >> { %717 = vadd.xlane.f32.xlu0 %v713_v15  ;;  %719 = vadd.xlane.f32.xlu1 %v714_v16  ;;  %v3326_v35 = vld [vmem:[%s4039_s23 + $0x20] sm:$0xff]   ;;  %v3327_v36 = vld [vmem:[%s4017_s21 + $0x74] ss:$8 sps:$4 sm:$0xff]   ;;  %v3330_v37 = vld [vmem:[%s4039_s23 + $0x28] sm:$0xff]   ;;  %vm3681_vm3 = vmmov 0   ;;  %vm1286_vm4 = vcmask 64512  }
  0xb5   : >> { %1021 = vmatpush1.bf16.msra.mxu1 %v3306_v20  ;;  %v3329_v39 = vld [vmem:[%s4017_s21 + $0x70] ss:$8 sps:$4 sm:$0xff]   ;;  %s3682_s24 = smov 64   ;;  %s4282_s25 = scalar_lea.vmem [#allocation7], %s4035_s15 }
  0xb6   : >> { %1022 = vmatprep.subr.bf16.mxu1 %v3307_v21  ;;  %2977 = vmatpush3.bf16.msra.mxu0 %v3314_v26  ;;  %v3331_v41 = vld [vmem:[%s4039_s23 + $0x30] sm:$0xff]   ;;  %v3332_v42 = vld [vmem:[%s4039_s23 + $0x38] sm:$0xff]   ;;  %s697_s2 = scalar_lea.vmem %s4525_s16, %s3667_s20  ;;  %s800_s23 = scalar_lea.vmem %s4470_s5, %s3667_s20 }
  0xb7   : >> { %2978 = vmatprep.subr.bf16.mxu0 %v3318_v29  ;;  %v2792_v26 = vld [vmem:[%s697_s2] ss:$0 sm:$0xff]  ;;  %s2233_s26 = scalar_lea.vmem [#allocation8], %s4035_s15 }
  0xb8   : >> { %721 = vadd.xlane.f32.xlu0 %v715_v17  ;;  %723 = vadd.xlane.f32.xlu1 %v716_v18 }
  0xb9   : >> { %1023 = vmatpush1.bf16.msra.mxu1 %v3309_v22 }
  0xba   : >> { %1024 = vmatprep.subr.bf16.mxu1 %v3311_v24  ;;  %2979 = vmatpush3.bf16.msra.mxu0 %v3318_v29  ;;  %v2793_v29 = vld [vmem:[%s699_s13] ss:$0 sm:$0xff]  ;;  %s4336_s13 = scalar_lea.vmem [#allocation10], %s4035_s15 }
  0xbb   : >> { %2980 = vmatprep.subr.bf16.mxu0 %v3322_v32 }
  0xbd   : >> { %1025 = vmatpush1.bf16.msra.mxu1 %v3313_v25 }
  0xbe   : >> { %1026 = vmatprep.subr.bf16.mxu1 %v3315_v27  ;;  %2981 = vmatpush3.bf16.msra.mxu0 %v3322_v32 }
  0xbf   : >> { %2982 = vmatprep.subr.bf16.mxu0 %v3326_v35 }
  0xc1   : >> { %1027 = vmatpush1.bf16.msra.mxu1 %v3317_v28 }
  0xc2   : >> { %1028 = vmatprep.subr.bf16.mxu1 %v3319_v30  ;;  %2983 = vmatpush3.bf16.msra.mxu0 %v3326_v35 }
  0xc3   : >> { %2984 = vmatprep.subr.bf16.mxu0 %v3330_v37 }
  0xc5   : >> { %1029 = vmatpush1.bf16.msra.mxu1 %v3321_v31 }
  0xc6   : >> { %1030 = vmatprep.subr.bf16.mxu1 %v3323_v33  ;;  %2985 = vmatpush3.bf16.msra.mxu0 %v3330_v37 }
  0xc7   : >> { %2986 = vmatprep.subr.bf16.mxu0 %v3331_v41 }
  0xc9   : >> { %1031 = vmatpush1.bf16.msra.mxu1 %v3325_v34 }
  0xca   : >> { %1032 = vmatprep.subr.bf16.mxu1 %v3327_v36  ;;  %2987 = vmatpush3.bf16.msra.mxu0 %v3331_v41 }
  0xcb   : >> { %2988 = vmatprep.subr.bf16.mxu0 %v3332_v42 }
  0xcd   : >> { %1033 = vmatpush1.bf16.msra.mxu1 %v3329_v39 }
  0xce   : >> { %2989 = vmatpush3.bf16.msra.mxu0 %v3332_v42  ;;  %3018 = vmatprep.subr.bf16.mxu1 %v3680_v44 }
  0xcf   : >> { %2994 = vmatprep.subr.bf16.mxu0 %v3680_v44 }
  0xd0   : >> { %1051 = vmatmul.mubr.bf16.vlgmr.msra.gmra.mrb[0].mxu1 %v779_v40 }
  0xd1   : >> { %1060 = vmatprep.mubr.bf16.mxu1 %v3679_v38 }
  0xd8   : >> { %1061 = vmatmul.mubr.bf16.gmra.mrb[4].mxu1 %v780_v43  ;;  %v930_v43 = vsub.s32 0, %v3968_v1 }
  0xd9   : >> { %3020 = vmatprep.mubr.msk.bf16.mxu1 %vm3681_vm3, %v3680_v44 }
 0x139   : >> { %v702_v45 = vpop.xlane.xlu0 %701  ;;  %v706_v46 = vpop.xlane.xlu1 %705 }
 0x13a   : >> { %v709_v49 = vmul.f32 0.03125, %v702_v45  ;;  %v711_v51 = vmul.f32 0.03125, %v706_v46  ;;  %v926_v45 = vld [vmem:[%s925_s30] sm:$0x3]  ;;  %v934_v46 = vsub.s32 1, %v3968_v1 }
 0x13c   : >> { %v729_v55 = vmul.f32 %v709_v49, %v709_v49  ;;  %v731_v61 = vmul.f32 %v711_v51, %v711_v51  ;;  %v741_v23 = vsub.f32 %v3663_v5, %v709_v49  ;;  %v743_v31 = vsub.f32 %v3655_v7, %v711_v51 }
 0x13d   : >> { %v704_v47 = vpop.xlane.xlu0 %703  ;;  %v708_v48 = vpop.xlane.xlu1 %707 }
 0x13e   : >> { %v710_v50 = vmul.f32 0.03125, %v704_v47  ;;  %v712_v52 = vmul.f32 0.03125, %v708_v48  ;;  %v931_v47 = vrot.slane %v926_v45, %v930_v43  ;;  %v935_v48 = vrot.slane %v926_v45, %v934_v46 }
 0x140   : >> { %v730_v56 = vmul.f32 %v710_v50, %v710_v50  ;;  %v732_v62 = vmul.f32 %v712_v52, %v712_v52  ;;  %v742_v25 = vsub.f32 %v3659_v6, %v710_v50  ;;  %v744_v34 = vsub.f32 %v3651_v8, %v712_v52 }
 0x141   : >> { %v718_v53 = vpop.xlane.xlu0 %717  ;;  %v720_v54 = vpop.xlane.xlu1 %719 }
 0x142   : >> { %v725_v57 = vmul.f32 0.03125, %v718_v53  ;;  %v726_v58 = vmul.f32 0.03125, %v720_v54 }
 0x144   : >> { %v733_v59 = vsub.f32 %v725_v57, %v729_v55  ;;  %v734_v60 = vsub.f32 %v726_v58, %v730_v56 }
 0x145   : >> { %v722_v63 = vpop.xlane.xlu0 %721  ;;  %v724_v0 = vpop.xlane.xlu1 %723 }
 0x146   : >> { %v737_v2 = vmax.f32 %v733_v59, 0.0  ;;  %v738_v3 = vmax.f32 %v734_v60, 0.0  ;;  %v727_v13 = vmul.f32 0.03125, %v722_v63  ;;  %v728_v14 = vmul.f32 0.03125, %v724_v0 }
 0x148   : >> { %v745_v15 = vadd.f32 1e-08, %v737_v2  ;;  %v746_v16 = vadd.f32 1e-08, %v738_v3  ;;  %v735_v17 = vsub.f32 %v727_v13, %v731_v61  ;;  %v736_v18 = vsub.f32 %v728_v14, %v732_v62 }
 0x14a   : >> { %3357 = vrsqrt.f32 %v745_v15  ;;  %v739_v19 = vmax.f32 %v735_v17, 0.0  ;;  %v740_v20 = vmax.f32 %v736_v18, 0.0  ;;  %v2796_v15 = vld [vmem:[%s800_s23] ss:$0 sm:$0xff] }
 0x14b   : >> { %3359 = vrsqrt.f32 %v746_v16 }
 0x14c   : >> { %v747_v21 = vadd.f32 1e-08, %v739_v19  ;;  %v748_v22 = vadd.f32 1e-08, %v740_v20 }
 0x14e   : >> { %3361 = vrsqrt.f32 %v747_v21 }
 0x14f   : >> { %3363 = vrsqrt.f32 %v748_v22 }
 0x154   : >> { %v3358_v24 = vpop.eup %3357 }
 0x155   : >> { %v3360_v27 = vpop.eup %3359  ;;  %v753_v28 = vmul.f32 %v3358_v24, %v741_v23 }
 0x156   : >> { %v754_v30 = vmul.f32 %v3360_v27, %v742_v25 }
 0x157   : >> { %v763_v32 = vmul.f32 %v2792_v26, %v753_v28 }
 0x158   : >> { %v3362_v33 = vpop.eup %3361  ;;  %v764_v5 = vmul.f32 %v2792_v26, %v754_v30 }
 0x159   : >> { %v3364_v35 = vpop.eup %3363  ;;  %v4077_v36 = vadd.f32 %v2793_v29, %v763_v32  ;;  %v755_v37 = vmul.f32 %v3362_v33, %v743_v31 }
 0x15a   : >> { %v4079_v38 = vadd.f32 %v2793_v29, %v764_v5  ;;  %v756_v6 = vmul.f32 %v3364_v35, %v744_v34 }
 0x15b   : >> { %v765_v39 = vmul.f32 %v2792_v26, %v755_v37 }
 0x15c   : >> { %v777_v40 = vpack.c.bf16 %v4079_v38, %v4077_v36  ;;  %v766_v41 = vmul.f32 %v2792_v26, %v756_v6 }
 0x15d   : >> { %v4083_v42 = vadd.f32 %v2793_v29, %v765_v39 }
 0x15e   : >> { %2990 = vmatprep.mubr.bf16.mxu0 %v777_v40  ;;  %v4085_v7 = vadd.f32 %v2793_v29, %v766_v41 }
 0x160   : >> { %v778_v8 = vpack.c.bf16 %v4085_v7, %v4083_v42 }
 0x162   : >> { %2991 = vmatmul.mubr.bf16.vlgmr.msra.gmra.mrb[0].mxu0 %v778_v8 }
 0x163   : >> { %2996 = vmatprep.mubr.msk.bf16.mxu0 %vm3681_vm3, %v3680_v44 }
 0x1a3   : >> { %v1052_v49 = vpop.f32.mrb[0].mxu1 }
 0x1a4   : >> { %v1053_v50 = vadd.f32 %v1052_v49, %v931_v47  ;;  %v1054_v51 = vpop.f32.mrb[1].mxu1 }
 0x1a5   : >> { %v1055_v52 = vadd.f32 %v1054_v51, %v935_v48  ;;  %v1056_v53 = vpop.f32.mrb[2].mxu1 }
 0x1a6   : >> { %v4095_v54 = vpack.c.bf16 %v1053_v50, %v1053_v50  ;;  %v1057_v55 = vadd.f32 %v1056_v53, %v931_v47  ;;  %v1058_v56 = vpop.f32.mrb[3].mxu1 }
 0x1a7   : >> { %v4097_v57 = vpack.c.bf16 %v1055_v52, %v1055_v52  ;;  %v1059_v58 = vadd.f32 %v1058_v56, %v935_v48 }
 0x1a8   : >> { %v1106_v59 = vsel %vm1101_vm1, %v4095_v54, 0  ;;  %v4117_v18 = vpack.c.bf16 %v1057_v55, %v1057_v55 }
 0x1a9   : >> { %v1340_v60 = vsel %vm1338_vm2, %v4097_v57, 0  ;;  %2995 = vmatpush3.bf16.xpose.msra.mxu0 %v1106_v59  ;;  %v4150_v33 = vpack.c.bf16 %v1059_v58, %v1059_v58 }
 0x1aa   : >> { %3019 = vmatpush3.bf16.msra.mxu1 %v1340_v60  ;;  %3000 = vmatprep.subr.bf16.mxu0 %v3680_v44  ;;  %v1152_v23 = vsel %vm1101_vm1, %v4117_v18, 0 }
 0x1ab   : >> { %3030 = vmatprep.subr.bf16.mxu1 %v3680_v44  ;;  %v1062_v61 = vpop.f32.mrb[4].mxu1  ;;  %v1386_v5 = vsel %vm1338_vm2, %v4150_v33, 0 }
 0x1ac   : >> { %v1063_v62 = vadd.f32 %v1062_v61, %v931_v47  ;;  %v1064_v63 = vpop.f32.mrb[5].mxu1 }
 0x1ad   : >> { %v4109_v0 = vadd.f32 %v1064_v63, %v935_v48  ;;  %v1066_v2 = vpop.f32.mrb[6].mxu1 }
 0x1ae   : >> { %v1067_v3 = vadd.f32 %v1066_v2, %v931_v47  ;;  %v1068_v13 = vpop.f32.mrb[7].mxu1  ;;  %v4127_v25 = vpack.c.bf16 %v1063_v62, %v1063_v62 }
 0x1af   : >> { %v4111_v14 = vadd.f32 %v1068_v13, %v935_v48 }
 0x1b0   : >> { %v1198_v27 = vsel %vm1101_vm1, %v4127_v25, 0  ;;  %v4138_v29 = vpack.c.bf16 %v1067_v3, %v1067_v3 }
 0x1b2   : >> { %v1244_v31 = vsel %vm1101_vm1, %v4138_v29, 0 }
 0x235   : >> { %v2992_v16 = vpop.f32.mrb[0].mxu0 }
 0x236   : >> { %v890_v17 = vpop.f32.mrb[1].mxu0  ;;  %v899_v28 = vadd.f32 %v2992_v16, %v2796_v15 }
 0x237   : >> { %v891_v19 = vadd.f32 %v2796_v15, %v890_v17  ;;  %v2993_v20 = vpop.f32.mrb[2].mxu0 }
 0x238   : >> { %v893_v21 = vpop.f32.mrb[3].mxu0  ;;  %v4141_v30 = vpack.c.bf16 %v899_v28, %v899_v28  ;;  %v902_v32 = vadd.f32 %v2993_v20, %v2796_v15 }
 0x239   : >> { %v4119_v22 = vpack.c.bf16 %v891_v19, %v891_v19  ;;  %v894_v24 = vadd.f32 %v2796_v15, %v893_v21 }
 0x23a   : >> { %v4152_v34 = vpack.c.bf16 %v902_v32, %v902_v32 }
 0x23b   : >> { %2997 = vmatmul.mubr.msk.bf16.vlgmr.msra.gmra.mrb[4].mxu0 %vm1101_vm1, %v4119_v22  ;;  %v4130_v26 = vpack.c.bf16 %v894_v24, %v894_v24 }
 0x23c   : >> { %3001 = vmatpush3.bf16.xpose.msra.mxu0 %v1152_v23  ;;  %3002 = vmatprep.mubr.msk.bf16.mxu0 %vm3681_vm3, %v3680_v44 }
 0x23d   : >> { %3006 = vmatprep.subr.bf16.mxu0 %v3680_v44 }
 0x243   : >> { %3003 = vmatmul.mubr.msk.bf16.vlgmr.msra.gmra.mrb[8].mxu0 %vm1101_vm1, %v4130_v26 }
 0x244   : >> { %3007 = vmatpush3.bf16.xpose.msra.mxu0 %v1198_v27  ;;  %3008 = vmatprep.mubr.msk.bf16.mxu0 %vm3681_vm3, %v3680_v44 }
 0x245   : >> { %3012 = vmatprep.subr.bf16.mxu0 %v3680_v44 }
 0x24b   : >> { %3009 = vmatmul.mubr.msk.bf16.vlgmr.msra.gmra.mrb[12].mxu0 %vm1101_vm1, %v4141_v30 }
 0x24c   : >> { %3013 = vmatpush3.bf16.xpose.msra.mxu0 %v1244_v31  ;;  %3014 = vmatprep.mubr.msk.bf16.mxu0 %vm3681_vm3, %v3680_v44 }
 0x24d   : >> { %3024 = vmatprep.subr.bf16.mxu0 %v3680_v44 }
 0x253   : >> { %3015 = vmatmul.mubr.msk.bf16.vlgmr.msra.gmra.mrb[16].mxu0 %vm1101_vm1, %v4152_v34 }
 0x254   : >> { %3025 = vmatpush3.bf16.msra.mxu0 %v1386_v5  ;;  %3026 = vmatprep.mubr.msk.bf16.mxu0 %vm3681_vm3, %v3680_v44 }
 0x255   : >> { %3036 = vmatprep.subr.bf16.mxu0 %v3680_v44 }
 0x30e   : >> { %v1142_v35 = vpop.f32.mrb[4].mxu0 }
 0x30f   : >> { %v1143_v37 = vadd.f32 %v1142_v35, %v3971_v4  ;;  %v2998_v6 = vpop.f32.mrb[5].mxu0 }
 0x310   : >> { %v1145_v39 = vpop.f32.mrb[6].mxu0 }
 0x311   : >> { %v2999_v40 = vpop.f32.mrb[7].mxu0  ;;  %v1287_v41 = vsel %vm1286_vm4, %v1143_v37, -inf }
 0x312   : >> { %1288 = vmax.xlane.f32.xlu0 %v1287_v41 }
 0x316   : >> { %v1188_v8 = vpop.f32.mrb[8].mxu0 }
 0x317   : >> { %v1189_v43 = vadd.f32 %v1188_v8, %v3971_v4  ;;  %v3004_v45 = vpop.f32.mrb[9].mxu0 }
 0x318   : >> { %v1191_v46 = vpop.f32.mrb[10].mxu0 }
 0x319   : >> { %v3005_v47 = vpop.f32.mrb[11].mxu0  ;;  %v1290_v48 = vsel %vm1286_vm4, %v1189_v43, -inf }
 0x31a   : >> { %1291 = vmax.xlane.f32.xlu1 %v1290_v48 }
 0x31e   : >> { %v1234_v49 = vpop.f32.mrb[12].mxu0 }
 0x31f   : >> { %v1235_v50 = vadd.f32 %v1234_v49, %v3971_v4  ;;  %v3010_v51 = vpop.f32.mrb[13].mxu0 }
 0x320   : >> { %v1237_v52 = vpop.f32.mrb[14].mxu0 }
 0x321   : >> { %v3011_v53 = vpop.f32.mrb[15].mxu0  ;;  %v1293_v55 = vsel %vm1286_vm4, %v1235_v50, -inf }
 0x322   : >> { %1294 = vmax.xlane.f32.xlu0 %v1293_v55 }
 0x326   : >> { %v1280_v56 = vpop.f32.mrb[16].mxu0 }
 0x327   : >> { %v1281_v58 = vadd.f32 %v1280_v56, %v3971_v4  ;;  %v3016_v59 = vpop.f32.mrb[17].mxu0 }
 0x328   : >> { %v1283_v60 = vpop.f32.mrb[18].mxu0 }
 0x329   : >> { %v3017_v61 = vpop.f32.mrb[19].mxu0  ;;  %v1296_v62 = vsel %vm1286_vm4, %v1281_v58, -inf }
 0x32a   : >> { %1297 = vmax.xlane.f32.xlu1 %v1296_v62 }
 0x39f   : >> { %v1289_v63 = vpop.xlane.xlu0 %1288 }
 0x3a0   : >> { %v1299_v2 = vsub.f32 %v1143_v37, %v1289_v63 }
 0x3a2   : >> { %v1303_v3 = vmul.f32 1.442695, %v1299_v2 }
 0x3a4   : >> { %3365 = vpow2.f32 %v1303_v3 }
 0x3a7   : >> { %v1292_v13 = vpop.xlane.xlu1 %1291 }
 0x3a8   : >> { %v1300_v15 = vsub.f32 %v1189_v43, %v1292_v13 }
 0x3aa   : >> { %v1305_v16 = vmul.f32 1.442695, %v1300_v15 }
 0x3ac   : >> { %3367 = vpow2.f32 %v1305_v16 }
 0x3ae   : >> { %v3366_v17 = vpop.eup %3365 }
 0x3af   : >> { %v1295_v19 = vpop.xlane.xlu0 %1294  ;;  %v1311_v20 = vsel %vm1286_vm4, %v3366_v17, 0.0 }
 0x3b0   : >> { %v1301_v21 = vsub.f32 %v1235_v50, %v1295_v19  ;;  %1312 = vadd.xlane.f32.xlu0 %v1311_v20 }
 0x3b2   : >> { %v1307_v23 = vmul.f32 1.442695, %v1301_v21 }
 0x3b4   : >> { %3369 = vpow2.f32 %v1307_v23 }
 0x3b6   : >> { %v3368_v24 = vpop.eup %3367 }
 0x3b7   : >> { %v1314_v27 = vsel %vm1286_vm4, %v3368_v24, 0.0  ;;  %v1298_v32 = vpop.xlane.xlu1 %1297 }
 0x3b8   : >> { %1315 = vadd.xlane.f32.xlu1 %v1314_v27  ;;  %v1302_v5 = vsub.f32 %v1281_v58, %v1298_v32 }
 0x3ba   : >> { %v1309_v35 = vmul.f32 1.442695, %v1302_v5 }
 0x3bc   : >> { %3371 = vpow2.f32 %v1309_v35 }
 0x3be   : >> { %v3370_v28 = vpop.eup %3369 }
 0x3bf   : >> { %v1317_v31 = vsel %vm1286_vm4, %v3370_v28, 0.0 }
 0x3c0   : >> { %1318 = vadd.xlane.f32.xlu0 %v1317_v31 }
 0x3c6   : >> { %v3372_v37 = vpop.eup %3371 }
 0x3c7   : >> { %v1320_v6 = vsel %vm1286_vm4, %v3372_v37, 0.0 }
 0x3c9   : >> { %1578 = vrot.lane.b32.xlu1 %v4117_v18, %s3682_s24 }
 0x3cd   : >> { %1523 = vrot.lane.b32.xlu1 %v4119_v22, %s3682_s24 }
 0x3d6   : >> { %1526 = vrot.lane.b32.xlu0 %v4095_v54, %s3682_s24 }
 0x3da   : >> { %1630 = vrot.lane.b32.xlu0 %v4127_v25, %s3682_s24  ;;  %v4191_v25 = vpack.c.bf16 %v4109_v0, %v4109_v0  ;;  %v4201_v0 = vpack.c.bf16 %v4111_v14, %v4111_v14 }
 0x3dc   : >> { %v1478_v8 = vsel %vm1338_vm2, %v4201_v0, 0 }
 0x3de   : >> { %1627 = vrot.lane.b32.xlu0 %v4141_v30, %s3682_s24 }
 0x3f1   : >> { %1321 = vadd.xlane.f32.xlu1 %v1320_v6 }
 0x402   : >> { %1575 = vrot.lane.b32.xlu1 %v4130_v26, %s3682_s24  ;;  %v1432_v26 = vsel %vm1338_vm2, %v4191_v25, 0 }
 0x406   : >> { %1682 = vrot.lane.b32.xlu1 %v4138_v29, %s3682_s24 }
 0x40a   : >> { %1679 = vrot.lane.b32.xlu1 %v4152_v34, %s3682_s24 }
 0x43d   : >> { %v1313_v54 = vpop.xlane.xlu0 %1312 }
 0x43e   : >> { %3373 = vrcp.f32 %v1313_v54 }
 0x445   : >> { %v1316_v18 = vpop.xlane.xlu1 %1315 }
 0x446   : >> { %3375 = vrcp.f32 %v1316_v18 }
 0x448   : >> { %v3374_v22 = vpop.eup %3373 }
 0x449   : >> { %v1327_v30 = vmul.f32 %v3374_v22, %v3366_v17  ;;  %v1579_v48 = vpop.permute.xlu1 %1578 }
 0x44a   : >> { %v1584_v60 = vsel %vm1101_vm1, %v1579_v48, 0 }
 0x44b   : >> { %v1331_v39 = vpack.c.bf16 %v1327_v30, %v1327_v30 }
 0x44d   : >> { %3021 = vmatmul.mubr.msk.bf16.vlgmr.msra.gmra.mrb[8].mxu1 %vm1286_vm4, %v1331_v39  ;;  %v1319_v29 = vpop.xlane.xlu0 %1318  ;;  %v1524_v50 = vpop.permute.xlu1 %1523 }
 0x44e   : >> { %3031 = vmatpush3.bf16.msra.mxu1 %v1432_v26  ;;  %3377 = vrcp.f32 %v1319_v29  ;;  %3032 = vmatprep.mubr.msk.bf16.mxu1 %vm3681_vm3, %v3680_v44 }
 0x44f   : >> { %3042 = vmatprep.subr.bf16.mxu1 %v3680_v44 }
 0x450   : >> { %v3376_v34 = vpop.eup %3375 }
 0x451   : >> { %v1328_v40 = vmul.f32 %v3376_v34, %v3368_v24  ;;  %v1527_v46 = vpop.permute.xlu0 %1526 }
 0x452   : >> { %v1532_v14 = vsel %vm1101_vm1, %v1527_v46, 0 }
 0x453   : >> { %v1332_v41 = vpack.c.bf16 %v1328_v40, %v1328_v40 }
 0x455   : >> { %3027 = vmatmul.mubr.msk.bf16.vlgmr.msra.gmra.mrb[20].mxu0 %vm1286_vm4, %v1332_v41  ;;  %v1631_v49 = vpop.permute.xlu0 %1630 }
 0x456   : >> { %3037 = vmatpush3.bf16.msra.mxu0 %v1478_v8  ;;  %3038 = vmatprep.mubr.msk.bf16.mxu0 %vm3681_vm3, %v3680_v44  ;;  %v1636_v51 = vsel %vm1101_vm1, %v1631_v49, 0 }
 0x457   : >> { %3048 = vmatprep.subr.bf16.mxu0 %v3680_v44 }
 0x458   : >> { %v3378_v43 = vpop.eup %3377 }
 0x459   : >> { %v1329_v45 = vmul.f32 %v3378_v43, %v3370_v28  ;;  %v1628_v52 = vpop.permute.xlu0 %1627 }
 0x45b   : >> { %v1333_v47 = vpack.c.bf16 %v1329_v45, %v1329_v45 }
 0x45d   : >> { %3033 = vmatmul.mubr.msk.bf16.vlgmr.msra.gmra.mrb[12].mxu1 %vm1286_vm4, %v1333_v47 }
 0x45e   : >> { %3043 = vmatpush3.bf16.xpose.msra.mxu1 %v1532_v14  ;;  %3044 = vmatprep.mubr.msk.bf16.mxu1 %vm3681_vm3, %v3680_v44 }
 0x45f   : >> { %3054 = vmatprep.subr.bf16.mxu1 %v3680_v44 }
 0x465   : >> { %3045 = vmatmul.mubr.msk.bf16.vlgmr.msra.gmra.mrb[16].mxu1 %vm1101_vm1, %v1524_v50 }
 0x466   : >> { %3055 = vmatpush3.bf16.xpose.msra.mxu1 %v1636_v51  ;;  %3056 = vmatprep.mubr.msk.bf16.mxu1 %vm3681_vm3, %v3680_v44 }
 0x467   : >> { %3066 = vmatprep.subr.bf16.mxu1 %v3680_v44 }
 0x46d   : >> { %3057 = vmatmul.mubr.msk.bf16.vlgmr.msra.gmra.mrb[20].mxu1 %vm1101_vm1, %v1628_v52 }
 0x46e   : >> { %3068 = vmatprep.mubr.msk.bf16.mxu1 %vm3681_vm3, %v3680_v44 }
 0x47e   : >> { %v1322_v53 = vpop.xlane.xlu1 %1321 }
 0x47f   : >> { %3379 = vrcp.f32 %v1322_v53 }
 0x482   : >> { %v1576_v59 = vpop.permute.xlu1 %1575 }
 0x486   : >> { %v1683_v61 = vpop.permute.xlu1 %1682 }
 0x487   : >> { %v1688_v62 = vsel %vm1101_vm1, %v1683_v61, 0 }
 0x489   : >> { %v3380_v55 = vpop.eup %3379 }
 0x48a   : >> { %v1330_v56 = vmul.f32 %v3380_v55, %v3372_v37  ;;  %v1680_v63 = vpop.permute.xlu1 %1679 }
 0x48c   : >> { %v1334_v58 = vpack.c.bf16 %v1330_v56, %v1330_v56 }
 0x48e   : >> { %3039 = vmatmul.mubr.msk.bf16.vlgmr.msra.gmra.mrb[24].mxu0 %vm1286_vm4, %v1334_v58 }
 0x48f   : >> { %3049 = vmatpush3.bf16.xpose.msra.mxu0 %v1584_v60  ;;  %3050 = vmatprep.mubr.msk.bf16.mxu0 %vm3681_vm3, %v3680_v44 }
 0x490   : >> { %3060 = vmatprep.subr.bf16.mxu0 %v3680_v44 }
 0x496   : >> { %3051 = vmatmul.mubr.msk.bf16.vlgmr.msra.gmra.mrb[28].mxu0 %vm1101_vm1, %v1576_v59 }
 0x497   : >> { %3061 = vmatpush3.bf16.xpose.msra.mxu0 %v1688_v62  ;;  %3062 = vmatprep.mubr.msk.bf16.mxu0 %vm3681_vm3, %v3680_v44 }
 0x498   : >> { %3072 = vmatprep.subr.bf16.mxu0 %v3680_v44 }
 0x49e   : >> { %3063 = vmatmul.mubr.msk.bf16.vlgmr.msra.gmra.mrb[32].mxu0 %vm1101_vm1, %v1680_v63 }
 0x49f   : >> { %3074 = vmatprep.mubr.msk.bf16.mxu0 %vm3681_vm3, %v3680_v44 }
 0x520   : >> { %v4235_v2 = vpop.f32.mrb[8].mxu1 }
 0x521   : >> { %v3022_v3 = vpop.f32.mrb[9].mxu1 }
 0x522   : >> { %v1379_v13 = vpop.f32.mrb[10].mxu1 }
 0x523   : >> { %v3023_v15 = vpop.f32.mrb[11].mxu1 }
 0x528   : >> { %v4237_v16 = vpop.f32.mrb[20].mxu0 }
 0x529   : >> { %v1520_v17 = vpack.c.bf16 %v4237_v16, %v4235_v2  ;;  %v3028_v19 = vpop.f32.mrb[21].mxu0  ;;  %v2853_v2 = vld [vmem:[%s2134_s27] ss:$0 sm:$0xff]  ;;  %s4527_s27 = sld [smem:[#allocation27_spill]] }
 0x52a   : >> { %v1425_v20 = vpop.f32.mrb[22].mxu0 }
 0x52b   : >> { %v3029_v21 = vpop.f32.mrb[23].mxu0 }
 0x530   : >> { %v4241_v23 = vpop.f32.mrb[12].mxu1 }
 0x531   : >> { %v3034_v24 = vpop.f32.mrb[13].mxu1 }
 0x532   : >> { %v1471_v27 = vpop.f32.mrb[14].mxu1 }
 0x533   : >> { %v3035_v28 = vpop.f32.mrb[15].mxu1 }
 0x538   : >> { %v1568_v31 = vpop.f32.mrb[16].mxu1 }
 0x539   : >> { %v1569_v32 = vadd.f32 %v1568_v31, %v3971_v4  ;;  %v3046_v5 = vpop.f32.mrb[17].mxu1 }
 0x53a   : >> { %v1571_v35 = vpop.f32.mrb[18].mxu1 }
 0x53b   : >> { %v3047_v37 = vpop.f32.mrb[19].mxu1  ;;  %v1730_v6 = vsel %vm1286_vm4, %v1569_v32, -inf }
 0x53c   : >> { %1731 = vmax.xlane.f32.xlu0 %v1730_v6 }
 0x540   : >> { %v1672_v54 = vpop.f32.mrb[20].mxu1 }
 0x541   : >> { %v1673_v18 = vadd.f32 %v1672_v54, %v3971_v4  ;;  %v3058_v22 = vpop.f32.mrb[21].mxu1 }
 0x542   : >> { %v1675_v30 = vpop.f32.mrb[22].mxu1 }
 0x543   : >> { %v3059_v39 = vpop.f32.mrb[23].mxu1  ;;  %v1736_v26 = vsel %vm1286_vm4, %v1673_v18, -inf }
 0x544   : >> { %1737 = vmax.xlane.f32.xlu0 %v1736_v26 }
 0x561   : >> { %v4247_v29 = vpop.f32.mrb[24].mxu0 }
 0x562   : >> { %v1521_v34 = vpack.c.bf16 %v4247_v29, %v4241_v23  ;;  %v3040_v40 = vpop.f32.mrb[25].mxu0 }
 0x563   : >> { %v1517_v41 = vpop.f32.mrb[26].mxu0 }
 0x564   : >> { %v3041_v8 = vpop.f32.mrb[27].mxu0 }
 0x569   : >> { %v1620_v43 = vpop.f32.mrb[28].mxu0 }
 0x56a   : >> { %v1621_v45 = vadd.f32 %v1620_v43, %v3971_v4  ;;  %v3052_v46 = vpop.f32.mrb[29].mxu0 }
 0x56b   : >> { %v1623_v47 = vpop.f32.mrb[30].mxu0 }
 0x56c   : >> { %v3053_v14 = vpop.f32.mrb[31].mxu0  ;;  %v1733_v48 = vsel %vm1286_vm4, %v1621_v45, -inf }
 0x56d   : >> { %1734 = vmax.xlane.f32.xlu1 %v1733_v48 }
 0x571   : >> { %v1724_v49 = vpop.f32.mrb[32].mxu0 }
 0x572   : >> { %v1725_v50 = vadd.f32 %v1724_v49, %v3971_v4  ;;  %v3064_v51 = vpop.f32.mrb[33].mxu0 }
 0x573   : >> { %v1727_v52 = vpop.f32.mrb[34].mxu0 }
 0x574   : >> { %v3065_v53 = vpop.f32.mrb[35].mxu0  ;;  %v1739_v55 = vsel %vm1286_vm4, %v1725_v50, -inf  ;;  %v3333_v52 = vld [vmem:[%s4282_s25 + $0x20] sm:$0xff]  }
 0x575   : >> { %1740 = vmax.xlane.f32.xlu0 %v1739_v55  ;;  %v3335_v53 = vld [vmem:[%s4282_s25 + $0x30] sm:$0xff]   ;;  %v3336_v55 = vld [vmem:[%s4282_s25 + $0x38] sm:$0xff]  }
 0x5c9   : >> { %v1732_v56 = vpop.xlane.xlu0 %1731 }
 0x5ca   : >> { %v1742_v58 = vsub.f32 %v1569_v32, %v1732_v56  ;;  %v3337_v56 = vld [vmem:[%s4282_s25] sm:$0xff]  }
 0x5cc   : >> { %v1746_v59 = vmul.f32 1.442695, %v1742_v58 }
 0x5ce   : >> { %3381 = vpow2.f32 %v1746_v59 }
 0x5d1   : >> { %v1738_v60 = vpop.xlane.xlu0 %1737 }
 0x5d2   : >> { %v1744_v61 = vsub.f32 %v1673_v18, %v1738_v60 }
 0x5d4   : >> { %v1750_v62 = vmul.f32 1.442695, %v1744_v61 }
 0x5d6   : >> { %3383 = vpow2.f32 %v1750_v62 }
 0x5d8   : >> { %v3382_v63 = vpop.eup %3381 }
 0x5d9   : >> { %v1754_v3 = vsel %vm1286_vm4, %v3382_v63, 0.0 }
 0x5da   : >> { %1755 = vadd.xlane.f32.xlu0 %v1754_v3 }
 0x5e0   : >> { %v3384_v13 = vpop.eup %3383 }
 0x5e1   : >> { %v1760_v15 = vsel %vm1286_vm4, %v3384_v13, 0.0 }
 0x5e2   : >> { %1761 = vadd.xlane.f32.xlu0 %v1760_v15 }
 0x5f8   : >> { %1779 = vrot.lane.b32.xlu0 %v4097_v57, %s3682_s24 }
 0x5fa   : >> { %v1735_v19 = vpop.xlane.xlu1 %1734 }
 0x5fb   : >> { %v1743_v20 = vsub.f32 %v1621_v45, %v1735_v19 }
 0x5fd   : >> { %v1748_v21 = vmul.f32 1.442695, %v1743_v20 }
 0x5ff   : >> { %3385 = vpow2.f32 %v1748_v21 }
 0x602   : >> { %v1741_v28 = vpop.xlane.xlu0 %1740 }
 0x603   : >> { %v1745_v31 = vsub.f32 %v1725_v50, %v1741_v28 }
 0x605   : >> { %v1752_v32 = vmul.f32 1.442695, %v1745_v31 }
 0x607   : >> { %3387 = vpow2.f32 %v1752_v32  ;;  %v3338_v32 = vld [vmem:[%s4282_s25 + $0x8] sm:$0xff]  }
 0x609   : >> { %v3386_v24 = vpop.eup %3385 }
 0x60a   : >> { %v1757_v27 = vsel %vm1286_vm4, %v3386_v24, 0.0 }
 0x60b   : >> { %1758 = vadd.xlane.f32.xlu1 %v1757_v27 }
 0x611   : >> { %v3388_v5 = vpop.eup %3387 }
 0x612   : >> { %v1763_v57 = vsel %vm1286_vm4, %v3388_v5, 0.0 }
 0x61c   : >> { %1828 = vrot.lane.b32.xlu1 %v4150_v33, %s3682_s24 }
 0x620   : >> { %1877 = vrot.lane.b32.xlu1 %v4191_v25, %s3682_s24 }
 0x644   : >> { %1764 = vadd.xlane.f32.xlu1 %v1763_v57 }
 0x655   : >> { %1926 = vrot.lane.b32.xlu1 %v4201_v0, %s3682_s24  ;;  %s4526_s24 = sld [smem:[#allocation26_spill]] }
 0x667   : >> { %v1756_v35 = vpop.xlane.xlu0 %1755 }
 0x668   : >> { %3389 = vrcp.f32 %v1756_v35  ;;  %v3339_v35 = vld [vmem:[%s4282_s25 + $0x10] sm:$0xff]  }
 0x66f   : >> { %v1762_v37 = vpop.xlane.xlu0 %1761 }
 0x670   : >> { %3391 = vrcp.f32 %v1762_v37  ;;  %v3340_v37 = vld [vmem:[%s4282_s25 + $0x18] sm:$0xff]  }
 0x672   : >> { %v3390_v6 = vpop.eup %3389 }
 0x673   : >> { %v1770_v54 = vmul.f32 %v3390_v6, %v3382_v63  ;;  %v1780_v33 = vpop.permute.xlu0 %1779 }
 0x674   : >> { %v1785_v18 = vsel %vm1338_vm2, %v1780_v33, 0 }
 0x675   : >> { %3067 = vmatpush3.bf16.msra.mxu1 %v1785_v18  ;;  %v1774_v25 = vpack.c.bf16 %v1770_v54, %v1770_v54 }
 0x676   : >> { %3078 = vmatprep.subr.bf16.mxu1 %v3680_v44 }
 0x678   : >> { %3069 = vmatmul.mubr.msk.bf16.vlgmr.msra.gmra.mrb[24].mxu1 %vm1286_vm4, %v1774_v25 }
 0x679   : >> { %3080 = vmatprep.mubr.msk.bf16.mxu1 %vm3681_vm3, %v3680_v44 }
 0x67a   : >> { %v3392_v0 = vpop.eup %3391 }
 0x67b   : >> { %v1772_v26 = vmul.f32 %v3392_v0, %v3384_v13 }
 0x67d   : >> { %v1776_v43 = vpack.c.bf16 %v1772_v26, %v1772_v26  ;;  %v3343_v26 = vld [vmem:[%s2233_s26 + $0x10] sm:$0xff]  }
 0x698   : >> { %v1759_v22 = vpop.xlane.xlu1 %1758 }
 0x699   : >> { %3393 = vrcp.f32 %v1759_v22 }
 0x69c   : >> { %v1829_v30 = vpop.permute.xlu1 %1828 }
 0x69d   : >> { %v1834_v39 = vsel %vm1338_vm2, %v1829_v30, 0 }
 0x69e   : >> { %3073 = vmatpush3.bf16.msra.mxu0 %v1834_v39  ;;  %v3342_v39 = vld [vmem:[%s2233_s26 + $0x8] sm:$0xff]  }
 0x69f   : >> { %3084 = vmatprep.subr.bf16.mxu0 %v3680_v44 }
 0x6a0   : >> { %v1878_v40 = vpop.permute.xlu1 %1877 }
 0x6a1   : >> { %v1883_v41 = vsel %vm1338_vm2, %v1878_v40, 0  ;;  %v3344_v40 = vld [vmem:[%s2233_s26 + $0x18] sm:$0xff]  }
 0x6a2   : >> { %3079 = vmatpush3.bf16.msra.mxu1 %v1883_v41  ;;  %v3345_v41 = vld [vmem:[%s2233_s26 + $0x20] sm:$0xff]  }
 0x6a3   : >> { %v3394_v8 = vpop.eup %3393  ;;  %3090 = vmatprep.subr.bf16.mxu1 %v3333_v52 }
 0x6a4   : >> { %v1771_v45 = vmul.f32 %v3394_v8, %v3386_v24  ;;  %v3346_v8 = vld [vmem:[%s2233_s26 + $0x28] sm:$0xff]  }
 0x6a5   : >> { %3081 = vmatmul.mubr.msk.bf16.vlgmr.msra.gmra.mrb[28].mxu1 %vm1286_vm4, %v1776_v43  ;;  %v3347_v43 = vld [vmem:[%s2233_s26 + $0x30] sm:$0xff]  }
 0x6a6   : >> { %v1775_v46 = vpack.c.bf16 %v1771_v45, %v1771_v45  ;;  %3091 = vmatpush3.bf16.msra.mxu1 %v3333_v52  ;;  %v3348_v45 = vld [vmem:[%s2233_s26 + $0x38] sm:$0xff]  }
 0x6a8   : >> { %3075 = vmatmul.mubr.msk.bf16.vlgmr.msra.gmra.mrb[36].mxu0 %vm1286_vm4, %v1775_v46  ;;  %v3349_v46 = vld [vmem:[%s4336_s13] sm:$0xff]  }
 0x6a9   : >> { %3086 = vmatprep.mubr.msk.bf16.mxu0 %vm3681_vm3, %v3680_v44  ;;  %v3334_v44 = vld [vmem:[%s4282_s25 + $0x28] sm:$0xff]   ;;  %s2250_s25 = scalar_lea.vmem %s4526_s24, %s3667_s20 }
 0x6aa   : >> { %3092 = vmatprep.subr.bf16.mxu1 %v3334_v44 }
 0x6ab   : >> { %3093 = vmatpush3.bf16.msra.mxu1 %v3334_v44 }
 0x6ac   : >> { %3094 = vmatprep.subr.bf16.mxu1 %v3335_v53 }
 0x6af   : >> { %3095 = vmatpush3.bf16.msra.mxu1 %v3335_v53 }
 0x6b0   : >> { %3096 = vmatprep.subr.bf16.mxu1 %v3336_v55 }
 0x6b3   : >> { %3097 = vmatpush3.bf16.msra.mxu1 %v3336_v55 }
 0x6b4   : >> { %3102 = vmatprep.subr.bf16.mxu1 %v3337_v56 }
 0x6d1   : >> { %v1765_v47 = vpop.xlane.xlu1 %1764 }
 0x6d2   : >> { %3395 = vrcp.f32 %v1765_v47  ;;  %v3350_v47 = vld [vmem:[%s4336_s13 + $0x8] sm:$0xff]  }
 0x6d5   : >> { %v1927_v14 = vpop.permute.xlu1 %1926 }
 0x6d6   : >> { %v1932_v48 = vsel %vm1338_vm2, %v1927_v14, 0  ;;  %v3351_v14 = vld [vmem:[%s4336_s13 + $0x10] sm:$0xff]  }
 0x6d7   : >> { %3085 = vmatpush3.bf16.msra.mxu0 %v1932_v48  ;;  %v3352_v48 = vld [vmem:[%s4336_s13 + $0x18] sm:$0xff]  }
 0x6dc   : >> { %v3396_v49 = vpop.eup %3395 }
 0x6dd   : >> { %v1773_v50 = vmul.f32 %v3396_v49, %v3388_v5  ;;  %v3353_v49 = vld [vmem:[%s4336_s13 + $0x20] sm:$0xff]  }
 0x6df   : >> { %v1777_v51 = vpack.c.bf16 %v1773_v50, %v1773_v50  ;;  %v3354_v50 = vld [vmem:[%s4336_s13 + $0x28] sm:$0xff]  }
 0x6e1   : >> { %3087 = vmatmul.mubr.msk.bf16.vlgmr.msra.gmra.mrb[40].mxu0 %vm1286_vm4, %v1777_v51 }
 0x74b   : >> { %v1821_v58 = vpop.f32.mrb[24].mxu1 }
 0x74c   : >> { %v3070_v59 = vpop.f32.mrb[25].mxu1 }
 0x74d   : >> { %v1824_v60 = vpop.f32.mrb[26].mxu1 }
 0x74e   : >> { %v3071_v61 = vpop.f32.mrb[27].mxu1 }
 0x778   : >> { %v1919_v62 = vpop.f32.mrb[28].mxu1 }
 0x779   : >> { %v3082_v63 = vpop.f32.mrb[29].mxu1 }
 0x77a   : >> { %v1922_v3 = vpop.f32.mrb[30].mxu1 }
 0x77b   : >> { %v1870_v13 = vpop.f32.mrb[36].mxu0  ;;  %v3083_v15 = vpop.f32.mrb[31].mxu1 }
 0x77c   : >> { %v1974_v19 = vpack.c.bf16 %v1870_v13, %v1821_v58  ;;  %v3076_v20 = vpop.f32.mrb[37].mxu0 }
 0x77d   : >> { %v1873_v21 = vpop.f32.mrb[38].mxu0 }
 0x77e   : >> { %v3077_v24 = vpop.f32.mrb[39].mxu0  ;;  %3098 = vmatprep.mubr.msk.bf16.mxu1 %vm1101_vm1, %v1974_v19 }
 0x7b4   : >> { %v1968_v27 = vpop.f32.mrb[40].mxu0 }
 0x7b5   : >> { %v1975_v28 = vpack.c.bf16 %v1968_v27, %v1919_v62  ;;  %v3088_v31 = vpop.f32.mrb[41].mxu0 }
 0x7b6   : >> { %v1971_v5 = vpop.f32.mrb[42].mxu0 }
 0x7b7   : >> { %v3089_v57 = vpop.f32.mrb[43].mxu0  ;;  %3099 = vmatmul.mubr.msk.bf16.vlgmr.msra.gmra.mrb[32].mxu1 %vm1101_vm1, %v1975_v28 }
 0x7b8   : >> { %3103 = vmatpush3.bf16.msra.mxu1 %v3337_v56  ;;  %3110 = vmatprep.mubr.msk.bf16.mxu1 %vm1101_vm1, %v1520_v17 }
 0x7b9   : >> { %3104 = vmatprep.subr.bf16.mxu1 %v3338_v32 }
 0x7bc   : >> { %3105 = vmatpush3.bf16.msra.mxu1 %v3338_v32 }
 0x7bd   : >> { %3106 = vmatprep.subr.bf16.mxu1 %v3339_v35 }
 0x7c0   : >> { %3107 = vmatpush3.bf16.msra.mxu1 %v3339_v35 }
 0x7c1   : >> { %3108 = vmatprep.subr.bf16.mxu1 %v3340_v37 }
 0x7c4   : >> { %3109 = vmatpush3.bf16.msra.mxu1 %v3340_v37 }
 0x7c5   : >> { %3134 = vmatprep.subr.bf16.mxu1 %v3349_v46 }
 0x7c7   : >> { %3111 = vmatmul.mubr.msk.bf16.vlgmr.msra.gmra.mrb[32].mxu1 %vm1101_vm1, %v1521_v34 }
 0x7c8   : >> { %3135 = vmatpush3.bf16.msra.mxu1 %v3349_v46 }
 0x7c9   : >> { %3136 = vmatprep.subr.bf16.mxu1 %v3350_v47 }
 0x7cc   : >> { %3137 = vmatpush3.bf16.msra.mxu1 %v3350_v47 }
 0x7cd   : >> { %3138 = vmatprep.subr.bf16.mxu1 %v3351_v14 }
 0x7d0   : >> { %3139 = vmatpush3.bf16.msra.mxu1 %v3351_v14 }
 0x7d1   : >> { %3140 = vmatprep.subr.bf16.mxu1 %v3352_v48 }
 0x7d4   : >> { %3141 = vmatpush3.bf16.msra.mxu1 %v3352_v48 }
 0x7d5   : >> { %3142 = vmatprep.subr.bf16.mxu1 %v3353_v49 }
 0x7d8   : >> { %3143 = vmatpush3.bf16.msra.mxu1 %v3353_v49 }
 0x7d9   : >> { %3144 = vmatprep.subr.bf16.mxu1 %v3354_v50 }
 0x7dc   : >> { %3145 = vmatpush3.bf16.msra.mxu1 %v3354_v50  ;;  %v3355_v50 = vld [vmem:[%s4336_s13 + $0x30] sm:$0xff]  }
 0x7dd   : >> { %3146 = vmatprep.subr.bf16.mxu1 %v3355_v50 }
 0x7e0   : >> { %3147 = vmatpush3.bf16.msra.mxu1 %v3355_v50 }
 0x89a   : >> { %v3112_v16 = vpop.f32.mrb[32].mxu1 }
 0x89b   : >> { %v2144_v17 = vadd.f32 %v3112_v16, %v2853_v2  ;;  %v2119_v6 = vpop.f32.mrb[33].mxu1 }
 0x89c   : >> { %v3113_v54 = vpop.f32.mrb[34].mxu1  ;;  %v2142_v18 = vadd.f32 %v2853_v2, %v2119_v6 }
 0x89d   : >> { %v4307_v33 = vadd.f32 %v2144_v17, %v4083_v42  ;;  %v2122_v25 = vpop.f32.mrb[35].mxu1  ;;  %v2145_v23 = vadd.f32 %v3113_v54, %v2853_v2 }
 0x89e   : >> { %v2143_v22 = vadd.f32 %v2853_v2, %v2122_v25  ;;  %v4314_v34 = vadd.f32 %v2142_v18, %v4077_v36 }
 0x89f   : >> { %2158 = vadd.xlane.f32.xlu0 %v4307_v33  ;;  %v4319_v42 = vadd.f32 %v2145_v23, %v4085_v7  ;;  %v2168_v30 = vmul.f32 %v4307_v33, %v4307_v33  ;;  %v3341_v7 = vld [vmem:[%s2233_s26] sm:$0xff]   ;;  %s2379_s26 = scalar_lea.vmem %s4527_s27, %s3667_s20  ;;  %s692_s20 = sadd.s32 1, %s3667_s20  }
 0x8a0   : >> { %v4311_v29 = vadd.f32 %v2143_v22, %v4079_v38  ;;  %v2166_v36 = vmul.f32 %v4314_v34, %v4314_v34  ;;  %3114 = vmatprep.subr.bf16.mxu0 %v3341_v7  ;;  %v2854_v23 = vld [vmem:[%s2150_s22] ss:$0 sm:$0xff]  ;;  %p689_p2 = scmp.ge.s32.totalorder %s692_s20, 2  }
 0x8a1   : >> { %v2169_v38 = vmul.f32 %v4319_v42, %v4319_v42  ;;  %3115 = vmatpush3.bf16.msra.mxu0 %v3341_v7  ;;  %s4536_s15 = sld [smem:[#allocation28_spill]] (%p689_p2)  ;;  %s4537_s18 = sld [smem:[#allocation29_spill]] (%p689_p2) }
 0x8a2   : >> { %2156 = vadd.xlane.f32.xlu1 %v4311_v29  ;;  %v2167_v0 = vmul.f32 %v4311_v29, %v4311_v29  ;;  %3116 = vmatprep.subr.bf16.mxu0 %v3342_v39  ;;  %s4538_s30 = sld [smem:[#allocation21_spill]] (%p689_p2)  ;;  %s2612_s21 = sshll.u32 (%p689_p2), %s3987_s1, 4  ;;  %s4419_s21 = int_to_ptr.vmem [resolvable:$true] %s2612_s21 }
 0x8a3   : >> { %2154 = vadd.xlane.f32.xlu0 %v4314_v34  ;;  %s4424_s2 = scalar_lea.sflag (%p689_p2), [#allocation4], %s656_s19  ;;  %s3683_s27 = smov (%p689_p2), [#allocation11]  }
 0x8a5   : >> { %3117 = vmatpush3.bf16.msra.mxu0 %v3342_v39 }
 0x8a6   : >> { %2172 = vadd.xlane.f32.xlu1 %v2167_v0  ;;  %3118 = vmatprep.subr.bf16.mxu0 %v3343_v26 }
 0x8a7   : >> { %2160 = vadd.xlane.f32.xlu0 %v4319_v42 }
 0x8a8   : > { %p4540_p4 = scmp.ne.s32.totalorder (%p689_p2), %s4538_s30, 0 }
 0x8a9   : >> { %3119 = vmatpush3.bf16.msra.mxu0 %v3343_v26 }
 0x8aa   : >> { %2176 = vadd.xlane.f32.xlu1 %v2169_v38  ;;  %3120 = vmatprep.subr.bf16.mxu0 %v3344_v40 }
 0x8ab   : >> { %2170 = vadd.xlane.f32.xlu0 %v2166_v36 }
 0x8ad   : >> { %3121 = vmatpush3.bf16.msra.mxu0 %v3344_v40 }
 0x8ae   : >> { %3122 = vmatprep.subr.bf16.mxu0 %v3345_v41 }
 0x8af   : >> { %2174 = vadd.xlane.f32.xlu0 %v2168_v30 }
 0x8b1   : >> { %3123 = vmatpush3.bf16.msra.mxu0 %v3345_v41 }
 0x8b2   : >> { %3124 = vmatprep.subr.bf16.mxu0 %v3346_v8 }
 0x8b5   : >> { %3125 = vmatpush3.bf16.msra.mxu0 %v3346_v8 }
 0x8b6   : >> { %3126 = vmatprep.subr.bf16.mxu0 %v3347_v43 }
 0x8b9   : >> { %3127 = vmatpush3.bf16.msra.mxu0 %v3347_v43 }
 0x8ba   : >> { %3128 = vmatprep.subr.bf16.mxu0 %v3348_v45 }
 0x8bb   : >> { %2495 = vperm.xlu1 %3300, %v3981_v10  }
 0x8bd   : >> { %3129 = vmatpush3.bf16.msra.mxu0 %v3348_v45 }
 0x8bf   : >> { %2500 = vperm.xlu1 %3300, %v3983_v11  }
 0x8c3   : >> { %2505 = vperm.xlu1 %3300, %v3985_v12  }
 0x8c5   : >> { %2490 = vperm.xlu0 %3299, %v3979_v9  }
 0x92c   : >> { %v2159_v51 = vpop.xlane.xlu0 %2158 }
 0x92d   : >> { %v2164_v20 = vmul.f32 0.03125, %v2159_v51  ;;  %v3356_v51 = vld [vmem:[%s4336_s13 + $0x38] sm:$0xff]  }
 0x92e   : >> { %3148 = vmatprep.subr.bf16.mxu1 %v3356_v51 }
 0x92f   : >> { %v2157_v52 = vpop.xlane.xlu1 %2156  ;;  %v2184_v57 = vmul.f32 %v2164_v20, %v2164_v20  ;;  %v2196_v40 = vsub.f32 %v4307_v33, %v2164_v20  ;;  %3149 = vmatpush3.bf16.msra.mxu1 %v3356_v51  ;;  %v2857_v33 = vld [vmem:[%s2250_s25] ss:$0 sm:$0xff]  ;;  %s4539_s25 = sld [smem:[#allocation30_spill]] (%p689_p2) }
 0x930   : >> { %v2163_v44 = vmul.f32 0.03125, %v2157_v52  ;;  %v2155_v53 = vpop.xlane.xlu0 %2154  ;;  %v2867_v20 = vld [vmem:[%s2379_s26] ss:$0 sm:$0xff]  ;;  %s3557_s26 = sshll.u32 (%p689_p2), %s3683_s27, 4  ;;  %s3558_s26 = int_to_ptr.vmem [resolvable:$false] %s3557_s26 }
 0x931   : >> { %v2162_v60 = vmul.f32 0.03125, %v2155_v53  ;;  %s3559_s20 = scalar_lea.vmem (%p689_p2), %s3558_s26, 512  ;;  %p3560_p11 = scmp.lt.s32.totalorder (%p689_p2), %s4419_s21, %s3558_s26 }
 0x932   : >> { %v2183_v56 = vmul.f32 %v2163_v44, %v2163_v44  ;;  %v2195_v25 = vsub.f32 %v4311_v29, %v2163_v44  ;;  %v2855_v29 = vld [vmem:[%s2152_s29] ss:$0 sm:$0xff]  ;;  %s2888_s29 = sshll.u32 (%p689_p2), %s3802_s0, 8  ;;  %s3553_s0 = scalar_lea.vmem (%p689_p2), %s4419_s21, 256 }
 0x933   : >> { %v2173_v55 = vpop.xlane.xlu1 %2172  ;;  %v2182_v21 = vmul.f32 %v2162_v60, %v2162_v60  ;;  %v2194_v38 = vsub.f32 %v4314_v34, %v2162_v60  ;;  %p3554_p3 = scmp.ne.s32.totalorder (%p689_p2), %s4419_s21, %s3553_s0  ;;  %p3561_p5 = scmp.lt.s32.totalorder (%p689_p2), %s3559_s20, %s3553_s0 }
 0x934   : >> { %v2179_v58 = vmul.f32 0.03125, %v2173_v55  ;;  %v2161_v59 = vpop.xlane.xlu0 %2160 }
 0x935   : >> { %v2165_v61 = vmul.f32 0.03125, %v2161_v59  ;;  %s4417_s16 = scalar_lea.hbm (%p689_p2), %s4539_s25, %s2888_s29  ;;  %p3555_p7 = pnand (%p689_p2), %p3554_p3, %p4540_p4 }
 0x936   : >> { %v2187_v62 = vsub.f32 %v2179_v58, %v2183_v56  ;;  %p3562_p0 = por (%p689_p2), %p3561_p5, %p3560_p11 }
 0x937   : >> { %v2185_v63 = vmul.f32 %v2165_v61, %v2165_v61  ;;  %v2177_v3 = vpop.xlane.xlu1 %2176  ;;  %v2197_v36 = vsub.f32 %v4319_v42, %v2165_v61  ;;  %p3556_p8 = pneg (%p689_p2), %p3555_p7 }
 0x938   : >> { %v2191_v13 = vmax.f32 %v2187_v62, 0.0  ;;  %v2181_v15 = vmul.f32 0.03125, %v2177_v3  ;;  %v2171_v19 = vpop.xlane.xlu0 %2170 }
 0x939   : >> { %v2178_v24 = vmul.f32 0.03125, %v2171_v19  ;;  %p3563_p6 = pnand (%p689_p2), %p3562_p0, %p3556_p8 }
 0x93a   : >> { %v2199_v27 = vadd.f32 1e-08, %v2191_v13  ;;  %v2189_v28 = vsub.f32 %v2181_v15, %v2185_v63 }
 0x93b   : >> { %v2186_v31 = vsub.f32 %v2178_v24, %v2182_v21  ;;  %v2496_v19 = vpop.permute.xlu1 %2495 }
 0x93c   : >> { %3397 = vrsqrt.f32 %v2199_v27  ;;  %v2193_v32 = vmax.f32 %v2189_v28, 0.0  ;;  %v2175_v5 = vpop.xlane.xlu0 %2174 }
 0x93d   : >> { %v2190_v35 = vmax.f32 %v2186_v31, 0.0  ;;  %v2180_v37 = vmul.f32 0.03125, %v2175_v5 }
 0x93e   : >> { %v2201_v2 = vadd.f32 1e-08, %v2193_v32 }
 0x93f   : >> { %v2198_v16 = vadd.f32 1e-08, %v2190_v35  ;;  %v2188_v17 = vsub.f32 %v2180_v37, %v2184_v57  ;;  %v2501_v21 = vpop.permute.xlu1 %2500 }
 0x940   : >> { %3399 = vrsqrt.f32 %v2201_v2 }
 0x941   : >> { %3401 = vrsqrt.f32 %v2198_v16  ;;  %v2192_v6 = vmax.f32 %v2188_v17, 0.0 }
 0x943   : >> { %v2200_v54 = vadd.f32 1e-08, %v2192_v6 }
 0x944   : >> { %v2491_v37 = vpop.permute.xlu0 %2490 }
 0x945   : >> { %3403 = vrsqrt.f32 %v2200_v54  ;;  %v2506_v54 = vpop.permute.xlu1 %2505 }
 0x946   : >> { %v3398_v18 = vpop.eup %3397 }
 0x947   : >> { %v2207_v22 = vmul.f32 %v3398_v18, %v2195_v25 }
 0x949   : >> { %v2217_v39 = vmul.f32 %v2854_v23, %v2207_v22 }
 0x94a   : >> { %v3400_v0 = vpop.eup %3399 }
 0x94b   : >> { %v3402_v30 = vpop.eup %3401  ;;  %v2209_v26 = vmul.f32 %v3400_v0, %v2197_v36  ;;  %v2227_v45 = vadd.f32 %v2855_v29, %v2217_v39 }
 0x94c   : >> { %v2206_v7 = vmul.f32 %v3402_v30, %v2194_v38 }
 0x94d   : >> { %v2219_v42 = vmul.f32 %v2854_v23, %v2209_v26 }
 0x94e   : >> { %v2216_v41 = vmul.f32 %v2854_v23, %v2206_v7 }
 0x94f   : >> { %v3404_v8 = vpop.eup %3403  ;;  %v2229_v48 = vadd.f32 %v2855_v29, %v2219_v42 }
 0x950   : >> { %v2226_v43 = vadd.f32 %v2855_v29, %v2216_v41  ;;  %v2208_v34 = vmul.f32 %v3404_v8, %v2196_v40 }
 0x952   : >> { %v2230_v46 = vpack.c.bf16 %v2227_v45, %v2226_v43  ;;  %v2218_v47 = vmul.f32 %v2854_v23, %v2208_v34 }
 0x954   : >> { %3130 = vmatprep.mubr.bf16.mxu0 %v2230_v46  ;;  %v2228_v14 = vadd.f32 %v2855_v29, %v2218_v47 }
 0x956   : >> { %v2231_v49 = vpack.c.bf16 %v2229_v48, %v2228_v14 }
 0x958   : >> { %3131 = vmatmul.mubr.bf16.vlgmr.msra.gmra.mrb[44].mxu0 %v2231_v49 }
 0xa2b   : >> { %v3132_v52 = vpop.f32.mrb[44].mxu0 }
 0xa2c   : >> { %v2349_v44 = vadd.f32 %v3132_v52, %v2857_v33  ;;  %v2340_v53 = vpop.f32.mrb[45].mxu0 }
 0xa2d   : >> { %v2341_v55 = vadd.f32 %v2857_v33, %v2340_v53  ;;  %v3133_v56 = vpop.f32.mrb[46].mxu0 }
 0xa2e   : >> { %v2352_v58 = vadd.f32 %v3133_v56, %v2857_v33  ;;  %v2343_v59 = vpop.f32.mrb[47].mxu0  ;;  %v2357_v61 = vmax.f32 %v2349_v44, 0.0 }
 0xa2f   : >> { %v2344_v60 = vadd.f32 %v2857_v33, %v2343_v59  ;;  %v2355_v63 = vmax.f32 %v2341_v55, 0.0 }
 0xa30   : >> { %v2358_v62 = vmax.f32 %v2352_v58, 0.0 }
 0xa31   : >> { %v2356_v3 = vmax.f32 %v2344_v60, 0.0 }
 0xa32   : >> { %v2360_v13 = vpack.c.bf16 %v2358_v62, %v2357_v61 }
 0xa33   : >> { %v2359_v15 = vpack.c.bf16 %v2356_v3, %v2355_v63  ;;  %v2876_v63 = vld [vmem:[%s4536_s15] ss:$0 sm:$0xff] (%p689_p2) }
 0xa35   : >> { %3150 = vmatprep.mubr.bf16.mxu1 %v2359_v15 }
 0xa36   : >> { %3151 = vmatmul.mubr.bf16.vlgmr.msra.gmra.mrb[36].mxu1 %v2360_v13 }
 0xb09   : >> { %v3152_v24 = vpop.f32.mrb[36].mxu1 }
 0xb0a   : >> { %v2478_v27 = vadd.f32 %v3152_v24, %v2867_v20  ;;  %v2469_v28 = vpop.f32.mrb[37].mxu1 }
 0xb0b   : >> { %v2470_v31 = vadd.f32 %v2867_v20, %v2469_v28  ;;  %v3153_v32 = vpop.f32.mrb[38].mxu1 }
 0xb0c   : >> { %v2486_v5 = vadd.f32 %v2478_v27, %v2228_v14  ;;  %v2481_v57 = vadd.f32 %v3153_v32, %v2867_v20  ;;  %v2472_v35 = vpop.f32.mrb[39].mxu1 }
 0xb0d   : >> { %v2473_v2 = vadd.f32 %v2867_v20, %v2472_v35  ;;  %v2484_v16 = vadd.f32 %v2470_v31, %v2226_v43 }
 0xb0e   : >> { %v4366_v7 = vmul.f32 %v2501_v21, %v2486_v5   ;;  %v2487_v6 = vadd.f32 %v2481_v57, %v2229_v48  ;;  %691 = sbr.rel (!%p689_p2) target bundleno = 172 (0xac), region = 172 }
 0xb0f   : >> { %v2485_v18 = vadd.f32 %v2473_v2, %v2227_v45  ;;  %v4368_v5 = vmul.f32 %v2491_v37, %v2484_v16  }
 0xb10   : >> { %v4528_v17 = vmov %v4366_v7  ;;  %v4370_v8 = vmul.f32 %v2506_v54, %v2487_v6  }
 0xb11   : >> { %v4529_v25 = vmov %v4368_v5  ;;  %v4372_v6 = vmul.f32 %v2496_v19, %v2485_v18   ;;  %v4533_v7 = vmov %v4528_v17  ;;  %2518 = vadd.xlane.f32.xlu1 (%p689_p2), %v4528_v17  ;;  %v2528_v1 = vmul.f32 (%p689_p2), %v4528_v17, %v4528_v17  ;;  %v2877_v19 = vld [vmem:[%s4537_s18] ss:$0 sm:$0xff] (%p689_p2) }
 0xb12   : >> { %v4530_v22 = vmov %v4370_v8  ;;  %v4535_v5 = vmov %v4529_v25  ;;  %2514 = vadd.xlane.f32.xlu0 (%p689_p2), %v4529_v25  ;;  %v2526_v38 = vmul.f32 (%p689_p2), %v4529_v25, %v4529_v25 }
 0xb13   : >> { %v4531_v23 = vmov %v4372_v6  ;;  %v4532_v8 = vmov %v4530_v22  ;;  %v2529_v36 = vmul.f32 (%p689_p2), %v4530_v22, %v4530_v22 }
 0xb14   : >> { %v4534_v6 = vmov %v4531_v23  ;;  %v2527_v0 = vmul.f32 (%p689_p2), %v4531_v23, %v4531_v23 }
 0xb15   : > { %2520 = vadd.xlane.f32.xlu1 %v4530_v22 }
 0xb16   : > { %2516 = vadd.xlane.f32.xlu0 %v4531_v23 }
 0xb19   : > { %2532 = vadd.xlane.f32.xlu1 %v2527_v0 }
 0xb1a   : > { %2530 = vadd.xlane.f32.xlu0 %v2526_v38 }
 0xb1d   : > { %2536 = vadd.xlane.f32.xlu1 %v2529_v36 }
 0xb1e   : > { %2534 = vadd.xlane.f32.xlu0 %v2528_v1 }
 0xb9e   : > { %v2519_v4 = vpop.xlane.xlu1 %2518 }
 0xb9f   : > { %v2515_v9 = vpop.xlane.xlu0 %2514  ;;  %v2524_v7 = vmul.f32 0.03125, %v2519_v4 }
 0xba0   : > { %v2522_v12 = vmul.f32 0.03125, %v2515_v9 }
 0xba1   : > { %v2544_v42 = vmul.f32 %v2524_v7, %v2524_v7  ;;  %v2556_v27 = vsub.f32 %v4528_v17, %v2524_v7 }
 0xba2   : > { %v2521_v10 = vpop.xlane.xlu1 %2520  ;;  %v2542_v40 = vmul.f32 %v2522_v12, %v2522_v12  ;;  %v2554_v62 = vsub.f32 %v4529_v25, %v2522_v12 }
 0xba3   : > { %v2517_v11 = vpop.xlane.xlu0 %2516  ;;  %v2525_v39 = vmul.f32 0.03125, %v2521_v10 }
 0xba4   : > { %v2523_v30 = vmul.f32 0.03125, %v2517_v11 }
 0xba5   : > { %v2545_v46 = vmul.f32 %v2525_v39, %v2525_v39  ;;  %v2557_v20 = vsub.f32 %v4530_v22, %v2525_v39 }
 0xba6   : > { %v2533_v26 = vpop.xlane.xlu1 %2532  ;;  %v2543_v41 = vmul.f32 %v2523_v30, %v2523_v30  ;;  %v2555_v60 = vsub.f32 %v4531_v23, %v2523_v30 }
 0xba7   : > { %v2531_v29 = vpop.xlane.xlu0 %2530  ;;  %v2539_v8 = vmul.f32 0.03125, %v2533_v26 }
 0xba8   : > { %v2538_v43 = vmul.f32 0.03125, %v2531_v29 }
 0xba9   : > { %v2547_v45 = vsub.f32 %v2539_v8, %v2543_v41 }
 0xbaa   : > { %v2546_v34 = vsub.f32 %v2538_v43, %v2542_v40  ;;  %v2537_v47 = vpop.xlane.xlu1 %2536 }
 0xbab   : > { %v2535_v14 = vpop.xlane.xlu0 %2534  ;;  %v2551_v48 = vmax.f32 %v2547_v45, 0.0  ;;  %v2541_v50 = vmul.f32 0.03125, %v2537_v47 }
 0xbac   : > { %v2550_v49 = vmax.f32 %v2546_v34, 0.0  ;;  %v2540_v51 = vmul.f32 0.03125, %v2535_v14 }
 0xbad   : > { %v2559_v33 = vadd.f32 1e-08, %v2551_v48  ;;  %v2549_v44 = vsub.f32 %v2541_v50, %v2545_v46 }
 0xbae   : > { %v2558_v52 = vadd.f32 1e-08, %v2550_v49  ;;  %v2548_v53 = vsub.f32 %v2540_v51, %v2544_v42 }
 0xbaf   : > { %3405 = vrsqrt.f32 %v2559_v33  ;;  %v2553_v55 = vmax.f32 %v2549_v44, 0.0 }
 0xbb0   : > { %v2552_v56 = vmax.f32 %v2548_v53, 0.0  ;;  %3407 = vrsqrt.f32 %v2558_v52 }
 0xbb1   : > { %v2561_v58 = vadd.f32 1e-08, %v2553_v55 }
 0xbb2   : > { %v2560_v59 = vadd.f32 1e-08, %v2552_v56 }
 0xbb3   : > { %3409 = vrsqrt.f32 %v2561_v58 }
 0xbb4   : > { %3411 = vrsqrt.f32 %v2560_v59 }
 0xbb9   : > { %v3406_v61 = vpop.eup %3405 }
 0xbba   : > { %v3408_v3 = vpop.eup %3407  ;;  %v2567_v13 = vmul.f32 %v3406_v61, %v2555_v60 }
 0xbbb   : > { %v2566_v15 = vmul.f32 %v3408_v3, %v2554_v62 }
 0xbbc   : > { %v2577_v21 = vmul.f32 %v2876_v63, %v2567_v13 }
 0xbbd   : > { %v3410_v24 = vpop.eup %3409  ;;  %v2576_v28 = vmul.f32 %v2876_v63, %v2566_v15 }
 0xbbe   : > { %v3412_v31 = vpop.eup %3411  ;;  %v2569_v32 = vmul.f32 %v3410_v24, %v2557_v20  ;;  %v2587_v5 = vadd.f32 %v2877_v19, %v2577_v21 }
 0xbbf   : > { %v2568_v57 = vmul.f32 %v3412_v31, %v2556_v27  ;;  %v2586_v35 = vadd.f32 %v2877_v19, %v2576_v28 }
 0xbc0   : > { %v2579_v37 = vmul.f32 %v2876_v63, %v2569_v32 }
 0xbc1   : > { %v2578_v2 = vmul.f32 %v2876_v63, %v2568_v57  ;;  %v2892_v16 = vpack.c.bf16 %v2587_v5, %v2586_v35 }
 0xbc2   : > { %v2589_v6 = vadd.f32 %v2877_v19, %v2579_v37 }
 0xbc3   : > { %v2588_v54 = vadd.f32 %v2877_v19, %v2578_v2  ;;  %2893 = vst [vmem:[%s3987_s1] sm:$0xff] %v2892_v16  }
 0xbc5   : > { %v2897_v17 = vpack.c.bf16 %v2589_v6, %v2588_v54 }
 0xbc7   : > { %2899 = vst [vmem:[%s3987_s1 + $0x8] sm:$0xff] %v2897_v17  }
 0xbc8   : > { %3566 = shalt.err (!%p3563_p6)
}
 0xbc9   : > { %s3567_s19 = scalar_lea.hbm %s4417_s16, 256  ;;  %s3571_s15 = scalar_lea.hbm %s4539_s25, 512 }
 0xbca   : > { %p3568_p9 = scmp.ne.s32.totalorder %s4417_s16, %s3567_s19  ;;  %p3572_p12 = scmp.lt.u32.totalorder %s4417_s16, %s4539_s25 }
 0xbcb   : > { %p3573_p1 = scmp.lt.u32.totalorder %s3571_s15, %s3567_s19  ;;  %p3575_p3 = scmp.lt.u32.totalorder %s3567_s19, %s4417_s16 }
 0xbcc   : > { %p3569_p10 = pnand %p3568_p9, %p4540_p4 }
 0xbcd   : > { %p3574_p2 = por %p3573_p1, %p3572_p12 }
 0xbce   : > { %p3570_p13 = pneg %p3569_p10 }
 0xbcf   : > { %p3576_p7 = por %p3575_p3, %p3574_p2 }
 0xbd1   : > { %p3577_p8 = pnand %p3576_p7, %p3570_p13 }
 0xbd3   : > { %3580 = shalt.err (!%p3577_p8)
}
 0xbd4   : > { %s3684_s18 = smov 64   ;;  %s3685_s29 = smov 4  }
 0xbd5   : > { %3178 = dma.vmem_to_hbm [thread:$0]  (%p4540_p4), %s4419_s21, 256, %s4417_s16, %s4424_s2, %s3684_s18, %s3684_s18, %s3685_s29  }
 0xbd6 PF: > { %s4541_s23 = sld [smem:[#allocation18_spill]]  ;;  %s4542_s24 = sld [smem:[#allocation16_spill]] }
 0xbd7   : > { %s4543_s0 = sld [smem:[#allocation22_spill]] }
 0xbdc   : > { %p3210_p11 = scmp.ge.s32.totalorder %s4541_s23, 2  ;;  %s2627_s27 = sand.u32 1, %s4542_s24  }
 0xbdd   : > { %p4544_p5 = scmp.ne.s32.totalorder %s4543_s0, 0  ;;  %s2628_s26 = scalar_lea.sflag [#allocation4], %s2627_s27 }
 0xbdf   : > { %p3197_p0 = pnand %p3210_p11, %p4544_p5 }
 0xbe1   : > { %3630 = dma.done.wait (!%p3197_p0), %s2628_s26, 256  }
 0xbe2   : > { %3632 = vsyncadd (!%p3197_p0), %s2628_s26, 4294967040  ;;  %s4545_s30 = sld [smem:[#allocation19_spill]]  ;;  %s4546_s20 = sld [smem:[#allocation17_spill]] }
 0xbe3   : > { %s4547_s29 = sld [smem:[#allocation20_spill]]  ;;  %s4548_s27 = smov %s3639_s28 }
 0xbe8   : > { %p31_p6 = scmp.ge.s32.totalorder %s4545_s30, 4   ;;  %s4549_s28 = smov %s4546_s20 }
 0xbea   :  { %33 = sbr.rel (!%p31_p6) target bundleno = 15 (0xf), region = 183 }
 0xbf1   :  { %2633 = vsyncpa [#allocation3], 1 }
 0xbf2   :  { %2635 = vsyncpa [#allocation3 + $0x1], 1 }
 0xbf3   :  { %2636 = vsyncpa [#allocation6], 1 }
 0xbf4   :  { %2637 = vsyncpa [#allocation9], 1 }
 0xbf5   :  { %2638 = vsyncpa [#allocation4], 1 }
 0xbf6   :  { %2640 = vsyncpa [#allocation4 + $0x1], 1 }

</bundles_post_ra>
